<compile_context>
chip_gen: v6e
topology: v6e:2x2x1
jax: 0.10.0
libtpu: 0.0.40
codegen_flags: <defaults>
</compile_context>

<pallas_src>
import functools

import jax
import jax.numpy as jnp
from jax.experimental import pallas as pl
from jax.experimental.pallas import tpu as pltpu

K = 3          # kernel size
S = 1          # stride
P = 1          # padding
EPS = 1e-5     # BatchNorm eps
LANES = 128
SUBLANES = 8

# MXU operand dtype. bf16 is the native MXU path on v5e/v6e/v7x and halves the
# im2col / weight VMEM footprint and DMA bytes; accumulation and BN statistics
# stay f32. Set to jnp.float32 to reproduce the f32 reference to ~2e-3.
MATMUL_DTYPE = jnp.bfloat16
# Cross-stage intermediate dtype (raw conv#1 output) in HBM.
INTER_DTYPE = jnp.bfloat16


def _round_up(x, m):
    return (x + m - 1) // m * m


def _largest_divisor_leq(n, cap):
    cap = max(1, min(n, cap))
    for d in range(cap, 0, -1):
        if n % d == 0:
            return d
    return 1


def _pick_tile_h(H, W, C):
    # Keep the stage-2 im2col buffer (TH*W, 9*C) in bf16 around <=2 MiB so the
    # double-buffered working set stays well inside v7x's 64 MiB VMEM while
    # still amortizing the ~0.35us/step grid overhead.
    row_bytes = max(1, W * K * K * C * 2)
    cap = max(1, min(32, (2 * 1024 * 1024) // row_bytes))
    return _largest_divisor_leq(H, cap)


def _vmem_limit_bytes():
    # Per-generation cap: ~56 MiB on v7x (64 MiB physical VMEM per TC),
    # ~110 MiB on v5e/v6e (128 MiB physical), with headroom for compiler
    # scratch.
    try:
        cap = pltpu.get_tpu_info().vmem_capacity_bytes
    except Exception:
        cap = 64 * 1024 * 1024
    return int(min(cap - cap // 8, 110 * 1024 * 1024))


def _make_conv1_kernel(TH, Wc, Cin, Cout, Cw):
    """Conv#1 over a TH-row tile (one im2col MXU matmul, halo columns included)
    plus per-channel sum / sum-of-squares partial BN#1 statistics."""

    def kernel(xp_ref, w_ref, wm_ref, conv_ref, stats_ref):
        j = pl.program_id(1)

        @pl.when(j == 0)
        def _init():
            stats_ref[...] = jnp.zeros_like(stats_ref)

        r0 = j * TH
        xw = xp_ref[0, pl.ds(r0, TH + 2 * P), :, :]          # (TH+2, Wc+2, Cin)

        # One (TH*Wc, 9*Cin) patch matrix -> ONE MXU matmul. The Wc output
        # columns include the 1-column halo ring (+ sublane padding), so the
        # store below stays aligned and stage 2 never shifts the activation.
        cols = jnp.concatenate(
            [xw[dy:dy + TH, dx:dx + Wc, :] for dy in range(K) for dx in range(K)],
            axis=-1).reshape(TH * Wc, K * K * Cin)
        acc = jnp.dot(cols.astype(MATMUL_DTYPE), w_ref[...],
                      preferred_element_type=jnp.float32)    # (TH*Wc, Cw)
        if Cw != Cout:
            acc = acc[:, :Cout]

        # BN#1 partial statistics over the true (interior) columns only.
        a = acc * wm_ref[...]
        s = jnp.sum(a, axis=0, keepdims=True)                # (1, Cout)
        ss = jnp.sum(a * acc, axis=0, keepdims=True)
        stats_ref[...] += jnp.concatenate([s, ss], axis=0).reshape(1, 2, Cout)

        conv_ref[...] = acc.reshape(1, TH, Wc, Cout).astype(conv_ref.dtype)

    return kernel


def _make_conv2_kernel(TH, H, W, Wc, Cmid, Cout, Cw):
    """BN#1 apply + ReLU (mask-zeroed halo) + conv#2 (im2col matmul) + BN#2
    partial statistics over a TH-row tile. The full conv#1 image of one batch
    element stays VMEM-resident across its row tiles (input block ignores j)."""

    def kernel(x_ref, sc_ref, sh_ref, w_ref, wm_ref, conv_ref, stats_ref):
        j = pl.program_id(1)

        @pl.when(j == 0)
        def _init():
            stats_ref[...] = jnp.zeros_like(stats_ref)

        r0 = j * TH
        sc = sc_ref[...]                                     # (1, Cmid) f32
        sh = sh_ref[...]

        def act(v):
            return jnp.maximum(v.astype(jnp.float32) * sc + sh, 0.0)

        # TH center rows plus one halo row above/below. Halo rows are clamped
        # at the image edge and zeroed post-activation; halo / padding columns
        # are zeroed by the column mask -> no shifted zero-pad copy.
        top = act(x_ref[0, pl.ds(jnp.maximum(r0 - P, 0), 1), :, :])
        mid = act(x_ref[0, pl.ds(r0, TH), :, :])
        bot = act(x_ref[0, pl.ds(jnp.minimum(r0 + TH, H - 1), 1), :, :])
        top = top * (r0 > 0).astype(jnp.float32)
        bot = bot * (r0 + TH < H).astype(jnp.float32)
        yp = jnp.concatenate([top, mid, bot], axis=0) * wm_ref[...]
        # yp: (TH+2, Wc, Cmid); columns [1, W+1) hold the activation, columns
        # 0 and W+1 are the zero padding that conv#2's taps read.

        cols = jnp.concatenate(
            [yp[dy:dy + TH, dx:dx + W, :] for dy in range(K) for dx in range(K)],
            axis=-1).reshape(TH * W, K * K * Cmid)
        acc = jnp.dot(cols.astype(MATMUL_DTYPE), w_ref[...],
                      preferred_element_type=jnp.float32)    # (TH*W, Cw)
        if Cw != Cout:
            acc = acc[:, :Cout]

        s = jnp.sum(acc, axis=0, keepdims=True)
        ss = jnp.sum(acc * acc, axis=0, keepdims=True)
        stats_ref[...] += jnp.concatenate([s, ss], axis=0).reshape(1, 2, Cout)

        conv_ref[...] = acc.reshape(1, TH, W, Cout).astype(conv_ref.dtype)

    return kernel


def _bn_affine(stats, gamma, beta, count):
    """(sum, sumsq) -> per-channel BN scale/shift (training-mode batch stats,
    biased variance). O(C) work, done in XLA between the kernels."""
    mean = stats[0] / count
    var = jnp.maximum(stats[1] / count - mean * mean, 0.0)
    # TODO(synk): shifted / Welford-style combine for production N*H*W where
    #             E[x^2]-E[x]^2 in f32 can cancel catastrophically.
    scale = gamma * jax.lax.rsqrt(var + EPS)
    shift = beta - mean * scale
    return scale[None, :].astype(jnp.float32), shift[None, :].astype(jnp.float32)


@functools.partial(jax.jit, static_argnames=("tile_h",))
def double_conv_forward(x_nchw, w1, g1, b1, w2, g2, b2, tile_h=None):
    """x_nchw: (N, Cin, H, W); weights in PyTorch OIHW layout. -> (N, Cout, H, W)."""
    N, Cin, H, W = x_nchw.shape
    Cout = w1.shape[0]
    # Lane-pad only the matmul RHS (and only when Cout is at least one lane
    # row); intermediates are stored at Cout channels -- for small Cout a
    # masked store is far cheaper than 128/Cout x more HBM bytes.
    Cw = Cout if Cout < LANES else _round_up(Cout, LANES)
    Wc = _round_up(W + 2 * P, SUBLANES)   # conv#1 stored width (halo + sublane pad)
    Wi = Wc + 2 * P                       # stage-1 padded input width
    Hp = H + 2 * P
    TH = _largest_divisor_leq(H, tile_h) if tile_h else _pick_tile_h(H, W, Cout)
    nH = H // TH
    count = float(N * H * W)

    # ---- layout glue (XLA): NCHW -> NHWC, spatial zero pad, weight repack ---
    x_nhwc = jnp.transpose(x_nchw, (0, 2, 3, 1)).astype(jnp.float32)
    x_pad = jnp.pad(x_nhwc, ((0, 0), (P, P), (2 * P, Wi - W - 2 * P), (0, 0)))

    def repack_w(w, cin):
        # (Cout, cin, K, K) -> (K*K*cin, Cw) in (ky, kx, cin) row order.
        wk = jnp.transpose(w, (2, 3, 1, 0)).reshape(K * K * cin, Cout)
        if Cw != Cout:
            wk = jnp.pad(wk, ((0, 0), (0, Cw - Cout)))
        return wk.astype(MATMUL_DTYPE)

    w1m = repack_w(w1, Cin)                                 # (9*Cin,  Cw)
    w2m = repack_w(w2, Cout)                                # (9*Cout, Cw)

    # Interior-column masks: halo / sublane-pad columns do not enter the BN
    # statistics and become conv#2's zero padding after BN+ReLU.
    col = jnp.arange(Wc)
    col_mask = ((col >= P) & (col < P + W)).astype(jnp.float32)
    wm1 = jnp.tile(col_mask, (TH,)).reshape(TH * Wc, 1)     # stage-1 stats mask
    wm2 = col_mask.reshape(1, Wc, 1)                        # stage-2 halo mask

    cparams = pltpu.CompilerParams(
        dimension_semantics=("parallel", "arbitrary"),
        vmem_limit_bytes=_vmem_limit_bytes())

    # ---- stage 1: conv #1 (+ halo ring) + BN #1 partial stats ---------------
    conv1, stats1 = pl.pallas_call(
        _make_conv1_kernel(TH, Wc, Cin, Cout, Cw),
        grid=(N, nH),
        in_specs=[
            pl.BlockSpec((1, Hp, Wi, Cin), lambda i, j: (i, 0, 0, 0)),
            pl.BlockSpec((K * K * Cin, Cw), lambda i, j: (0, 0)),
            pl.BlockSpec((TH * Wc, 1), lambda i, j: (0, 0)),
        ],
        out_specs=(
            pl.BlockSpec((1, TH, Wc, Cout), lambda i, j: (i, j, 0, 0)),
            pl.BlockSpec((1, 2, Cout), lambda i, j: (i, 0, 0)),
        ),
        out_shape=(
            jax.ShapeDtypeStruct((N, H, Wc, Cout), INTER_DTYPE),
            jax.ShapeDtypeStruct((N, 2, Cout), jnp.float32),
        ),
        compiler_params=cparams,
    )(x_pad, w1m, wm1)

    sc1, sh1 = _bn_affine(jnp.sum(stats1, axis=0),
                          g1.astype(jnp.float32), b1.astype(jnp.float32), count)

    # ---- stage 2: BN#1 apply + ReLU + conv #2 + BN #2 partial stats ---------
    conv2, stats2 = pl.pallas_call(
        _make_conv2_kernel(TH, H, W, Wc, Cout, Cout, Cw),
        grid=(N, nH),
        in_specs=[
            pl.BlockSpec((1, H, Wc, Cout), lambda i, j: (i, 0, 0, 0)),
            pl.BlockSpec((1, Cout), lambda i, j: (0, 0)),
            pl.BlockSpec((1, Cout), lambda i, j: (0, 0)),
            pl.BlockSpec((K * K * Cout, Cw), lambda i, j: (0, 0)),
            pl.BlockSpec((1, Wc, 1), lambda i, j: (0, 0, 0)),
        ],
        out_specs=(
            pl.BlockSpec((1, TH, W, Cout), lambda i, j: (i, j, 0, 0)),
            pl.BlockSpec((1, 2, Cout), lambda i, j: (i, 0, 0)),
        ),
        out_shape=(
            jax.ShapeDtypeStruct((N, H, W, Cout), jnp.float32),
            jax.ShapeDtypeStruct((N, 2, Cout), jnp.float32),
        ),
        compiler_params=cparams,
    )(conv1, sc1, sh1, w2m, wm2)

    sc2, sh2 = _bn_affine(jnp.sum(stats2, axis=0),
                          g2.astype(jnp.float32), b2.astype(jnp.float32), count)

    # ---- epilogue (XLA-fused): BN #2 apply + ReLU + layout back to NCHW -----
    y = jnp.maximum(conv2 * sc2 + sh2, 0.0)
    return jnp.transpose(y, (0, 3, 1, 2))


def _reference(x_nchw, w1, g1, b1, w2, g2, b2):
    """Pure-JAX f32 reference matching PyTorch training-mode DoubleConv."""
    def conv(x, w):
        return jax.lax.conv_general_dilated(
            x, w, window_strides=(S, S), padding=((P, P), (P, P)),
            dimension_numbers=("NCHW", "OIHW", "NCHW"))

    def bn_relu(x, g, b):
        mean = jnp.mean(x, axis=(0, 2, 3), keepdims=True)
        var = jnp.mean((x - mean) ** 2, axis=(0, 2, 3), keepdims=True)
        y = (x - mean) * jax.lax.rsqrt(var + EPS)
        y = y * g.reshape(1, -1, 1, 1) + b.reshape(1, -1, 1, 1)
        return jnp.maximum(y, 0.0)

    h = bn_relu(conv(x_nchw, w1), g1, b1)
    return bn_relu(conv(h, w2), g2, b2)


if __name__ == "__main__":
    # Small shapes: batch=2, in_channels=4, out_channels=8, spatial=16x16.
    N, Cin, Cout, H, W = 2, 4, 8, 16, 16
    key = jax.random.PRNGKey(0)
    kx, kw1, kw2 = jax.random.split(key, 3)

    x = jax.random.normal(kx, (N, Cin, H, W), dtype=jnp.float32)
    w1 = jax.random.normal(kw1, (Cout, Cin, K, K), dtype=jnp.float32) * 0.1
    w2 = jax.random.normal(kw2, (Cout, Cout, K, K), dtype=jnp.float32) * 0.1
    g1 = jnp.ones((Cout,), jnp.float32)
    b1 = jnp.zeros((Cout,), jnp.float32)
    g2 = jnp.ones((Cout,), jnp.float32)
    b2 = jnp.zeros((Cout,), jnp.float32)

    # tile_h=8 exercises the H-row tiling / halo path (nH=2).
    out = double_conv_forward(x, w1, g1, b1, w2, g2, b2, tile_h=8)
    out = jax.block_until_ready(out)

    ref = jax.block_until_ready(_reference(x, w1, g1, b1, w2, g2, b2))
    assert out.shape == (N, Cout, H, W), out.shape
    err = float(jnp.max(jnp.abs(out - ref)))
    # bf16 MXU operands + bf16 intermediate: ~5e-2 acceptance vs the f32
    # reference (two conv+BN layers of bf16 rounding). With MATMUL_DTYPE /
    # INTER_DTYPE = float32 this reproduces the reference to < 2e-3.
    assert err < 5e-2, err

    print("KERNEL_OK")
</pallas_src>

<mosaic_0001>
module attributes {stable_mosaic.version = 11 : i64} {
  func.func @kernel(%arg0: i32, %arg1: i32, %arg2: memref<1x18x26x4xf32, #tpu.memory_space<vmem>>, %arg3: memref<36x8xbf16, #tpu.memory_space<vmem>>, %arg4: memref<192x1xf32, #tpu.memory_space<vmem>>, %arg5: memref<1x8x24x8xbf16, #tpu.memory_space<vmem>>, %arg6: memref<1x2x8xf32, #tpu.memory_space<vmem>>) attributes {dimension_semantics = [#tpu.dimension_semantics<parallel>, #tpu.dimension_semantics<arbitrary>], iteration_bounds = array<i64: 2, 2>, scalar_prefetch = 0 : i64, scratch_operands = 0 : i64, tpu.core_type = #tpu.core_type<tc>, window_params = [{transform_indices = @transform_0, window_bounds = array<i64: 1, 18, 26, 4>}, {pipeline_mode = #tpu.pipeline_mode<synchronous>, transform_indices = @transform_1, window_bounds = array<i64: 36, 8>}, {pipeline_mode = #tpu.pipeline_mode<synchronous>, transform_indices = @transform_2, window_bounds = array<i64: 192, 1>}, {transform_indices = @transform_3, window_bounds = array<i64: 1, 8, 24, 8>}, {transform_indices = @transform_4, window_bounds = array<i64: 1, 2, 8>}]} {
    %c0_i32 = arith.constant 0 : i32
    %0 = arith.cmpi eq, %arg1, %c0_i32 : i32
    %1 = arith.extui %0 : i1 to i32
    %c0_i32_0 = arith.constant 0 : i32
    %2 = arith.cmpi ne, %1, %c0_i32_0 : i32
    scf.if %2 {
      %cst_19 = arith.constant 0.000000e+00 : f32
      %37 = vector.broadcast %cst_19 : f32 to vector<1x2x8xf32>
      %c0_20 = arith.constant 0 : index
      %c0_21 = arith.constant 0 : index
      %c0_22 = arith.constant 0 : index
      %38 = vector.load %arg6[%c0_20, %c0_21, %c0_22] : memref<1x2x8xf32, #tpu.memory_space<vmem>>, vector<1x2x8xf32>
      tpu.vector_store %arg6[%c0_20, %c0_21, %c0_22], %37 {strides = array<i32>} : memref<1x2x8xf32, #tpu.memory_space<vmem>>, vector<1x2x8xf32>,
    } else {
    }
    %c8_i32 = arith.constant 8 : i32
    %3 = arith.muli %arg1, %c8_i32 : i32
    %c0 = arith.constant 0 : index
    %4 = arith.index_cast %3 : i32 to index
    %c0_1 = arith.constant 0 : index
    %c0_2 = arith.constant 0 : index
    %5 = vector.load %arg2[%c0, %4, %c0_1, %c0_2] : memref<1x18x26x4xf32, #tpu.memory_space<vmem>>, vector<1x10x26x4xf32>
    %6 = vector.shape_cast %5 : vector<1x10x26x4xf32> to vector<10x26x4xf32>
    %7 = vector.extract_strided_slice %6 {offsets = [0, 0, 0], sizes = [8, 24, 4], strides = [1, 1, 1]} : vector<10x26x4xf32> to vector<8x24x4xf32>
    %8 = vector.extract_strided_slice %6 {offsets = [0, 1, 0], sizes = [8, 24, 4], strides = [1, 1, 1]} : vector<10x26x4xf32> to vector<8x24x4xf32>
    %9 = vector.extract_strided_slice %6 {offsets = [0, 2, 0], sizes = [8, 24, 4], strides = [1, 1, 1]} : vector<10x26x4xf32> to vector<8x24x4xf32>
    %10 = vector.extract_strided_slice %6 {offsets = [1, 0, 0], sizes = [8, 24, 4], strides = [1, 1, 1]} : vector<10x26x4xf32> to vector<8x24x4xf32>
    %11 = vector.extract_strided_slice %6 {offsets = [1, 1, 0], sizes = [8, 24, 4], strides = [1, 1, 1]} : vector<10x26x4xf32> to vector<8x24x4xf32>
    %12 = vector.extract_strided_slice %6 {offsets = [1, 2, 0], sizes = [8, 24, 4], strides = [1, 1, 1]} : vector<10x26x4xf32> to vector<8x24x4xf32>
    %13 = vector.extract_strided_slice %6 {offsets = [2, 0, 0], sizes = [8, 24, 4], strides = [1, 1, 1]} : vector<10x26x4xf32> to vector<8x24x4xf32>
    %14 = vector.extract_strided_slice %6 {offsets = [2, 1, 0], sizes = [8, 24, 4], strides = [1, 1, 1]} : vector<10x26x4xf32> to vector<8x24x4xf32>
    %15 = vector.extract_strided_slice %6 {offsets = [2, 2, 0], sizes = [8, 24, 4], strides = [1, 1, 1]} : vector<10x26x4xf32> to vector<8x24x4xf32>
    %16 = tpu.concatenate %7, %8, %9, %10, %11, %12, %13, %14, %15 in 2 : vector<8x24x4xf32>, vector<8x24x4xf32>, vector<8x24x4xf32>, vector<8x24x4xf32>, vector<8x24x4xf32>, vector<8x24x4xf32>, vector<8x24x4xf32>, vector<8x24x4xf32>, vector<8x24x4xf32> -> vector<8x24x36xf32>
    %17 = vector.shape_cast %16 : vector<8x24x36xf32> to vector<192x36xf32>
    %18 = arith.truncf %17 : vector<192x36xf32> to vector<192x36xbf16>
    %c0_3 = arith.constant 0 : index
    %c0_4 = arith.constant 0 : index
    %19 = vector.load %arg3[%c0_3, %c0_4] : memref<36x8xbf16, #tpu.memory_space<vmem>>, vector<36x8xbf16>
    %cst = arith.constant dense<0.000000e+00> : vector<192x8xf32>
    %20 = tpu.matmul %18, %19, %cst {dimension_numbers = #tpu.dot_dimension_numbers<[1], [0], [0], [1], [0, 0, 1, 1], [], []>} : vector<192x36xbf16>, vector<36x8xbf16>, vector<192x8xf32> -> vector<192x8xf32>
    %c0_5 = arith.constant 0 : index
    %c0_6 = arith.constant 0 : index
    %21 = vector.load %arg4[%c0_5, %c0_6] : memref<192x1xf32, #tpu.memory_space<vmem>>, vector<192x1xf32>
    %22 = vector.broadcast %21 : vector<192x1xf32> to vector<192x8xf32>
    %23 = arith.mulf %20, %22 : vector<192x8xf32>
    %cst_7 = arith.constant dense<0.000000e+00> : vector<8xf32>
    %24 = vector.multi_reduction <add>, %23, %cst_7 [0] : vector<192x8xf32> to vector<8xf32>
    %25 = vector.shape_cast %24 : vector<8xf32> to vector<1x8xf32>
    %26 = arith.mulf %23, %20 : vector<192x8xf32>
    %cst_8 = arith.constant dense<0.000000e+00> : vector<8xf32>
    %27 = vector.multi_reduction <add>, %26, %cst_8 [0] : vector<192x8xf32> to vector<8xf32>
    %28 = vector.shape_cast %27 : vector<8xf32> to vector<1x8xf32>
    %c0_9 = arith.constant 0 : index
    %c0_10 = arith.constant 0 : index
    %c0_11 = arith.constant 0 : index
    %29 = vector.load %arg6[%c0_9, %c0_10, %c0_11] : memref<1x2x8xf32, #tpu.memory_space<vmem>>, vector<1x2x8xf32>
    %30 = tpu.concatenate %25, %28 in 0 : vector<1x8xf32>, vector<1x8xf32> -> vector<2x8xf32>
    %31 = vector.shape_cast %30 : vector<2x8xf32> to vector<1x2x8xf32>
    %32 = arith.addf %29, %31 : vector<1x2x8xf32>
    %c0_12 = arith.constant 0 : index
    %c0_13 = arith.constant 0 : index
    %c0_14 = arith.constant 0 : index
    %33 = vector.load %arg6[%c0_12, %c0_13, %c0_14] : memref<1x2x8xf32, #tpu.memory_space<vmem>>, vector<1x2x8xf32>
    tpu.vector_store %arg6[%c0_12, %c0_13, %c0_14], %32 {strides = array<i32>} : memref<1x2x8xf32, #tpu.memory_space<vmem>>, vector<1x2x8xf32>,
    %34 = vector.shape_cast %20 : vector<192x8xf32> to vector<1x8x24x8xf32>
    %35 = arith.truncf %34 : vector<1x8x24x8xf32> to vector<1x8x24x8xbf16>
    %c0_15 = arith.constant 0 : index
    %c0_16 = arith.constant 0 : index
    %c0_17 = arith.constant 0 : index
    %c0_18 = arith.constant 0 : index
    %36 = vector.load %arg5[%c0_15, %c0_16, %c0_17, %c0_18] : memref<1x8x24x8xbf16, #tpu.memory_space<vmem>>, vector<1x8x24x8xbf16>
    tpu.vector_store %arg5[%c0_15, %c0_16, %c0_17, %c0_18], %35 {strides = array<i32>} : memref<1x8x24x8xbf16, #tpu.memory_space<vmem>>, vector<1x8x24x8xbf16>,
    return
  }
  func.func @transform_0(%arg0: i32, %arg1: i32) -> (i32, i32, i32, i32) {
    %c0_i32 = arith.constant 0 : i32
    %c0_i32_0 = arith.constant 0 : i32
    %c0_i32_1 = arith.constant 0 : i32
    %c0_i32_2 = arith.constant 0 : i32
    return %arg0, %c0_i32, %c0_i32_0, %c0_i32_1 : i32, i32, i32, i32
  }
  func.func @transform_1(%arg0: i32, %arg1: i32) -> (i32, i32) {
    %c0_i32 = arith.constant 0 : i32
    %c0_i32_0 = arith.constant 0 : i32
    %c0_i32_1 = arith.constant 0 : i32
    return %c0_i32, %c0_i32_0 : i32, i32
  }
  func.func @transform_2(%arg0: i32, %arg1: i32) -> (i32, i32) {
    %c0_i32 = arith.constant 0 : i32
    %c0_i32_0 = arith.constant 0 : i32
    %c0_i32_1 = arith.constant 0 : i32
    return %c0_i32, %c0_i32_0 : i32, i32
  }
  func.func @transform_3(%arg0: i32, %arg1: i32) -> (i32, i32, i32, i32) {
    %c0_i32 = arith.constant 0 : i32
    %c0_i32_0 = arith.constant 0 : i32
    %c0_i32_1 = arith.constant 0 : i32
    return %arg0, %arg1, %c0_i32, %c0_i32_0 : i32, i32, i32, i32
  }
  func.func @transform_4(%arg0: i32, %arg1: i32) -> (i32, i32, i32) {
    %c0_i32 = arith.constant 0 : i32
    %c0_i32_0 = arith.constant 0 : i32
    %c0_i32_1 = arith.constant 0 : i32
    return %arg0, %c0_i32, %c0_i32_0 : i32, i32, i32
  }
}

module attributes {stable_mosaic.version = 11 : i64} {
  func.func @kernel(%arg0: i32, %arg1: i32, %arg2: memref<1x16x24x8xbf16, #tpu.memory_space<vmem>>, %arg3: memref<1x8xf32, #tpu.memory_space<vmem>>, %arg4: memref<1x8xf32, #tpu.memory_space<vmem>>, %arg5: memref<72x8xbf16, #tpu.memory_space<vmem>>, %arg6: memref<1x24x1xf32, #tpu.memory_space<vmem>>, %arg7: memref<1x8x16x8xf32, #tpu.memory_space<vmem>>, %arg8: memref<1x2x8xf32, #tpu.memory_space<vmem>>) attributes {dimension_semantics = [#tpu.dimension_semantics<parallel>, #tpu.dimension_semantics<arbitrary>], iteration_bounds = array<i64: 2, 2>, scalar_prefetch = 0 : i64, scratch_operands = 0 : i64, tpu.core_type = #tpu.core_type<tc>, window_params = [{transform_indices = @transform_0, window_bounds = array<i64: 1, 16, 24, 8>}, {pipeline_mode = #tpu.pipeline_mode<synchronous>, transform_indices = @transform_1, window_bounds = array<i64: 1, 8>}, {pipeline_mode = #tpu.pipeline_mode<synchronous>, transform_indices = @transform_2, window_bounds = array<i64: 1, 8>}, {pipeline_mode = #tpu.pipeline_mode<synchronous>, transform_indices = @transform_3, window_bounds = array<i64: 72, 8>}, {pipeline_mode = #tpu.pipeline_mode<synchronous>, transform_indices = @transform_4, window_bounds = array<i64: 1, 24, 1>}, {transform_indices = @transform_5, window_bounds = array<i64: 1, 8, 16, 8>}, {transform_indices = @transform_6, window_bounds = array<i64: 1, 2, 8>}]} {
    %c0_i32 = arith.constant 0 : i32
    %0 = arith.cmpi eq, %arg1, %c0_i32 : i32
    %1 = arith.extui %0 : i1 to i32
    %c0_i32_0 = arith.constant 0 : i32
    %2 = arith.cmpi ne, %1, %c0_i32_0 : i32
    scf.if %2 {
      %cst_37 = arith.constant 0.000000e+00 : f32
      %87 = vector.broadcast %cst_37 : f32 to vector<1x2x8xf32>
      %c0_38 = arith.constant 0 : index
      %c0_39 = arith.constant 0 : index
      %c0_40 = arith.constant 0 : index
      %88 = vector.load %arg8[%c0_38, %c0_39, %c0_40] : memref<1x2x8xf32, #tpu.memory_space<vmem>>, vector<1x2x8xf32>
      tpu.vector_store %arg8[%c0_38, %c0_39, %c0_40], %87 {strides = array<i32>} : memref<1x2x8xf32, #tpu.memory_space<vmem>>, vector<1x2x8xf32>,
    } else {
    }
    %c8_i32 = arith.constant 8 : i32
    %3 = arith.muli %arg1, %c8_i32 : i32
    %c0 = arith.constant 0 : index
    %c0_1 = arith.constant 0 : index
    %4 = vector.load %arg3[%c0, %c0_1] : memref<1x8xf32, #tpu.memory_space<vmem>>, vector<1x8xf32>
    %c0_2 = arith.constant 0 : index
    %c0_3 = arith.constant 0 : index
    %5 = vector.load %arg4[%c0_2, %c0_3] : memref<1x8xf32, #tpu.memory_space<vmem>>, vector<1x8xf32>
    %c1_i32 = arith.constant 1 : i32
    %6 = arith.subi %3, %c1_i32 : i32
    %c0_i32_4 = arith.constant 0 : i32
    %7 = arith.maxsi %6, %c0_i32_4 : i32
    %c0_5 = arith.constant 0 : index
    %8 = arith.index_cast %7 : i32 to index
    %c0_6 = arith.constant 0 : index
    %c0_7 = arith.constant 0 : index
    %9 = vector.load %arg2[%c0_5, %8, %c0_6, %c0_7] : memref<1x16x24x8xbf16, #tpu.memory_space<vmem>>, vector<1x1x24x8xbf16>
    %10 = vector.shape_cast %9 : vector<1x1x24x8xbf16> to vector<1x24x8xbf16>
    %11 = arith.extf %10 : vector<1x24x8xbf16> to vector<1x24x8xf32>
    %12 = vector.shape_cast %4 : vector<1x8xf32> to vector<1x1x8xf32>
    %13 = vector.broadcast %12 : vector<1x1x8xf32> to vector<1x24x8xf32>
    %14 = arith.mulf %11, %13 : vector<1x24x8xf32>
    %15 = vector.shape_cast %5 : vector<1x8xf32> to vector<1x1x8xf32>
    %16 = vector.broadcast %15 : vector<1x1x8xf32> to vector<1x24x8xf32>
    %17 = arith.addf %14, %16 : vector<1x24x8xf32>
    %cst = arith.constant 0.000000e+00 : f32
    %18 = vector.broadcast %cst : f32 to vector<1x24x8xf32>
    %19 = arith.maximumf %17, %18 : vector<1x24x8xf32>
    %c0_8 = arith.constant 0 : index
    %20 = arith.index_cast %3 : i32 to index
    %c0_9 = arith.constant 0 : index
    %c0_10 = arith.constant 0 : index
    %21 = vector.load %arg2[%c0_8, %20, %c0_9, %c0_10] : memref<1x16x24x8xbf16, #tpu.memory_space<vmem>>, vector<1x8x24x8xbf16>
    %22 = vector.shape_cast %21 : vector<1x8x24x8xbf16> to vector<8x24x8xbf16>
    %23 = arith.extf %22 : vector<8x24x8xbf16> to vector<8x24x8xf32>
    %24 = vector.shape_cast %4 : vector<1x8xf32> to vector<1x1x8xf32>
    %25 = vector.broadcast %24 : vector<1x1x8xf32> to vector<8x24x8xf32>
    %26 = arith.mulf %23, %25 : vector<8x24x8xf32>
    %27 = vector.shape_cast %5 : vector<1x8xf32> to vector<1x1x8xf32>
    %28 = vector.broadcast %27 : vector<1x1x8xf32> to vector<8x24x8xf32>
    %29 = arith.addf %26, %28 : vector<8x24x8xf32>
    %cst_11 = arith.constant 0.000000e+00 : f32
    %30 = vector.broadcast %cst_11 : f32 to vector<8x24x8xf32>
    %31 = arith.maximumf %29, %30 : vector<8x24x8xf32>
    %c8_i32_12 = arith.constant 8 : i32
    %32 = arith.addi %3, %c8_i32_12 : i32
    %c15_i32 = arith.constant 15 : i32
    %33 = arith.minsi %32, %c15_i32 : i32
    %c0_13 = arith.constant 0 : index
    %34 = arith.index_cast %33 : i32 to index
    %c0_14 = arith.constant 0 : index
    %c0_15 = arith.constant 0 : index
    %35 = vector.load %arg2[%c0_13, %34, %c0_14, %c0_15] : memref<1x16x24x8xbf16, #tpu.memory_space<vmem>>, vector<1x1x24x8xbf16>
    %36 = vector.shape_cast %35 : vector<1x1x24x8xbf16> to vector<1x24x8xbf16>
    %37 = arith.extf %36 : vector<1x24x8xbf16> to vector<1x24x8xf32>
    %38 = vector.shape_cast %4 : vector<1x8xf32> to vector<1x1x8xf32>
    %39 = vector.broadcast %38 : vector<1x1x8xf32> to vector<1x24x8xf32>
    %40 = arith.mulf %37, %39 : vector<1x24x8xf32>
    %41 = vector.shape_cast %5 : vector<1x8xf32> to vector<1x1x8xf32>
    %42 = vector.broadcast %41 : vector<1x1x8xf32> to vector<1x24x8xf32>
    %43 = arith.addf %40, %42 : vector<1x24x8xf32>
    %cst_16 = arith.constant 0.000000e+00 : f32
    %44 = vector.broadcast %cst_16 : f32 to vector<1x24x8xf32>
    %45 = arith.maximumf %43, %44 : vector<1x24x8xf32>
    %c0_i32_17 = arith.constant 0 : i32
    %46 = arith.cmpi sgt, %3, %c0_i32_17 : i32
    %47 = arith.extui %46 : i1 to i32
    %48 = arith.sitofp %47 : i32 to f32
    %49 = vector.broadcast %48 : f32 to vector<1x24x8xf32>
    %50 = arith.mulf %19, %49 : vector<1x24x8xf32>
    %c8_i32_18 = arith.constant 8 : i32
    %51 = arith.addi %3, %c8_i32_18 : i32
    %c16_i32 = arith.constant 16 : i32
    %52 = arith.cmpi slt, %51, %c16_i32 : i32
    %53 = arith.extui %52 : i1 to i32
    %54 = arith.sitofp %53 : i32 to f32
    %55 = vector.broadcast %54 : f32 to vector<1x24x8xf32>
    %56 = arith.mulf %45, %55 : vector<1x24x8xf32>
    %57 = tpu.concatenate %50, %31, %56 in 0 : vector<1x24x8xf32>, vector<8x24x8xf32>, vector<1x24x8xf32> -> vector<10x24x8xf32>
    %c0_19 = arith.constant 0 : index
    %c0_20 = arith.constant 0 : index
    %c0_21 = arith.constant 0 : index
    %58 = vector.load %arg6[%c0_19, %c0_20, %c0_21] : memref<1x24x1xf32, #tpu.memory_space<vmem>>, vector<1x24x1xf32>
    %59 = vector.broadcast %58 : vector<1x24x1xf32> to vector<10x24x8xf32>
    %60 = arith.mulf %57, %59 : vector<10x24x8xf32>
    %61 = vector.extract_strided_slice %60 {offsets = [0, 0, 0], sizes = [8, 16, 8], strides = [1, 1, 1]} : vector<10x24x8xf32> to vector<8x16x8xf32>
    %62 = vector.extract_strided_slice %60 {offsets = [0, 1, 0], sizes = [8, 16, 8], strides = [1, 1, 1]} : vector<10x24x8xf32> to vector<8x16x8xf32>
    %63 = vector.extract_strided_slice %60 {offsets = [0, 2, 0], sizes = [8, 16, 8], strides = [1, 1, 1]} : vector<10x24x8xf32> to vector<8x16x8xf32>
    %64 = vector.extract_strided_slice %60 {offsets = [1, 0, 0], sizes = [8, 16, 8], strides = [1, 1, 1]} : vector<10x24x8xf32> to vector<8x16x8xf32>
    %65 = vector.extract_strided_slice %60 {offsets = [1, 1, 0], sizes = [8, 16, 8], strides = [1, 1, 1]} : vector<10x24x8xf32> to vector<8x16x8xf32>
    %66 = vector.extract_strided_slice %60 {offsets = [1, 2, 0], sizes = [8, 16, 8], strides = [1, 1, 1]} : vector<10x24x8xf32> to vector<8x16x8xf32>
    %67 = vector.extract_strided_slice %60 {offsets = [2, 0, 0], sizes = [8, 16, 8], strides = [1, 1, 1]} : vector<10x24x8xf32> to vector<8x16x8xf32>
    %68 = vector.extract_strided_slice %60 {offsets = [2, 1, 0], sizes = [8, 16, 8], strides = [1, 1, 1]} : vector<10x24x8xf32> to vector<8x16x8xf32>
    %69 = vector.extract_strided_slice %60 {offsets = [2, 2, 0], sizes = [8, 16, 8], strides = [1, 1, 1]} : vector<10x24x8xf32> to vector<8x16x8xf32>
    %70 = tpu.concatenate %61, %62, %63, %64, %65, %66, %67, %68, %69 in 2 : vector<8x16x8xf32>, vector<8x16x8xf32>, vector<8x16x8xf32>, vector<8x16x8xf32>, vector<8x16x8xf32>, vector<8x16x8xf32>, vector<8x16x8xf32>, vector<8x16x8xf32>, vector<8x16x8xf32> -> vector<8x16x72xf32>
    %71 = vector.shape_cast %70 : vector<8x16x72xf32> to vector<128x72xf32>
    %72 = arith.truncf %71 : vector<128x72xf32> to vector<128x72xbf16>
    %c0_22 = arith.constant 0 : index
    %c0_23 = arith.constant 0 : index
    %73 = vector.load %arg5[%c0_22, %c0_23] : memref<72x8xbf16, #tpu.memory_space<vmem>>, vector<72x8xbf16>
    %cst_24 = arith.constant dense<0.000000e+00> : vector<128x8xf32>
    %74 = tpu.matmul %72, %73, %cst_24 {dimension_numbers = #tpu.dot_dimension_numbers<[1], [0], [0], [1], [0, 0, 1, 1], [], []>} : vector<128x72xbf16>, vector<72x8xbf16>, vector<128x8xf32> -> vector<128x8xf32>
    %cst_25 = arith.constant dense<0.000000e+00> : vector<8xf32>
    %75 = vector.multi_reduction <add>, %74, %cst_25 [0] : vector<128x8xf32> to vector<8xf32>
    %76 = vector.shape_cast %75 : vector<8xf32> to vector<1x8xf32>
    %77 = arith.mulf %74, %74 : vector<128x8xf32>
    %cst_26 = arith.constant dense<0.000000e+00> : vector<8xf32>
    %78 = vector.multi_reduction <add>, %77, %cst_26 [0] : vector<128x8xf32> to vector<8xf32>
    %79 = vector.shape_cast %78 : vector<8xf32> to vector<1x8xf32>
    %c0_27 = arith.constant 0 : index
    %c0_28 = arith.constant 0 : index
    %c0_29 = arith.constant 0 : index
    %80 = vector.load %arg8[%c0_27, %c0_28, %c0_29] : memref<1x2x8xf32, #tpu.memory_space<vmem>>, vector<1x2x8xf32>
    %81 = tpu.concatenate %76, %79 in 0 : vector<1x8xf32>, vector<1x8xf32> -> vector<2x8xf32>
    %82 = vector.shape_cast %81 : vector<2x8xf32> to vector<1x2x8xf32>
    %83 = arith.addf %80, %82 : vector<1x2x8xf32>
    %c0_30 = arith.constant 0 : index
    %c0_31 = arith.constant 0 : index
    %c0_32 = arith.constant 0 : index
    %84 = vector.load %arg8[%c0_30, %c0_31, %c0_32] : memref<1x2x8xf32, #tpu.memory_space<vmem>>, vector<1x2x8xf32>
    tpu.vector_store %arg8[%c0_30, %c0_31, %c0_32], %83 {strides = array<i32>} : memref<1x2x8xf32, #tpu.memory_space<vmem>>, vector<1x2x8xf32>,
    %85 = vector.shape_cast %74 : vector<128x8xf32> to vector<1x8x16x8xf32>
    %c0_33 = arith.constant 0 : index
    %c0_34 = arith.constant 0 : index
    %c0_35 = arith.constant 0 : index
    %c0_36 = arith.constant 0 : index
    %86 = vector.load %arg7[%c0_33, %c0_34, %c0_35, %c0_36] : memref<1x8x16x8xf32, #tpu.memory_space<vmem>>, vector<1x8x16x8xf32>
    tpu.vector_store %arg7[%c0_33, %c0_34, %c0_35, %c0_36], %85 {strides = array<i32>} : memref<1x8x16x8xf32, #tpu.memory_space<vmem>>, vector<1x8x16x8xf32>,
    return
  }
  func.func @transform_0(%arg0: i32, %arg1: i32) -> (i32, i32, i32, i32) {
    %c0_i32 = arith.constant 0 : i32
    %c0_i32_0 = arith.constant 0 : i32
    %c0_i32_1 = arith.constant 0 : i32
    %c0_i32_2 = arith.constant 0 : i32
    return %arg0, %c0_i32, %c0_i32_0, %c0_i32_1 : i32, i32, i32, i32
  }
  func.func @transform_1(%arg0: i32, %arg1: i32) -> (i32, i32) {
    %c0_i32 = arith.constant 0 : i32
    %c0_i32_0 = arith.constant 0 : i32
    %c0_i32_1 = arith.constant 0 : i32
    return %c0_i32, %c0_i32_0 : i32, i32
  }
  func.func @transform_2(%arg0: i32, %arg1: i32) -> (i32, i32) {
    %c0_i32 = arith.constant 0 : i32
    %c0_i32_0 = arith.constant 0 : i32
    %c0_i32_1 = arith.constant 0 : i32
    return %c0_i32, %c0_i32_0 : i32, i32
  }
  func.func @transform_3(%arg0: i32, %arg1: i32) -> (i32, i32) {
    %c0_i32 = arith.constant 0 : i32
    %c0_i32_0 = arith.constant 0 : i32
    %c0_i32_1 = arith.constant 0 : i32
    return %c0_i32, %c0_i32_0 : i32, i32
  }
  func.func @transform_4(%arg0: i32, %arg1: i32) -> (i32, i32, i32) {
    %c0_i32 = arith.constant 0 : i32
    %c0_i32_0 = arith.constant 0 : i32
    %c0_i32_1 = arith.constant 0 : i32
    %c0_i32_2 = arith.constant 0 : i32
    return %c0_i32, %c0_i32_0, %c0_i32_1 : i32, i32, i32
  }
  func.func @transform_5(%arg0: i32, %arg1: i32) -> (i32, i32, i32, i32) {
    %c0_i32 = arith.constant 0 : i32
    %c0_i32_0 = arith.constant 0 : i32
    %c0_i32_1 = arith.constant 0 : i32
    return %arg0, %arg1, %c0_i32, %c0_i32_0 : i32, i32, i32, i32
  }
  func.func @transform_6(%arg0: i32, %arg1: i32) -> (i32, i32, i32) {
    %c0_i32 = arith.constant 0 : i32
    %c0_i32_0 = arith.constant 0 : i32
    %c0_i32_1 = arith.constant 0 : i32
    return %arg0, %c0_i32, %c0_i32_0 : i32, i32, i32
  }
}

</mosaic_0001>

<bundles_post_ra>
// kernel: tile.8
= control target key start
LH: loop header
LB: loop body
LE: loop exit
PB: predicated region body
PF: predicated region fallthrough
CT: control target
= control target key end

     0   :  { %s22_s0 = inlined_call_operand.vmem [shape: f32[24], index: 0, kind: input, shape index: {}]   ;;  %s23_s1 = inlined_call_operand.vmem [shape: f32[8,24], index: 1, kind: output, shape index: {}]  }
   0x1   :  { %v4_v0 = vld [vmem:[%s22_s0] ss:$0 sm:$0xff] }
   0x2   :  { %5 = vst [vmem:[%s23_s1] sm:$0xff] %v4_v0 }

// kernel: tile.0
= control target key start
LH: loop header
LB: loop body
LE: loop exit
PB: predicated region body
PF: predicated region fallthrough
CT: control target
= control target key end

     0   :  { %s397_s8 = smov 127   ;;  %s398_s9 = smov 125   ;;  %vm3_vm0 = vcmask 7168   ;;  %s818_s0 = inlined_call_operand.vmem [shape: f32[8,24], index: 0, kind: input, shape index: {}]   ;;  %s819_s1 = inlined_call_operand.vmem [shape: f32[192,1], index: 1, kind: output, shape index: {}]  }
   0x1   :  { %v6_v0 = vld.sshfl [vmem:[%s818_s0] sm:$0xff pattern:$0x56741230]   ;;  %s399_s10 = smov 126   ;;  %s400_s11 = smov 124  }
   0x2   :  { %7 = vrot.lane.b32.xlu0 %v6_v0, %s397_s8  ;;  %31 = vrot.lane.b32.xlu1 %v6_v0, %s398_s9  ;;  %s401_s12 = smov 123   ;;  %s402_s13 = smov 122   ;;  %v90_v1 = vld.sshfl [vmem:[%s818_s0] sm:$0xff pattern:$0x67452301]  }
   0x3   :  { %s403_s16 = smov 121   ;;  %s404_s17 = smov 120   ;;  %v186_v2 = vld.sshfl [vmem:[%s818_s0] sm:$0xff pattern:$0x74563012]  }
   0x4   :  { %s405_s18 = smov 119   ;;  %s406_s19 = smov 118   ;;  %v2_v3 = vld [vmem:[%s818_s0] sm:$0xff]  }
   0x5   :  { %s407_s20 = smov 117   ;;  %s408_s21 = smov 116   ;;  %4 = vst.msk [vmem:[%s819_s1] ss:$24 sm:$0xf] %vm3_vm0, %v2_v3  }
   0x6   :  { %19 = vrot.lane.b32.xlu0 %v6_v0, %s399_s10  ;;  %43 = vrot.lane.b32.xlu1 %v6_v0, %s400_s11  ;;  %s409_s22 = smov 115   ;;  %s410_s23 = smov 114   ;;  %5 = vst.msk [vmem:[%s819_s1] ss:$24 sm:$0xf0] %vm3_vm0, %v2_v3  }
   0x7   :  { %s411_s26 = smov 113   ;;  %s412_s27 = smov 112  }
   0x8   :  { %s413_s4 = smov 111   ;;  %s414_s5 = smov 110  }
   0x9   :  { %s415_s6 = smov 109   ;;  %s416_s7 = smov 108  }
   0xa   :  { %55 = vrot.lane.b32.xlu0 %v6_v0, %s401_s12  ;;  %67 = vrot.lane.b32.xlu1 %v6_v0, %s402_s13  ;;  %s417_s8 = smov 107   ;;  %s418_s9 = smov 106  }
   0xb   :  { %s419_s10 = smov 105  }
   0xe   :  { %79 = vrot.lane.b32.xlu0 %v6_v0, %s403_s16  ;;  %91 = vrot.lane.b32.xlu1 %v90_v1, %s404_s17 }
  0x12   :  { %103 = vrot.lane.b32.xlu0 %v90_v1, %s405_s18  ;;  %115 = vrot.lane.b32.xlu1 %v90_v1, %s406_s19 }
  0x16   :  { %127 = vrot.lane.b32.xlu0 %v90_v1, %s407_s20  ;;  %139 = vrot.lane.b32.xlu1 %v90_v1, %s408_s21 }
  0x1a   :  { %151 = vrot.lane.b32.xlu0 %v90_v1, %s409_s22  ;;  %163 = vrot.lane.b32.xlu1 %v90_v1, %s410_s23 }
  0x1e   :  { %175 = vrot.lane.b32.xlu0 %v90_v1, %s411_s26  ;;  %187 = vrot.lane.b32.xlu1 %v186_v2, %s412_s27 }
  0x22   :  { %199 = vrot.lane.b32.xlu0 %v186_v2, %s413_s4  ;;  %211 = vrot.lane.b32.xlu1 %v186_v2, %s414_s5 }
  0x26   :  { %223 = vrot.lane.b32.xlu0 %v186_v2, %s415_s6  ;;  %235 = vrot.lane.b32.xlu1 %v186_v2, %s416_s7 }
  0x2a   :  { %247 = vrot.lane.b32.xlu0 %v186_v2, %s417_s8  ;;  %259 = vrot.lane.b32.xlu1 %v186_v2, %s418_s9 }
  0x2e   :  { %271 = vrot.lane.b32.xlu0 %v186_v2, %s419_s10 }
  0x74   :  { %v8_v4 = vpop.permute.xlu0 %7   ;;  %v32_v5 = vpop.permute.xlu1 %31  }
  0x75   :  { %282 = vst.msk [vmem:[%s819_s1 + $0x1] ss:$72 sm:$0x3] %vm3_vm0, %v8_v4   ;;  %283 = vst.msk [vmem:[%s819_s1 + $0x61] ss:$-24 sm:$0xc] %vm3_vm0, %v8_v4  }
  0x76   :  { %284 = vst.msk [vmem:[%s819_s1 - $0xbf] ss:$72 sm:$0x30] %vm3_vm0, %v8_v4   ;;  %285 = vst.msk [vmem:[%s819_s1 + $0x121] ss:$-24 sm:$0xc0] %vm3_vm0, %v8_v4  }
  0x77   :  { %290 = vst.msk [vmem:[%s819_s1 + $0x3] ss:$72 sm:$0x3] %vm3_vm0, %v32_v5   ;;  %291 = vst.msk [vmem:[%s819_s1 + $0x63] ss:$-24 sm:$0xc] %vm3_vm0, %v32_v5  }
  0x78   :  { %292 = vst.msk [vmem:[%s819_s1 - $0xbd] ss:$72 sm:$0x30] %vm3_vm0, %v32_v5   ;;  %293 = vst.msk [vmem:[%s819_s1 + $0x123] ss:$-24 sm:$0xc0] %vm3_vm0, %v32_v5   ;;  %v20_v6 = vpop.permute.xlu0 %19   ;;  %v44_v7 = vpop.permute.xlu1 %43  }
  0x79   :  { %286 = vst.msk [vmem:[%s819_s1 + $0x2] ss:$72 sm:$0x3] %vm3_vm0, %v20_v6   ;;  %287 = vst.msk [vmem:[%s819_s1 + $0x62] ss:$-24 sm:$0xc] %vm3_vm0, %v20_v6  }
  0x7a   :  { %288 = vst.msk [vmem:[%s819_s1 - $0xbe] ss:$72 sm:$0x30] %vm3_vm0, %v20_v6   ;;  %289 = vst.msk [vmem:[%s819_s1 + $0x122] ss:$-24 sm:$0xc0] %vm3_vm0, %v20_v6  }
  0x7b   :  { %294 = vst.msk [vmem:[%s819_s1 + $0x4] ss:$72 sm:$0x3] %vm3_vm0, %v44_v7   ;;  %295 = vst.msk [vmem:[%s819_s1 + $0x64] ss:$-24 sm:$0xc] %vm3_vm0, %v44_v7  }
  0x7c   :  { %296 = vst.msk [vmem:[%s819_s1 - $0xbc] ss:$72 sm:$0x30] %vm3_vm0, %v44_v7   ;;  %297 = vst.msk [vmem:[%s819_s1 + $0x124] ss:$-24 sm:$0xc0] %vm3_vm0, %v44_v7   ;;  %v56_v8 = vpop.permute.xlu0 %55   ;;  %v68_v9 = vpop.permute.xlu1 %67  }
  0x7d   :  { %298 = vst.msk [vmem:[%s819_s1 + $0x5] ss:$72 sm:$0x3] %vm3_vm0, %v56_v8   ;;  %299 = vst.msk [vmem:[%s819_s1 + $0x65] ss:$-24 sm:$0xc] %vm3_vm0, %v56_v8  }
  0x7e   :  { %300 = vst.msk [vmem:[%s819_s1 - $0xbb] ss:$72 sm:$0x30] %vm3_vm0, %v56_v8   ;;  %301 = vst.msk [vmem:[%s819_s1 + $0x125] ss:$-24 sm:$0xc0] %vm3_vm0, %v56_v8  }
  0x7f   :  { %302 = vst.msk [vmem:[%s819_s1 + $0x6] ss:$72 sm:$0x3] %vm3_vm0, %v68_v9   ;;  %303 = vst.msk [vmem:[%s819_s1 + $0x66] ss:$-24 sm:$0xc] %vm3_vm0, %v68_v9  }
  0x80   :  { %304 = vst.msk [vmem:[%s819_s1 - $0xba] ss:$72 sm:$0x30] %vm3_vm0, %v68_v9   ;;  %305 = vst.msk [vmem:[%s819_s1 + $0x126] ss:$-24 sm:$0xc0] %vm3_vm0, %v68_v9   ;;  %v80_v10 = vpop.permute.xlu0 %79   ;;  %v92_v11 = vpop.permute.xlu1 %91  }
  0x81   :  { %306 = vst.msk [vmem:[%s819_s1 + $0x7] ss:$72 sm:$0x3] %vm3_vm0, %v80_v10   ;;  %307 = vst.msk [vmem:[%s819_s1 + $0x67] ss:$-24 sm:$0xc] %vm3_vm0, %v80_v10  }
  0x82   :  { %308 = vst.msk [vmem:[%s819_s1 - $0xb9] ss:$72 sm:$0x30] %vm3_vm0, %v80_v10   ;;  %309 = vst.msk [vmem:[%s819_s1 + $0x127] ss:$-24 sm:$0xc0] %vm3_vm0, %v80_v10  }
  0x83   :  { %310 = vst.msk [vmem:[%s819_s1 + $0x20] ss:$-24 sm:$0x3] %vm3_vm0, %v92_v11   ;;  %311 = vst.msk [vmem:[%s819_s1 + $0x80] ss:$-24 sm:$0xc] %vm3_vm0, %v92_v11  }
  0x84   :  { %312 = vst.msk [vmem:[%s819_s1 + $0xe0] ss:$-24 sm:$0x30] %vm3_vm0, %v92_v11   ;;  %313 = vst.msk [vmem:[%s819_s1 + $0x140] ss:$-24 sm:$0xc0] %vm3_vm0, %v92_v11   ;;  %v104_v12 = vpop.permute.xlu0 %103   ;;  %v116_v13 = vpop.permute.xlu1 %115  }
  0x85   :  { %314 = vst.msk [vmem:[%s819_s1 + $0x21] ss:$-24 sm:$0x3] %vm3_vm0, %v104_v12   ;;  %315 = vst.msk [vmem:[%s819_s1 + $0x81] ss:$-24 sm:$0xc] %vm3_vm0, %v104_v12  }
  0x86   :  { %316 = vst.msk [vmem:[%s819_s1 + $0xe1] ss:$-24 sm:$0x30] %vm3_vm0, %v104_v12   ;;  %317 = vst.msk [vmem:[%s819_s1 + $0x141] ss:$-24 sm:$0xc0] %vm3_vm0, %v104_v12  }
  0x87   :  { %318 = vst.msk [vmem:[%s819_s1 + $0x22] ss:$-24 sm:$0x3] %vm3_vm0, %v116_v13   ;;  %319 = vst.msk [vmem:[%s819_s1 + $0x82] ss:$-24 sm:$0xc] %vm3_vm0, %v116_v13  }
  0x88   :  { %320 = vst.msk [vmem:[%s819_s1 + $0xe2] ss:$-24 sm:$0x30] %vm3_vm0, %v116_v13   ;;  %321 = vst.msk [vmem:[%s819_s1 + $0x142] ss:$-24 sm:$0xc0] %vm3_vm0, %v116_v13   ;;  %v128_v14 = vpop.permute.xlu0 %127   ;;  %v140_v15 = vpop.permute.xlu1 %139  }
  0x89   :  { %322 = vst.msk [vmem:[%s819_s1 + $0x23] ss:$-24 sm:$0x3] %vm3_vm0, %v128_v14   ;;  %323 = vst.msk [vmem:[%s819_s1 + $0x83] ss:$-24 sm:$0xc] %vm3_vm0, %v128_v14  }
  0x8a   :  { %324 = vst.msk [vmem:[%s819_s1 + $0xe3] ss:$-24 sm:$0x30] %vm3_vm0, %v128_v14   ;;  %325 = vst.msk [vmem:[%s819_s1 + $0x143] ss:$-24 sm:$0xc0] %vm3_vm0, %v128_v14  }
  0x8b   :  { %326 = vst.msk [vmem:[%s819_s1 + $0x24] ss:$-24 sm:$0x3] %vm3_vm0, %v140_v15   ;;  %327 = vst.msk [vmem:[%s819_s1 + $0x84] ss:$-24 sm:$0xc] %vm3_vm0, %v140_v15  }
  0x8c   :  { %328 = vst.msk [vmem:[%s819_s1 + $0xe4] ss:$-24 sm:$0x30] %vm3_vm0, %v140_v15   ;;  %329 = vst.msk [vmem:[%s819_s1 + $0x144] ss:$-24 sm:$0xc0] %vm3_vm0, %v140_v15   ;;  %v152_v16 = vpop.permute.xlu0 %151   ;;  %v164_v17 = vpop.permute.xlu1 %163  }
  0x8d   :  { %330 = vst.msk [vmem:[%s819_s1 + $0x25] ss:$-24 sm:$0x3] %vm3_vm0, %v152_v16   ;;  %331 = vst.msk [vmem:[%s819_s1 + $0x85] ss:$-24 sm:$0xc] %vm3_vm0, %v152_v16  }
  0x8e   :  { %332 = vst.msk [vmem:[%s819_s1 + $0xe5] ss:$-24 sm:$0x30] %vm3_vm0, %v152_v16   ;;  %333 = vst.msk [vmem:[%s819_s1 + $0x145] ss:$-24 sm:$0xc0] %vm3_vm0, %v152_v16  }
  0x8f   :  { %334 = vst.msk [vmem:[%s819_s1 + $0x26] ss:$-24 sm:$0x3] %vm3_vm0, %v164_v17   ;;  %335 = vst.msk [vmem:[%s819_s1 + $0x86] ss:$-24 sm:$0xc] %vm3_vm0, %v164_v17  }
  0x90   :  { %336 = vst.msk [vmem:[%s819_s1 + $0xe6] ss:$-24 sm:$0x30] %vm3_vm0, %v164_v17   ;;  %337 = vst.msk [vmem:[%s819_s1 + $0x146] ss:$-24 sm:$0xc0] %vm3_vm0, %v164_v17   ;;  %v176_v18 = vpop.permute.xlu0 %175   ;;  %v188_v19 = vpop.permute.xlu1 %187  }
  0x91   :  { %338 = vst.msk [vmem:[%s819_s1 + $0x27] ss:$-24 sm:$0x3] %vm3_vm0, %v176_v18   ;;  %339 = vst.msk [vmem:[%s819_s1 + $0x87] ss:$-24 sm:$0xc] %vm3_vm0, %v176_v18  }
  0x92   :  { %340 = vst.msk [vmem:[%s819_s1 + $0xe7] ss:$-24 sm:$0x30] %vm3_vm0, %v176_v18   ;;  %341 = vst.msk [vmem:[%s819_s1 + $0x147] ss:$-24 sm:$0xc0] %vm3_vm0, %v176_v18  }
  0x93   :  { %342 = vst.msk [vmem:[%s819_s1 + $0x40] ss:$-24 sm:$0x7] %vm3_vm0, %v188_v19   ;;  %343 = vst.msk [vmem:[%s819_s1 - $0x80] ss:$72 sm:$0x18] %vm3_vm0, %v188_v19  }
  0x94   :  { %344 = vst.msk [vmem:[%s819_s1 + $0x100] ss:$-24 sm:$0x60] %vm3_vm0, %v188_v19   ;;  %345 = vst.msk [vmem:[%s819_s1 + $0xb1] sm:$0x80] %vm3_vm0, %v188_v19   ;;  %v200_v20 = vpop.permute.xlu0 %199   ;;  %v212_v21 = vpop.permute.xlu1 %211  }
  0x95   :  { %346 = vst.msk [vmem:[%s819_s1 + $0x41] ss:$-24 sm:$0x7] %vm3_vm0, %v200_v20   ;;  %347 = vst.msk [vmem:[%s819_s1 - $0x7f] ss:$72 sm:$0x18] %vm3_vm0, %v200_v20  }
  0x96   :  { %348 = vst.msk [vmem:[%s819_s1 + $0x101] ss:$-24 sm:$0x60] %vm3_vm0, %v200_v20   ;;  %349 = vst.msk [vmem:[%s819_s1 + $0xb2] sm:$0x80] %vm3_vm0, %v200_v20  }
  0x97   :  { %350 = vst.msk [vmem:[%s819_s1 + $0x42] ss:$-24 sm:$0x7] %vm3_vm0, %v212_v21   ;;  %351 = vst.msk [vmem:[%s819_s1 - $0x7e] ss:$72 sm:$0x18] %vm3_vm0, %v212_v21  }
  0x98   :  { %352 = vst.msk [vmem:[%s819_s1 + $0x102] ss:$-24 sm:$0x60] %vm3_vm0, %v212_v21   ;;  %353 = vst.msk [vmem:[%s819_s1 + $0xb3] sm:$0x80] %vm3_vm0, %v212_v21   ;;  %v224_v22 = vpop.permute.xlu0 %223   ;;  %v236_v23 = vpop.permute.xlu1 %235  }
  0x99   :  { %354 = vst.msk [vmem:[%s819_s1 + $0x43] ss:$-24 sm:$0x7] %vm3_vm0, %v224_v22   ;;  %355 = vst.msk [vmem:[%s819_s1 - $0x7d] ss:$72 sm:$0x18] %vm3_vm0, %v224_v22  }
  0x9a   :  { %356 = vst.msk [vmem:[%s819_s1 + $0x103] ss:$-24 sm:$0x60] %vm3_vm0, %v224_v22   ;;  %357 = vst.msk [vmem:[%s819_s1 + $0xb4] sm:$0x80] %vm3_vm0, %v224_v22  }
  0x9b   :  { %358 = vst.msk [vmem:[%s819_s1 + $0x44] ss:$-24 sm:$0x7] %vm3_vm0, %v236_v23   ;;  %359 = vst.msk [vmem:[%s819_s1 - $0x7c] ss:$72 sm:$0x18] %vm3_vm0, %v236_v23  }
  0x9c   :  { %360 = vst.msk [vmem:[%s819_s1 + $0x104] ss:$-24 sm:$0x60] %vm3_vm0, %v236_v23   ;;  %361 = vst.msk [vmem:[%s819_s1 + $0xb5] sm:$0x80] %vm3_vm0, %v236_v23   ;;  %v248_v24 = vpop.permute.xlu0 %247   ;;  %v260_v25 = vpop.permute.xlu1 %259  }
  0x9d   :  { %362 = vst.msk [vmem:[%s819_s1 + $0x45] ss:$-24 sm:$0x7] %vm3_vm0, %v248_v24   ;;  %363 = vst.msk [vmem:[%s819_s1 - $0x7b] ss:$72 sm:$0x18] %vm3_vm0, %v248_v24  }
  0x9e   :  { %364 = vst.msk [vmem:[%s819_s1 + $0x105] ss:$-24 sm:$0x60] %vm3_vm0, %v248_v24   ;;  %365 = vst.msk [vmem:[%s819_s1 + $0xb6] sm:$0x80] %vm3_vm0, %v248_v24  }
  0x9f   :  { %366 = vst.msk [vmem:[%s819_s1 + $0x46] ss:$-24 sm:$0x7] %vm3_vm0, %v260_v25   ;;  %367 = vst.msk [vmem:[%s819_s1 - $0x7a] ss:$72 sm:$0x18] %vm3_vm0, %v260_v25  }
  0xa0   :  { %368 = vst.msk [vmem:[%s819_s1 + $0x106] ss:$-24 sm:$0x60] %vm3_vm0, %v260_v25   ;;  %369 = vst.msk [vmem:[%s819_s1 + $0xb7] sm:$0x80] %vm3_vm0, %v260_v25   ;;  %v272_v26 = vpop.permute.xlu0 %271  }
  0xa1   :  { %370 = vst.msk [vmem:[%s819_s1 + $0x47] ss:$-24 sm:$0x7] %vm3_vm0, %v272_v26   ;;  %371 = vst.msk [vmem:[%s819_s1 - $0x79] ss:$72 sm:$0x18] %vm3_vm0, %v272_v26  }
  0xa2   :  { %372 = vst.msk [vmem:[%s819_s1 + $0x107] ss:$-24 sm:$0x60] %vm3_vm0, %v272_v26   ;;  %373 = vst.msk [vmem:[%s819_s1 + $0xb8] sm:$0x80] %vm3_vm0, %v272_v26  }

// kernel: double_conv_forward.3
= control target key start
LH: loop header
LB: loop body
LE: loop exit
PB: predicated region body
PF: predicated region fallthrough
CT: control target
= control target key end

     0   :  { %s2217_s21 = smov 0   ;;  %s2219_s22 = smov 0   ;;  %s3065_s0 = inlined_call_operand.vmem [shape: bf16[2,16,24,8], index: 0, kind: input, shape index: {}]   ;;  %s3066_s1 = inlined_call_operand.vmem [shape: f32[1,8], index: 1, kind: input, shape index: {}]   ;;  %s3067_s2 = inlined_call_operand.vmem [shape: f32[1,8], index: 2, kind: input, shape index: {}]   ;;  %s3068_s3 = inlined_call_operand.vmem [shape: bf16[72,8], index: 3, kind: input, shape index: {}]   ;;  %s3069_s4 = inlined_call_operand.vmem [shape: f32[1,24,1], index: 4, kind: input, shape index: {}]   ;;  %s3070_s5 = inlined_call_operand.vmem [shape: f32[2,16,16,8], index: 5, kind: output, shape index: {0}]   ;;  %s3071_s6 = inlined_call_operand.vmem [shape: f32[2,2,8], index: 6, kind: output, shape index: {1}]  }
   0x1   :  { %s2221_s23 = smov 0   ;;  %s2223_s24 = smov 0  }
   0x2   :  { %s2225_s25 = smov 0  }
   0x3 LB: > { %s26_s26 = sadd.s32 1, %s2162_s23  ;;  %s29_s27 = sadd.s32 1, %s2166_s24  ;;  %s2170_s25 = sphi %s2225_s25, %s17_s25   ;;  %s2166_s24 = sphi %s2223_s24, %s3075_s24   ;;  %s2162_s23 = sphi %s2221_s23, %s3074_s23   ;;  %s2158_s22 = sphi %s2219_s22, %s3073_s22   ;;  %s2154_s21 = sphi %s2217_s21, %s3072_s21  }
   0x4   : > { %p27_p0 = scmp.ge.s32.totalorder %s26_s26, 2  ;;  %p1602_p1 = scmp.ge.s32.totalorder %s2170_s25, 1 }
   0x5   : > { %p229_p2 = scmp.lt.s32.totalorder %s2170_s25, 5 }
   0x6   : > { %s3077_s26 = smov (%p27_p0, %s26_s26), 0  ;;  %s3079_s27 = smov (!%p27_p0, %s29_s27), %s2166_s24 }
   0x7   : > { %p230_p3 = pnand %p1602_p1, %p229_p2  ;;  %p31_p4 = scmp.ge.s32.totalorder %s3079_s27, 2 }
   0x8   : > { %p268_p5 = scmp.lt.s32.totalorder (!%p230_p3), %s2158_s22, 1  ;;  %s2250_s28 = sshll.u32 (!%p230_p3), %s2154_s21, 3 }
   0x9   : > { %s3081_s27 = smov (%p31_p4, %s3079_s27), 0  ;;  %233 = sbr.rel (%p230_p3) target bundleno = 630 (0x276), region = 40 }
   0xa   : > { %p276_p6 = scmp.lt.s32.totalorder (!%p230_p3), %s2250_s28, 15  ;;  %p1609_p7 = scmp.ne.s32.totalorder (!%p230_p3), %s2154_s21, 0 }
   0xe   : > { %s3083_s22 = smov (!%p268_p5, %s2158_s22), 1 }
   0xf   : > { %s277_s29 = scalar_select %p276_p6, %s2250_s28, 15 }
  0x10   : > { %s1754_s30 = smul.u32 192, %s3083_s22  ;;  %s1606_s7 = sshll.u32 %s3083_s22, 5 }
  0x11   : > { %s1605_s8 = sshll.u32 %s277_s29, 1  ;;  %s1608_s9 = sshll.u32 %s3083_s22, 1 }
  0x12   : > { %s2257_s12 = scalar_lea.vmem %s3065_s0, %s1754_s30  ;;  %s280_s13 = sadd.s32 %s1606_s7, %s1605_s8 }
  0x13   : > { %s1607_s14 = sshll.u32 %s280_s13, 3  ;;  %s2262_s17 = scalar_lea.vmem %s3071_s6, %s1608_s9 }
  0x14   : > { %s2267_s20 = scalar_lea.vmem %s3070_s5, %s1607_s14  ;;  %292 = sbr.rel (%p1609_p7) target bundleno = 27 (0x1b), region = 44 }
  0x19   : > { %vm293_vm0 = vcmask 58368   ;;  %v2172_v0 = vmov 0.0  }
  0x1a   : > { %294 = vst.msk [vmem:[%s2262_s17] sm:$0x3] %vm293_vm0, %v2172_v0 }
  0x1b PF: > { %v489_v1 = vld [vmem:[%s3069_s4] sm:$0xff]  ;;  %v491_v2 = vld [vmem:[%s3069_s4 + $0x10] sm:$0xff]  ;;  %v2173_v3 = vmov 0   ;;  %v490_v4 = vld [vmem:[%s3069_s4 + $0x8] sm:$0xff]  ;;  %s454_s10 = sadd.s32 8, %s2250_s28  ;;  %s1634_s13 = smul.u32 96, %s2154_s21 }
  0x1c   : > { %1805 = vset.pattern.permute.xlu0 %v2173_v3  ;;  %1806 = vset.pattern.permute.xlu1 %v2173_v3  ;;  %p455_p8 = scmp.lt.s32.totalorder %s454_s10, 15  ;;  %p482_p9 = scmp.lt.s32.totalorder %s454_s10, 16  ;;  %v2306_v12 = vld [vmem:[%s3066_s1] ss:$0 sm:$0xff]  ;;  %vm561_vm1 = vcmask 1046528   ;;  %vm650_vm2 = vcmask 1045504  }
  0x1d   : > { %494 = vperm.xlu0 %1805, %v489_v1   ;;  %504 = vperm.xlu1 %1806, %v491_v2   ;;  %s2283_s15 = scalar_lea.vmem %s2257_s12, %s1634_s13  ;;  %v2315_v18 = vld [vmem:[%s3067_s2] ss:$0 sm:$0xff]  ;;  %s1611_s7 = sadd.s32 4294967295, %s2250_s28  ;;  %vm1258_vm3 = vcmask 1043456   ;;  %vm1053_vm4 = vcmask 64512   ;;  %vm1070_vm5 = vcmask 130048  }
  0x1e   : > { %s456_s11 = scalar_select %p455_p8, %s454_s10, 15  ;;  %v2286_v5 = vld [vmem:[%s2283_s15 + $0x40] sm:$0xff]   ;;  %v2292_v6 = vld [vmem:[%s2283_s15 + $0x58] sm:$0xff]   ;;  %v2299_v9 = vld [vmem:[%s2283_s15 + $0x50] sm:$0xff]   ;;  %vm1087_vm6 = vcmask 195584   ;;  %vm1104_vm7 = vcmask 261120  }
  0x1f   : > { %v2296_v8 = vld [vmem:[%s2283_s15 + $0x38] sm:$0xff]   ;;  %s483_s21 = scalar_select %p482_p9, 1, 0  ;;  %v1675_v11 = vunpack.c.h.bf16 %v2286_v5  ;;  %v1682_v13 = vunpack.c.l.bf16 %v2299_v9  ;;  %v1687_v14 = vunpack.c.h.bf16 %v2292_v6  ;;  %v2339_v30 = vld [vmem:[%s2283_s15 + $0x8] sm:$0xff]   ;;  %v2343_v31 = vld [vmem:[%s2283_s15 + $0x10] sm:$0xff]   ;;  %v1674_v0 = vunpack.c.l.bf16 %v2286_v5 }
  0x20   : > { %s1635_s14 = smul.u32 12, %s456_s11  ;;  %v1670_v10 = vunpack.c.l.bf16 %v2296_v8  ;;  %v1641_v32 = vld [vmem:[%s2283_s15] sm:$0xff]   ;;  %v1694_v33 = vld [vmem:[%s2283_s15 + $0x18] sm:$0xff]   ;;  %v2348_v34 = vld [vmem:[%s2283_s15 + $0x28] sm:$0xff]   ;;  %v1647_v35 = vunpack.c.h.bf16 %v2339_v30  ;;  %p299_p10 = scmp.gt.s32.totalorder %s1611_s7, 0  ;;  %v1650_v36 = vunpack.c.l.bf16 %v2343_v31  ;;  %v1671_v63 = vunpack.c.h.bf16 %v2296_v8 }
  0x21   : > { %499 = vperm.xlu0 %1805, %v490_v4   ;;  %v399_v17 = vmul.f32 %v1675_v11, %v2306_v12  ;;  %v402_v19 = vmul.f32 %v1682_v13, %v2306_v12  ;;  %v405_v20 = vmul.f32 %v1687_v14, %v2306_v12  ;;  %s484_s30 = scvt.s32.f32 %s483_s21  ;;  %v1642_v37 = vunpack.c.l.bf16 %v1641_v32  ;;  %v2353_v40 = vld [vmem:[%s2283_s15 + $0x20] sm:$0xff]   ;;  %v1697_v49 = vld [vmem:[%s2283_s15 + $0x30] sm:$0xff]   ;;  %v1700_v56 = vld [vmem:[%s2283_s15 + $0x48] sm:$0xff]   ;;  %p475_p11 = scmp.gt.s32.totalorder %s2250_s28, 0 }
  0x22   : > { %s2289_s16 = scalar_lea.vmem %s2257_s12, %s1635_s14  ;;  %v396_v16 = vmul.f32 %v1670_v10, %v2306_v12  ;;  %v1643_v38 = vunpack.c.h.bf16 %v1641_v32  ;;  %v1654_v39 = vunpack.c.l.bf16 %v1694_v33  ;;  %v1655_v41 = vunpack.c.h.bf16 %v1694_v33  ;;  %s3085_s7 = smov (!%p299_p10, %s1611_s7), 0 }
  0x23   : > { %v462_v7 = vld [vmem:[%s2289_s16 + $0x8] sm:$0xf]  ;;  %v2324_v23 = vadd.f32 %v2315_v18, %v399_v17  ;;  %v2327_v24 = vadd.f32 %v2315_v18, %v402_v19  ;;  %v2330_v25 = vadd.f32 %v2315_v18, %v405_v20  ;;  %v2333_v28 = vstv %s484_s30  ;;  %s1633_s8 = smul.u32 12, %s3085_s7  ;;  %v1689_v33 = vld [vmem:[%s2289_s16] sm:$0xff]   ;;  %s2175_s28 = smov 48  }
  0x24   : > { %v465_v15 = vunpack.c.l.bf16 %v462_v7  ;;  %v2321_v22 = vadd.f32 %v2315_v18, %v396_v16  ;;  %v1662_v42 = vunpack.c.l.bf16 %v2348_v34  ;;  %v385_v43 = vmul.f32 %v1647_v35, %v2306_v12  ;;  %s2447_s10 = scalar_select %p475_p11, 1, 0 }
  0x25   : > { %v1659_v44 = vunpack.c.h.bf16 %v2353_v40  ;;  %v386_v45 = vmul.f32 %v1650_v36, %v2306_v12  ;;  %v382_v46 = vmul.f32 %v1642_v37, %v2306_v12  ;;  %v383_v47 = vmul.f32 %v1643_v38, %v2306_v12  ;;  %s303_s9 = scalar_lea.vmem %s2257_s12, %s1633_s8  ;;  %s2174_s12 = smov 24  }
  0x26   : > { %v468_v21 = vmul.f32 %v2306_v12, %v465_v15  ;;  %v388_v48 = vmul.f32 %v1654_v39, %v2306_v12  ;;  %v389_v50 = vmul.f32 %v1655_v41, %v2306_v12  ;;  %v392_v51 = vmul.f32 %v1662_v42, %v2306_v12  ;;  %v306_v17 = vld [vmem:[%s303_s9 + $0x8] sm:$0xf]  ;;  %v1637_v35 = vld [vmem:[%s303_s9] sm:$0xff]   ;;  %s477_s11 = scvt.s32.f32 %s2447_s10  ;;  %s2176_s13 = smov 8  }
  0x27   : > { %v409_v52 = vadd.f32 %v2315_v18, %v385_v43  ;;  %v391_v53 = vmul.f32 %v1659_v44, %v2306_v12  ;;  %v1666_v54 = vunpack.c.l.bf16 %v1697_v49  ;;  %v1667_v55 = vunpack.c.h.bf16 %v1697_v49  ;;  %s2177_s14 = smov 16   ;;  %s2178_s21 = smov 32  }
  0x28   : > { %v471_v26 = vadd.f32 %v2315_v18, %v468_v21  ;;  %v410_v57 = vadd.f32 %v2315_v18, %v386_v45  ;;  %v406_v58 = vadd.f32 %v2315_v18, %v382_v46  ;;  %v407_v59 = vadd.f32 %v2315_v18, %v383_v47  ;;  %s2179_s22 = smov 40   ;;  %s2180_s7 = smov 56  }
  0x29   : > { %v412_v60 = vadd.f32 %v2315_v18, %v388_v48  ;;  %v413_v61 = vadd.f32 %v2315_v18, %v389_v50  ;;  %v2377_v62 = vadd.f32 %v2315_v18, %v392_v51  ;;  %v1678_v1 = vunpack.c.l.bf16 %v1700_v56 }
  0x2a   : > { %v474_v27 = vmax.f32 %v471_v26, 0.0  ;;  %v1679_v2 = vunpack.c.h.bf16 %v1700_v56  ;;  %v1683_v3 = vunpack.c.h.bf16 %v2299_v9  ;;  %v1686_v4 = vunpack.c.l.bf16 %v2292_v6 }
  0x2b   : > { %v433_v10 = vmax.f32 %v409_v52, 0.0  ;;  %v2386_v11 = vadd.f32 %v2315_v18, %v391_v53  ;;  %v394_v13 = vmul.f32 %v1666_v54, %v2306_v12  ;;  %v395_v14 = vmul.f32 %v1667_v55, %v2306_v12 }
  0x2c   : > { %v2336_v29 = vmul.f32 %v2333_v28, %v474_v27  ;;  %v434_v8 = vmax.f32 %v410_v57, 0.0  ;;  %v430_v5 = vmax.f32 %v406_v58, 0.0  ;;  %v431_v15 = vmax.f32 %v407_v59, 0.0 }
  0x2d   : > { %v436_v16 = vmax.f32 %v412_v60, 0.0  ;;  %v437_v9 = vmax.f32 %v413_v61, 0.0  ;;  %v440_v6 = vmax.f32 %v2377_v62, 0.0  ;;  %v397_v19 = vmul.f32 %v1671_v63, %v2306_v12 }
  0x2e   : > { %v398_v20 = vmul.f32 %v1674_v0, %v2306_v12  ;;  %v400_v21 = vmul.f32 %v1678_v1, %v2306_v12  ;;  %v401_v26 = vmul.f32 %v1679_v2, %v2306_v12  ;;  %v403_v27 = vmul.f32 %v1683_v3, %v2306_v12 }
  0x2f   : > { %v404_v32 = vmul.f32 %v1686_v4, %v2306_v12  ;;  %v418_v37 = vadd.f32 %v2315_v18, %v394_v13  ;;  %v419_v38 = vadd.f32 %v2315_v18, %v395_v14  ;;  %v1639_v39 = vunpack.c.h.bf16 %v1637_v35 }
  0x30   : > { %v309_v41 = vunpack.c.l.bf16 %v306_v17  ;;  %v2417_v46 = vadd.f32 %v2315_v18, %v397_v19  ;;  %v1690_v47 = vunpack.c.l.bf16 %v1689_v33  ;;  %v1691_v48 = vunpack.c.h.bf16 %v1689_v33 }
  0x31   : > { %v1638_v49 = vunpack.c.l.bf16 %v1637_v35  ;;  %v1646_v53 = vunpack.c.l.bf16 %v2339_v30  ;;  %v422_v54 = vadd.f32 %v2315_v18, %v398_v20  ;;  %v2429_v55 = vadd.f32 %v2315_v18, %v400_v21 }
  0x32   : > { %v317_v56 = vmul.f32 %v1639_v39, %v2306_v12  ;;  %v318_v57 = vmul.f32 %v2306_v12, %v309_v41  ;;  %v439_v59 = vmax.f32 %v2386_v11, 0.0  ;;  %v2440_v30 = vadd.f32 %v2315_v18, %v401_v26 }
  0x33   : > { %v2443_v60 = vadd.f32 %v2315_v18, %v403_v27  ;;  %v443_v61 = vmax.f32 %v419_v38, 0.0  ;;  %v466_v62 = vmul.f32 %v1690_v47, %v2306_v12  ;;  %v467_v63 = vmul.f32 %v1691_v48, %v2306_v12 }
  0x34   : > { %v316_v0 = vmul.f32 %v1638_v49, %v2306_v12  ;;  %v384_v3 = vmul.f32 %v1646_v53, %v2306_v12  ;;  %v2459_v4 = vadd.f32 %v2315_v18, %v404_v32  ;;  %v327_v11 = vadd.f32 %v2315_v18, %v318_v57 }
  0x35   : > { %v1651_v13 = vunpack.c.h.bf16 %v2343_v31  ;;  %v470_v17 = vadd.f32 %v2315_v18, %v467_v63  ;;  %v1658_v31 = vunpack.c.l.bf16 %v2353_v40  ;;  %v448_v21 = vmax.f32 %v2429_v55, 0.0 }
  0x36   : > { %v408_v20 = vadd.f32 %v2315_v18, %v384_v3  ;;  %v330_v27 = vmax.f32 %v327_v11, 0.0  ;;  %v449_v33 = vmax.f32 %v2440_v30, 0.0  ;;  %v451_v35 = vmax.f32 %v2443_v60, 0.0 }
  0x37   : > { %v387_v32 = vmul.f32 %v1651_v13, %v2306_v12  ;;  %v473_v39 = vmax.f32 %v470_v17, 0.0  ;;  %v1663_v55 = vunpack.c.h.bf16 %v2348_v34  ;;  %v452_v57 = vmax.f32 %v2459_v4, 0.0 }
  0x38   : > { %v432_v49 = vmax.f32 %v408_v20, 0.0  ;;  %v450_v13 = vmax.f32 %v2327_v24, 0.0  ;;  %vm1121_vm8 = vcmask 326656   ;;  %vm1138_vm9 = vcmask 392192  }
  0x39   : > { %v487_v30 = vmul.f32 %v2333_v28, %v473_v39  ;;  %vm1155_vm10 = vcmask 457728   ;;  %vm1172_vm11 = vcmask 523264   ;;  %vm1233_vm12 = vcmask 588800  }
  0x3a   : > { %vm1450_vm13 = vcmask 1040384   ;;  %vm1453_vm14 = vcmask 58368  }
  0x98   : > { %v2383_v7 = vpop.permute.xlu0 %494 }
  0x99   : > { %v2404_v42 = vmul.f32 %v2383_v7, %v433_v10  ;;  %v2410_v44 = vmul.f32 %v2383_v7, %v430_v5  ;;  %v2436_v58 = vmul.f32 %v2383_v7, %v436_v16  ;;  %v326_v10 = vadd.f32 %v2315_v18, %v317_v56 }
  0x9a   : > { %v2467_v14 = vmul.f32 %v2383_v7, %v439_v59  ;;  %v445_v5 = vmax.f32 %v2417_v46, 0.0  ;;  %v469_v16 = vadd.f32 %v2315_v18, %v466_v62  ;;  %v390_v46 = vmul.f32 %v1658_v31, %v2306_v12 }
  0x9b   : > { %v329_v26 = vmax.f32 %v326_v10, 0.0  ;;  %v2527_v4 = vmul.f32 %v2383_v7, %v448_v21  ;;  %v2530_v10 = vmul.f32 %v2383_v7, %v451_v35 }
  0x9c   : > { %v2399_v36 = vpop.permute.xlu0 %499  ;;  %v472_v38 = vmax.f32 %v469_v16, 0.0  ;;  %v2503_v56 = vmul.f32 %v2383_v7, %v445_v5 }
  0x9d   : > { %v2407_v43 = vmul.f32 %v2399_v36, %v434_v8  ;;  %v2413_v45 = vmul.f32 %v2399_v36, %v431_v15  ;;  %v2424_v52 = vmul.f32 %v2399_v36, %v437_v9  ;;  %v2455_v2 = vmul.f32 %v2399_v36, %v440_v6 }
  0x9e   : > { %v442_v8 = vmax.f32 %v418_v37, 0.0  ;;  %v446_v15 = vmax.f32 %v422_v54, 0.0  ;;  %v325_v9 = vadd.f32 %v2315_v18, %v316_v0  ;;  %v2478_v19 = vmul.f32 %v2399_v36, %v443_v61 }
  0x9f   : > { %v1812_v50 = vpack.i.bf16 %v2407_v43, %v2404_v42  ;;  %v1807_v51 = vpack.i.bf16 %v2413_v45, %v2410_v44  ;;  %v1822_v1 = vpack.i.bf16 %v2424_v52, %v2436_v58  ;;  %v1832_v6 = vpack.i.bf16 %v2455_v2, %v2467_v14 }
  0xa0   : > { %v2486_v40 = vmul.f32 %v2383_v7, %v442_v8  ;;  %v478_v37 = vstv %s477_s11  ;;  %v328_v41 = vmax.f32 %v325_v9, 0.0  ;;  %v2494_v48 = vmul.f32 %v2399_v36, %v446_v15 }
  0xa1   : > { %1813 = vrot.lane.b32.xlu0 %v1812_v50, %s2174_s12  ;;  %1808 = vrot.lane.b32.xlu1 %v1807_v51, %s2174_s12  ;;  %v480_v51 = vmul.f32 %v478_v37, %v329_v26  ;;  %v481_v53 = vmul.f32 %v478_v37, %v330_v27  ;;  %v411_v54 = vadd.f32 %v2315_v18, %v387_v32  ;;  %v568_v5 = vrot.slane %v2413_v45, 1 }
  0xa2   : > { %v1842_v47 = vpack.i.bf16 %v2478_v19, %v2486_v40  ;;  %v486_v59 = vmul.f32 %v2333_v28, %v472_v38  ;;  %v479_v60 = vmul.f32 %v478_v37, %v328_v41  ;;  %v2509_v61 = vadd.f32 %v2315_v18, %v390_v46 }
  0xa3   : > { %v1852_v34 = vpack.i.bf16 %v2494_v48, %v2503_v56  ;;  %v2514_v62 = vmul.f32 %v2399_v36, %v449_v33  ;;  %v2518_v0 = vmul.f32 %v2399_v36, %v480_v51  ;;  %v435_v3 = vmax.f32 %v411_v54, 0.0 }
  0xa4   : > { %v2522_v28 = vmul.f32 %v1663_v55, %v2306_v12  ;;  %v2533_v11 = vmul.f32 %v2399_v36, %v452_v57  ;;  %v2537_v8 = vmul.f32 %v2383_v7, %v486_v59  ;;  %v567_v12 = vrot.slane %v2410_v44, 1 }
  0xa5   : > { %1823 = vrot.lane.b32.xlu0 %v1822_v1, %s2175_s28  ;;  %1818 = vrot.lane.b32.xlu1 %v1812_v50, %s2175_s28  ;;  %v2496_v50 = vpop.permute.xlu1 %504  ;;  %v2542_v15 = vmul.f32 %v2383_v7, %v479_v60  ;;  %v1862_v16 = vpack.i.bf16 %v2514_v62, %v2527_v4  ;;  %v657_v9 = vrot.slane %v2413_v45, 2  ;;  %v563_v31 = vrot.slane %v2518_v0, 1 }
  0xa6   : > { %v512_v63 = vmul.f32 %v2496_v50, %v432_v49  ;;  %v2549_v20 = vmul.f32 %v2496_v50, %v435_v3  ;;  %v1872_v7 = vpack.i.bf16 %v2533_v11, %v2530_v10  ;;  %v2556_v21 = vmul.f32 %v2399_v36, %v487_v30 }
  0xa7   : > { %v656_v26 = vrot.slane %v2410_v44, 2  ;;  %v569_v27 = vsel %vm561_vm1, %v567_v12, %v568_v5  ;;  %v562_v32 = vrot.slane %v2542_v15, 1  ;;  %v652_v33 = vrot.slane %v2518_v0, 2 }
  0xa8   : > { %v570_v17 = vrot.slane %v512_v63, 1  ;;  %v659_v24 = vrot.slane %v512_v63, 2  ;;  %v651_v39 = vrot.slane %v2542_v15, 2  ;;  %v573_v41 = vrot.slane %v2407_v43, 1 }
  0xa9   : > { %1833 = vrot.lane.b32.xlu0 %v1832_v6, %s2174_s12  ;;  %1828 = vrot.lane.b32.xlu1 %v1822_v1, %s2174_s12  ;;  %v509_v1 = vmul.f32 %v2496_v50, %v481_v53  ;;  %v658_v38 = vsel %vm650_vm2, %v656_v26, %v657_v9  ;;  %v564_v36 = vsel %vm561_vm1, %v562_v32, %v563_v31  ;;  %v575_v49 = vrot.slane %v2549_v20, 1 }
  0xaa   : > { %v571_v37 = vsel %vm561_vm1, %v568_v5, %v570_v17  ;;  %v572_v51 = vrot.slane %v2404_v42, 1  ;;  %v438_v53 = vmax.f32 %v2509_v61, 0.0  ;;  %v453_v54 = vmax.f32 %v2330_v25, 0.0 }
  0xab   : > { %v654_v35 = vrot.slane %v509_v1, 2  ;;  %v1882_v55 = vpack.i.bf16 %v2556_v21, %v2537_v8  ;;  %v1892_v57 = vpack.i.bf16 %v571_v37, %v569_v27  ;;  %v653_v59 = vsel %vm650_vm2, %v651_v39, %v652_v33 }
  0xac   : > { %v574_v63 = vsel %vm561_vm1, %v572_v51, %v573_v41  ;;  %v576_v3 = vsel %vm561_vm1, %v573_v41, %v575_v49  ;;  %v530_v61 = vmul.f32 %v2496_v50, %v450_v13  ;;  %v597_v25 = vrot.slane %v2527_v4, 1 }
  0xad   : > { %1843 = vrot.lane.b32.xlu0 %v1842_v47, %s2175_s28  ;;  %1838 = vrot.lane.b32.xlu1 %v1832_v6, %s2175_s28  ;;  %v565_v6 = vrot.slane %v509_v1, 1  ;;  %v655_v30 = vsel %vm650_vm2, %v652_v33, %v654_v35  ;;  %v662_v1 = vrot.slane %v2407_v43, 2  ;;  %v598_v12 = vrot.slane %v2514_v62, 1 }
  0xae   : > { %v1897_v5 = vpack.i.bf16 %v655_v30, %v653_v59  ;;  %v664_v17 = vrot.slane %v2549_v20, 2  ;;  %v686_v26 = vrot.slane %v2527_v4, 2  ;;  %v687_v27 = vrot.slane %v2514_v62, 2 }
  0xaf   : > { %v566_v46 = vsel %vm561_vm1, %v563_v31, %v565_v6  ;;  %v578_v31 = vrot.slane %v2424_v52, 1  ;;  %v599_v13 = vsel %vm561_vm1, %v597_v25, %v598_v12  ;;  %v600_v6 = vrot.slane %v530_v61, 1 }
  0xb0   : > { %v1887_v60 = vpack.i.bf16 %v566_v46, %v564_v36  ;;  %v533_v20 = vmul.f32 %v2496_v50, %v453_v54  ;;  %v790_v35 = vrot.slane %v2530_v10, 1  ;;  %v791_v39 = vrot.slane %v2533_v11, 1 }
  0xb1   : > { %1853 = vrot.lane.b32.xlu0 %v1852_v34, %s2174_s12  ;;  %1848 = vrot.lane.b32.xlu1 %v1842_v47, %s2174_s12  ;;  %v660_v47 = vsel %vm650_vm2, %v657_v9, %v659_v24  ;;  %v2592_v9 = vmul.f32 %v2496_v50, %v438_v53  ;;  %v2596_v24 = vpack.i.bf16 %v576_v3, %v574_v63  ;;  %v843_v46 = vrot.slane %v2530_v10, 2 }
  0xb2   : > { %v601_v33 = vsel %vm561_vm1, %v598_v12, %v600_v6  ;;  %v793_v36 = vrot.slane %v533_v20, 1  ;;  %v792_v49 = vsel %vm561_vm1, %v790_v35, %v791_v39  ;;  %v844_v51 = vrot.slane %v2533_v11, 2 }
  0xb3   : > { %v2606_v37 = vpack.i.bf16 %v601_v33, %v599_v13  ;;  %v846_v54 = vrot.slane %v533_v20, 2  ;;  %v947_v30 = vrot.slane %v2537_v8, 1  ;;  %v948_v11 = vrot.slane %v2556_v21, 1 }
  0xb4   : > { %v794_v53 = vsel %vm561_vm1, %v791_v39, %v793_v36  ;;  %v845_v10 = vsel %vm650_vm2, %v843_v46, %v844_v51  ;;  %v1000_v3 = vrot.slane %v2537_v8, 2  ;;  %v1001_v25 = vrot.slane %v2556_v21, 2  ;;  %v2131_v46 = vld [vmem:[%s3068_s3] sm:$0xff]  }
  0xb5   : > { %1863 = vrot.lane.b32.xlu0 %v1862_v16, %s2175_s28  ;;  %1858 = vrot.lane.b32.xlu1 %v1852_v34, %s2175_s28  ;;  %v2579_v34 = vpack.i.bf16 %v660_v47, %v658_v38  ;;  %v688_v38 = vsel %vm650_vm2, %v686_v26, %v687_v27  ;;  %v2622_v59 = vpack.i.bf16 %v794_v53, %v792_v49  ;;  %v580_v13 = vrot.slane %v2592_v9, 1 }
  0xb6   : > { %v2649_v21 = vsel %vm650_vm2, %v1000_v3, %v1001_v25  ;;  %v417_v35 = vadd.f32 %v2315_v18, %v2522_v28  ;;  %v669_v39 = vrot.slane %v2592_v9, 2  ;;  %v666_v28 = vrot.slane %v2436_v58, 2 }
  0xb7   : > { %v581_v20 = vsel %vm561_vm1, %v578_v31, %v580_v13 }
  0xb8   : > { %v441_v18 = vmax.f32 %v417_v35, 0.0  ;;  %v676_v35 = vrot.slane %v2486_v40, 2 }
  0xb9   : > { %1873 = vrot.lane.b32.xlu0 %v1872_v7, %s2174_s12  ;;  %1868 = vrot.lane.b32.xlu1 %v1862_v16, %s2174_s12  ;;  %v661_v16 = vrot.slane %v2404_v42, 2  ;;  %s2181_s12 = smov 64  }
  0xba   : > { %v521_v36 = vmul.f32 %v2496_v50, %v441_v18  ;;  %v593_v18 = vrot.slane %v2494_v48, 1 }
  0xbb   : > { %v663_v32 = vsel %vm650_vm2, %v661_v16, %v662_v1  ;;  %v665_v16 = vsel %vm650_vm2, %v662_v1, %v664_v17  ;;  %v577_v1 = vrot.slane %v2436_v58, 1 }
  0xbc   : > { %v585_v53 = vrot.slane %v521_v36, 1 }
  0xbd   : > { %1883 = vrot.lane.b32.xlu0 %v1882_v55, %s2175_s28  ;;  %1878 = vrot.lane.b32.xlu1 %v1872_v7, %s2175_s28  ;;  %v689_v7 = vrot.slane %v530_v61, 2  ;;  %v536_v55 = vmul.f32 %v2496_v50, %v2336_v29  ;;  %v2632_v61 = vsel %vm561_vm1, %v947_v30, %v948_v11  ;;  %v579_v33 = vsel %vm561_vm1, %v577_v1, %v578_v31 }
  0xbe   : > { %v667_v31 = vrot.slane %v2424_v52, 2 }
  0xbf   : > { %v690_v41 = vsel %vm650_vm2, %v687_v27, %v689_v7  ;;  %v950_v63 = vrot.slane %v536_v55, 1  ;;  %v1003_v12 = vrot.slane %v536_v55, 2  ;;  %v2128_v27 = vld [vmem:[%s3068_s3 + $0x18] sm:$0xff]   ;;  %v672_v55 = vrot.slane %v2455_v2, 2 }
  0xc0   : > { %v2612_v47 = vpack.i.bf16 %v690_v41, %v688_v38  ;;  %v1932_v38 = vpack.i.bf16 %v581_v20, %v579_v33  ;;  %v668_v41 = vsel %vm650_vm2, %v666_v28, %v667_v31  ;;  %v670_v9 = vsel %vm650_vm2, %v667_v31, %v669_v39 }
  0xc1   : > { %1893 = vrot.lane.b32.xlu0 %v1892_v57, %s2176_s13  ;;  %1888 = vrot.lane.b32.xlu1 %v1887_v60, %s2176_s13  ;;  %v847_v60 = vsel %vm650_vm2, %v844_v51, %v846_v54  ;;  %v2641_v6 = vsel %vm561_vm1, %v948_v11, %v950_v63  ;;  %v2652_v26 = vsel %vm650_vm2, %v1001_v25, %v1003_v12  ;;  %v583_v51 = vrot.slane %v2455_v2, 1 }
  0xc2   : > { %v2629_v29 = vpack.i.bf16 %v847_v60, %v845_v10  ;;  %v2112_v8 = vpack.i.bf16 %v2641_v6, %v2632_v61  ;;  %v2122_v17 = vpack.i.bf16 %v2652_v26, %v2649_v21  ;;  %v1947_v49 = vpack.i.bf16 %v670_v9, %v668_v41 }
  0xc3   : > { %v444_v54 = vmax.f32 %v2321_v22, 0.0  ;;  %v586_v30 = vsel %vm561_vm1, %v583_v51, %v585_v53  ;;  %v674_v11 = vrot.slane %v521_v36, 2  ;;  %v671_v22 = vrot.slane %v2467_v14, 2 }
  0xc4   : > { %v588_v12 = vrot.slane %v2478_v19, 1  ;;  %v447_v20 = vmax.f32 %v2324_v23, 0.0  ;;  %v592_v28 = vrot.slane %v2503_v56, 1  ;;  %v681_v36 = vrot.slane %v2503_v56, 2 }
  0xc5   : > { %1903 = vrot.lane.b32.xlu0 %v2579_v34, %s2177_s14  ;;  %1898 = vrot.lane.b32.xlu1 %v1897_v5, %s2177_s14  ;;  %v2127_v5 = vld [vmem:[%s3068_s3 + $0x20] ss:$0 sps:$4 sm:$0xff]   ;;  %v524_v60 = vmul.f32 %v2496_v50, %v444_v54  ;;  %v673_v3 = vsel %vm650_vm2, %v671_v22, %v672_v55  ;;  %v675_v25 = vsel %vm650_vm2, %v672_v55, %v674_v11 }
  0xc6   : > { %1752 = vmatprep.subr.msk.bf16.mxu0 %vm1258_vm3, %v2127_v5  ;;  %v1260_v7 = vsel %vm1258_vm3, %v2127_v5, 0  ;;  %1753 = vmatprep.subr.msk.bf16.mxu1 %vm1258_vm3, %v2127_v5  ;;  %v1982_v13 = vpack.i.bf16 %v675_v25, %v673_v3  ;;  %v527_v31 = vmul.f32 %v2496_v50, %v447_v20  ;;  %v682_v50 = vrot.slane %v2494_v48, 2 }
  0xc7   : > { %1717 = vmatpush3.bf16.msra.mxu0 %v1260_v7  ;;  %1747 = vmatpush3.bf16.msra.mxu1 %v1260_v7  ;;  %v590_v5 = vrot.slane %v524_v60, 1  ;;  %v677_v7 = vrot.slane %v2478_v19, 2  ;;  %v679_v33 = vrot.slane %v524_v60, 2 }
  0xc8   : > { %1718 = vmatprep.subr.bf16.mxu0 %v2128_v27  ;;  %1743 = vmatprep.subr.bf16.mxu1 %v2128_v27  ;;  %v595_v23 = vrot.slane %v527_v31, 1  ;;  %v684_v9 = vrot.slane %v527_v31, 2 }
  0xc9   : > { %1913 = vrot.lane.b32.xlu0 %v2596_v24, %s2178_s21  ;;  %1908 = vrot.lane.b32.xlu1 %v1892_v57, %s2178_s21  ;;  %v1922_v57 = vpack.i.bf16 %v665_v16, %v663_v32  ;;  %v2129_v32 = vld [vmem:[%s3068_s3 + $0x10] sm:$0xff]   ;;  %v587_v16 = vrot.slane %v2486_v40, 1 }
  0xca   : > { %v596_v41 = vsel %vm561_vm1, %v593_v18, %v595_v23 }
  0xcb   : > { %1719 = vmatpush3.bf16.msra.mxu0 %v2128_v27  ;;  %1748 = vmatpush3.bf16.msra.mxu1 %v2128_v27  ;;  %v589_v1 = vsel %vm561_vm1, %v587_v16, %v588_v12  ;;  %v591_v27 = vsel %vm561_vm1, %v588_v12, %v590_v5 }
  0xcc   : > { %1720 = vmatprep.subr.bf16.mxu0 %v2129_v32  ;;  %1744 = vmatprep.subr.bf16.mxu1 %v2129_v32 }
  0xcd   : > { %1923 = vrot.lane.b32.xlu0 %v1922_v57, %s2179_s22  ;;  %1918 = vrot.lane.b32.xlu1 %v2579_v34, %s2179_s22  ;;  %v2130_v34 = vld [vmem:[%s3068_s3 + $0x8] sm:$0xff]  }
  0xcf   : > { %1721 = vmatpush3.bf16.msra.mxu0 %v2129_v32  ;;  %1749 = vmatpush3.bf16.msra.mxu1 %v2129_v32  ;;  %v678_v32 = vsel %vm650_vm2, %v676_v35, %v677_v7 }
  0xd0   : > { %1722 = vmatprep.subr.bf16.mxu0 %v2130_v34  ;;  %1745 = vmatprep.subr.bf16.mxu1 %v2130_v34 }
  0xd1   : > { %1933 = vrot.lane.b32.xlu0 %v1932_v38, %s2180_s7  ;;  %1928 = vrot.lane.b32.xlu1 %v2596_v24, %s2180_s7 }
  0xd3   : > { %1723 = vmatpush3.bf16.msra.mxu0 %v2130_v34  ;;  %1750 = vmatpush3.bf16.msra.mxu1 %v2130_v34  ;;  %v594_v34 = vsel %vm561_vm1, %v592_v28, %v593_v18 }
  0xd4   : > { %1724 = vmatprep.subr.bf16.mxu0 %v2131_v46  ;;  %1746 = vmatprep.subr.bf16.mxu1 %v2131_v46 }
  0xd5   : > { %1943 = vrot.lane.b32.xlu0 %v2596_v24, %s2176_s13  ;;  %1938 = vrot.lane.b32.xlu1 %v1922_v57, %s2181_s12  ;;  %v582_v24 = vrot.slane %v2467_v14, 1 }
  0xd7   : > { %v584_v10 = vsel %vm561_vm1, %v582_v24, %v583_v51  ;;  %1725 = vmatpush3.bf16.msra.mxu0 %v2131_v46  ;;  %1751 = vmatpush3.bf16.msra.mxu1 %v2131_v46  ;;  %v2032_v46 = vpack.i.bf16 %v596_v41, %v594_v34  ;;  %v685_v51 = vsel %vm650_vm2, %v682_v50, %v684_v9 }
  0xd8   : > { %v1972_v63 = vpack.i.bf16 %v586_v30, %v584_v10 }
  0xd9   : > { %1953 = vrot.lane.b32.xlu0 %v1932_v38, %s2176_s13  ;;  %1948 = vrot.lane.b32.xlu1 %v1947_v49, %s2181_s12 }
  0xdd   : > { %1963 = vrot.lane.b32.xlu0 %v1947_v49, %s2177_s14  ;;  %1958 = vrot.lane.b32.xlu1 %v1922_v57, %s2177_s14  ;;  %v1992_v57 = vpack.i.bf16 %v591_v27, %v589_v1 }
  0xe1   : > { %1973 = vrot.lane.b32.xlu0 %v1972_v63, %s2178_s21  ;;  %1968 = vrot.lane.b32.xlu1 %v1932_v38, %s2178_s21  ;;  %v680_v38 = vsel %vm650_vm2, %v677_v7, %v679_v33 }
  0xe2   : > { %v2007_v39 = vpack.i.bf16 %v680_v38, %v678_v32 }
  0xe5   : > { %1983 = vrot.lane.b32.xlu0 %v1982_v13, %s2179_s22  ;;  %1978 = vrot.lane.b32.xlu1 %v1947_v49, %s2179_s22  ;;  %v683_v49 = vsel %vm650_vm2, %v681_v36, %v682_v50 }
  0xe6   : > { %v2042_v53 = vpack.i.bf16 %v685_v51, %v683_v49 }
  0xe9   : > { %1993 = vrot.lane.b32.xlu0 %v1992_v57, %s2180_s7  ;;  %1988 = vrot.lane.b32.xlu1 %v1972_v63, %s2180_s7 }
  0xed   : > { %2003 = vrot.lane.b32.xlu0 %v1972_v63, %s2176_s13  ;;  %1998 = vrot.lane.b32.xlu1 %v1982_v13, %s2181_s12 }
  0xf1   : > { %2013 = vrot.lane.b32.xlu0 %v1992_v57, %s2176_s13  ;;  %2008 = vrot.lane.b32.xlu1 %v2007_v39, %s2181_s12 }
  0xf5   : > { %2023 = vrot.lane.b32.xlu0 %v2007_v39, %s2177_s14  ;;  %2018 = vrot.lane.b32.xlu1 %v1982_v13, %s2177_s14 }
  0xf9   : > { %2033 = vrot.lane.b32.xlu0 %v2032_v46, %s2178_s21  ;;  %2028 = vrot.lane.b32.xlu1 %v1992_v57, %s2178_s21 }
  0xfd   : > { %2043 = vrot.lane.b32.xlu0 %v2042_v53, %s2179_s22  ;;  %2038 = vrot.lane.b32.xlu1 %v2007_v39, %s2179_s22 }
 0x101   : > { %2053 = vrot.lane.b32.xlu0 %v2606_v37, %s2180_s7  ;;  %2048 = vrot.lane.b32.xlu1 %v2032_v46, %s2180_s7 }
 0x105   : > { %2063 = vrot.lane.b32.xlu0 %v2032_v46, %s2176_s13  ;;  %2058 = vrot.lane.b32.xlu1 %v2042_v53, %s2181_s12 }
 0x109   : > { %2073 = vrot.lane.b32.xlu0 %v2606_v37, %s2176_s13  ;;  %2068 = vrot.lane.b32.xlu1 %v2612_v47, %s2181_s12 }
 0x10d   : > { %2083 = vrot.lane.b32.xlu0 %v2612_v47, %s2177_s14  ;;  %2078 = vrot.lane.b32.xlu1 %v2042_v53, %s2177_s14 }
 0x111   : > { %2093 = vrot.lane.b32.xlu0 %v2622_v59, %s2178_s21  ;;  %2088 = vrot.lane.b32.xlu1 %v2606_v37, %s2178_s21 }
 0x113   : > { %v2752_v54 = vpop.permute.xlu0 %1813  ;;  %v2754_v24 = vpop.permute.xlu1 %1808 }
 0x114   : > { %v1811_v20 = vunpack.i.h.bf16 %v2754_v24  ;;  %v1810_v35 = vunpack.i.l.bf16 %v2754_v24  ;;  %v1816_v46 = vunpack.i.h.bf16 %v2752_v54 }
 0x115   : > { %2103 = vrot.lane.b32.xlu0 %v2629_v29, %s2179_s22  ;;  %2098 = vrot.lane.b32.xlu1 %v2612_v47, %s2179_s22 }
 0x117   : > { %v2760_v55 = vpop.permute.xlu0 %1823  ;;  %v2762_v10 = vpop.permute.xlu1 %1818 }
 0x119   : > { %2113 = vrot.lane.b32.xlu0 %v2112_v8, %s2180_s7  ;;  %2108 = vrot.lane.b32.xlu1 %v2622_v59, %s2180_s7 }
 0x11b   : > { %v2770_v37 = vpop.permute.xlu0 %1833  ;;  %v2772_v30 = vpop.permute.xlu1 %1828 }
 0x11d   : > { %2123 = vrot.lane.b32.xlu0 %v2122_v17, %s2181_s12  ;;  %2118 = vrot.lane.b32.xlu1 %v2629_v29, %s2181_s12 }
 0x11f   : > { %v2780_v47 = vpop.permute.xlu0 %1843  ;;  %v2782_v11 = vpop.permute.xlu1 %1838 }
 0x123   : > { %v2784_v61 = vpop.permute.xlu0 %1853  ;;  %v2786_v6 = vpop.permute.xlu1 %1848 }
 0x127   : > { %v2788_v59 = vpop.permute.xlu0 %1863  ;;  %v2790_v8 = vpop.permute.xlu1 %1858 }
 0x12b   : > { %v2792_v60 = vpop.permute.xlu0 %1873  ;;  %v2794_v22 = vpop.permute.xlu1 %1868 }
 0x12f   : > { %v2796_v21 = vpop.permute.xlu0 %1883  ;;  %v2798_v26 = vpop.permute.xlu1 %1878 }
 0x133   : > { %v1894_v29 = vpop.permute.xlu0 %1893  ;;  %v1889_v17 = vpop.permute.xlu1 %1888 }
 0x134   : > { %v1896_v25 = vunpack.i.h.bf16 %v1894_v29  ;;  %v1895_v12 = vunpack.i.l.bf16 %v1894_v29  ;;  %v1891_v5 = vunpack.i.h.bf16 %v1889_v17  ;;  %v1890_v16 = vunpack.i.l.bf16 %v1889_v17 }
 0x136   : > { %v1057_v32 = vsel %vm1053_vm4, %v2413_v45, %v1896_v25  ;;  %v1056_v38 = vsel %vm1053_vm4, %v2410_v44, %v1895_v12  ;;  %v1055_v31 = vsel %vm1053_vm4, %v2518_v0, %v1891_v5  ;;  %v1054_v39 = vsel %vm1053_vm4, %v2542_v15, %v1890_v16 }
 0x137   : > { %v1904_v63 = vpop.permute.xlu0 %1903  ;;  %v1899_v3 = vpop.permute.xlu1 %1898  ;;  %v1815_v0 = vunpack.i.l.bf16 %v2752_v54 }
 0x138   : > { %v1901_v27 = vunpack.i.h.bf16 %v1899_v3  ;;  %v1900_v57 = vunpack.i.l.bf16 %v1899_v3  ;;  %v1906_v7 = vunpack.i.h.bf16 %v1904_v63  ;;  %v1905_v33 = vunpack.i.l.bf16 %v1904_v63 }
 0x13a   : > { %v1071_v28 = vsel %vm1070_vm5, %v1054_v39, %v1900_v57  ;;  %v1072_v34 = vsel %vm1070_vm5, %v1055_v31, %v1901_v27  ;;  %v1073_v9 = vsel %vm1070_vm5, %v1056_v38, %v1905_v33  ;;  %v1074_v45 = vsel %vm1070_vm5, %v1057_v32, %v1906_v7 }
 0x13b   : > { %v1914_v13 = vpop.permute.xlu0 %1913  ;;  %v1909_v1 = vpop.permute.xlu1 %1908  ;;  %v1088_v51 = vsel %vm1087_vm6, %v1071_v28, %v1810_v35  ;;  %v1089_v53 = vsel %vm1087_vm6, %v1072_v34, %v1811_v20  ;;  %v1090_v3 = vsel %vm1087_vm6, %v1073_v9, %v1815_v0  ;;  %v1091_v25 = vsel %vm1087_vm6, %v1074_v45, %v1816_v46 }
 0x13c   : > { %v1911_v41 = vunpack.i.h.bf16 %v1909_v1  ;;  %v1910_v50 = vunpack.i.l.bf16 %v1909_v1  ;;  %v1916_v49 = vunpack.i.h.bf16 %v1914_v13  ;;  %v1915_v15 = vunpack.i.l.bf16 %v1914_v13 }
 0x13d   : > { %v1821_v27 = vunpack.i.h.bf16 %v2762_v10  ;;  %v1820_v57 = vunpack.i.l.bf16 %v2762_v10  ;;  %v1825_v9 = vunpack.i.l.bf16 %v2760_v55 }
 0x13e   : > { %v1105_v12 = vsel %vm1104_vm7, %v1088_v51, %v1910_v50  ;;  %v1106_v5 = vsel %vm1104_vm7, %v1089_v53, %v1911_v41  ;;  %v1107_v7 = vsel %vm1104_vm7, %v1090_v3, %v1915_v15  ;;  %v1108_v33 = vsel %vm1104_vm7, %v1091_v25, %v1916_v49 }
 0x13f   : > { %v1924_v18 = vpop.permute.xlu0 %1923  ;;  %v1919_v23 = vpop.permute.xlu1 %1918  ;;  %v1826_v50 = vunpack.i.h.bf16 %v2760_v55 }
 0x140   : > { %v1921_v36 = vunpack.i.h.bf16 %v1919_v23  ;;  %v1920_v44 = vunpack.i.l.bf16 %v1919_v23  ;;  %v1926_v24 = vunpack.i.h.bf16 %v1924_v18  ;;  %v1925_v29 = vunpack.i.l.bf16 %v1924_v18 }
 0x142   : > { %v1122_v54 = vsel %vm1121_vm8, %v1105_v12, %v1920_v44  ;;  %v1123_v16 = vsel %vm1121_vm8, %v1106_v5, %v1921_v36  ;;  %v1124_v20 = vsel %vm1121_vm8, %v1107_v7, %v1925_v29  ;;  %v1125_v35 = vsel %vm1121_vm8, %v1108_v33, %v1926_v24 }
 0x143   : > { %v1934_v17 = vpop.permute.xlu0 %1933  ;;  %v1929_v63 = vpop.permute.xlu1 %1928  ;;  %v1139_v18 = vsel %vm1138_vm9, %v1122_v54, %v1820_v57  ;;  %v1140_v23 = vsel %vm1138_vm9, %v1123_v16, %v1821_v27  ;;  %v1141_v49 = vsel %vm1138_vm9, %v1124_v20, %v1825_v9  ;;  %v1142_v15 = vsel %vm1138_vm9, %v1125_v35, %v1826_v50 }
 0x144   : > { %v1931_v13 = vunpack.i.h.bf16 %v1929_v63  ;;  %v1930_v1 = vunpack.i.l.bf16 %v1929_v63  ;;  %v1936_v28 = vunpack.i.h.bf16 %v1934_v17  ;;  %v1935_v10 = vunpack.i.l.bf16 %v1934_v17 }
 0x146   : > { %v1156_v34 = vsel %vm1155_vm10, %v1139_v18, %v1930_v1  ;;  %v1157_v41 = vsel %vm1155_vm10, %v1140_v23, %v1931_v13  ;;  %v1158_v24 = vsel %vm1155_vm10, %v1141_v49, %v1935_v10  ;;  %v1159_v29 = vsel %vm1155_vm10, %v1142_v15, %v1936_v28 }
 0x147   : > { %v1944_v32 = vpop.permute.xlu0 %1943  ;;  %v1939_v38 = vpop.permute.xlu1 %1938  ;;  %v1830_v23 = vunpack.i.l.bf16 %v2772_v30  ;;  %v1845_v10 = vunpack.i.l.bf16 %v2780_v47 }
 0x148   : > { %v1941_v31 = vunpack.i.h.bf16 %v1939_v38  ;;  %v1940_v39 = vunpack.i.l.bf16 %v1939_v38  ;;  %v1946_v13 = vunpack.i.h.bf16 %v1944_v32  ;;  %v1945_v1 = vunpack.i.l.bf16 %v1944_v32 }
 0x149   : > { %v1836_v38 = vunpack.i.h.bf16 %v2770_v37  ;;  %v1831_v32 = vunpack.i.h.bf16 %v2772_v30 }
 0x14a   : > { %v1173_v45 = vsel %vm1172_vm11, %v1156_v34, %v1940_v39  ;;  %v1174_v36 = vsel %vm1172_vm11, %v1157_v41, %v1941_v31  ;;  %v1835_v31 = vunpack.i.l.bf16 %v2770_v37  ;;  %v1059_v34 = vsel %vm1053_vm4, %v2407_v43, %v1946_v13 }
 0x14b   : > { %v1954_v44 = vpop.permute.xlu0 %1953  ;;  %v1949_v46 = vpop.permute.xlu1 %1948  ;;  %v1189_v0 = vpack.c.bf16 %v1174_v36, %v1173_v45  ;;  %v1058_v37 = vsel %vm1053_vm4, %v2404_v42, %v1945_v1  ;;  %v1841_v1 = vunpack.i.h.bf16 %v2782_v11 }
 0x14c   : > { %v1951_v51 = vunpack.i.h.bf16 %v1949_v46  ;;  %v1950_v53 = vunpack.i.l.bf16 %v1949_v46  ;;  %v1956_v63 = vunpack.i.h.bf16 %v1954_v44  ;;  %v1955_v3 = vunpack.i.l.bf16 %v1954_v44 }
 0x14d   : > { %1726 = vmatprep.mubr.msk.bf16.mxu0 %vm1233_vm12, %v1189_v0 }
 0x14e   : > { %v1176_v55 = vsel %vm1172_vm11, %v1159_v29, %v1951_v51  ;;  %v1175_v17 = vsel %vm1172_vm11, %v1158_v24, %v1950_v53  ;;  %v1061_v27 = vsel %vm1053_vm4, %v2424_v52, %v1956_v63  ;;  %v1060_v57 = vsel %vm1053_vm4, %v2436_v58, %v1955_v3 }
 0x14f   : > { %v1190_v25 = vpack.c.bf16 %v1176_v55, %v1175_v17  ;;  %v1964_v12 = vpop.permute.xlu0 %1963  ;;  %v1959_v5 = vpop.permute.xlu1 %1958  ;;  %v1846_v58 = vunpack.i.h.bf16 %v2780_v47 }
 0x150   : > { %v1966_v54 = vunpack.i.h.bf16 %v1964_v12  ;;  %v1965_v16 = vunpack.i.l.bf16 %v1964_v12  ;;  %v1961_v7 = vunpack.i.h.bf16 %v1959_v5  ;;  %v1960_v33 = vunpack.i.l.bf16 %v1959_v5 }
 0x151   : > { %1727 = vmatmul.mubr.msk.bf16.vlgmr.msra.gmra.mxu0 %vm1233_vm12, %v1190_v25 }
 0x152   : > { %v1077_v39 = vsel %vm1070_vm5, %v1060_v57, %v1965_v16  ;;  %v1078_v18 = vsel %vm1070_vm5, %v1061_v27, %v1966_v54  ;;  %v1076_v41 = vsel %vm1070_vm5, %v1059_v34, %v1961_v7  ;;  %v1075_v50 = vsel %vm1070_vm5, %v1058_v37, %v1960_v33 }
 0x153   : > { %v1974_v20 = vpop.permute.xlu0 %1973  ;;  %v1969_v35 = vpop.permute.xlu1 %1968  ;;  %v1094_v9 = vsel %vm1087_vm6, %v1077_v39, %v1835_v31  ;;  %v1095_v30 = vsel %vm1087_vm6, %v1078_v18, %v1836_v38  ;;  %v1092_v24 = vsel %vm1087_vm6, %v1075_v50, %v1830_v23  ;;  %v1093_v29 = vsel %vm1087_vm6, %v1076_v41, %v1831_v32 }
 0x154   : > { %v1976_v52 = vunpack.i.h.bf16 %v1974_v20  ;;  %v1975_v28 = vunpack.i.l.bf16 %v1974_v20  ;;  %v1971_v44 = vunpack.i.h.bf16 %v1969_v35  ;;  %v1970_v46 = vunpack.i.l.bf16 %v1969_v35 }
 0x155   : > { %v1840_v27 = vunpack.i.l.bf16 %v2782_v11 }
 0x156   : > { %v1111_v49 = vsel %vm1104_vm7, %v1094_v9, %v1975_v28  ;;  %v1112_v43 = vsel %vm1104_vm7, %v1095_v30, %v1976_v52  ;;  %v1109_v25 = vsel %vm1104_vm7, %v1092_v24, %v1970_v46  ;;  %v1110_v12 = vsel %vm1104_vm7, %v1093_v29, %v1971_v44 }
 0x157   : > { %v1984_v45 = vpop.permute.xlu0 %1983  ;;  %v1979_v36 = vpop.permute.xlu1 %1978  ;;  %v1851_v24 = vunpack.i.h.bf16 %v2786_v6  ;;  %v1850_v29 = vunpack.i.l.bf16 %v2786_v6 }
 0x158   : > { %v1986_v0 = vunpack.i.h.bf16 %v1984_v45  ;;  %v1985_v47 = vunpack.i.l.bf16 %v1984_v45  ;;  %v1981_v15 = vunpack.i.h.bf16 %v1979_v36  ;;  %v1980_v42 = vunpack.i.l.bf16 %v1979_v36 }
 0x15a   : > { %v1128_v51 = vsel %vm1121_vm8, %v1111_v49, %v1985_v47  ;;  %v1129_v53 = vsel %vm1121_vm8, %v1112_v43, %v1986_v0  ;;  %v1126_v5 = vsel %vm1121_vm8, %v1109_v25, %v1980_v42  ;;  %v1127_v54 = vsel %vm1121_vm8, %v1110_v12, %v1981_v15 }
 0x15b   : > { %v1994_v55 = vpop.permute.xlu0 %1993  ;;  %v1145_v17 = vsel %vm1138_vm9, %v1128_v51, %v1845_v10  ;;  %v1146_v63 = vsel %vm1138_vm9, %v1129_v53, %v1846_v58  ;;  %v1989_v3 = vpop.permute.xlu1 %1988  ;;  %v1143_v33 = vsel %vm1138_vm9, %v1126_v5, %v1840_v27  ;;  %v1144_v20 = vsel %vm1138_vm9, %v1127_v54, %v1841_v1 }
 0x15c   : > { %v1991_v16 = vunpack.i.h.bf16 %v1989_v3  ;;  %v1990_v13 = vunpack.i.l.bf16 %v1989_v3  ;;  %v1996_v31 = vunpack.i.h.bf16 %v1994_v55  ;;  %v1995_v39 = vunpack.i.l.bf16 %v1994_v55 }
 0x15d   : > { %v1856_v51 = vunpack.i.h.bf16 %v2784_v61  ;;  %v1855_v53 = vunpack.i.l.bf16 %v2784_v61  ;;  %v1866_v1 = vunpack.i.h.bf16 %v2788_v59  ;;  %v1860_v27 = vunpack.i.l.bf16 %v2790_v8 }
 0x15e   : > { %v1160_v18 = vsel %vm1155_vm10, %v1143_v33, %v1990_v13  ;;  %v1161_v32 = vsel %vm1155_vm10, %v1144_v20, %v1991_v16  ;;  %v1162_v37 = vsel %vm1155_vm10, %v1145_v17, %v1995_v39  ;;  %v1163_v41 = vsel %vm1155_vm10, %v1146_v63, %v1996_v31 }
 0x15f   : > { %v2004_v57 = vpop.permute.xlu0 %2003  ;;  %v1999_v7 = vpop.permute.xlu1 %1998 }
 0x160   : > { %v2001_v35 = vunpack.i.h.bf16 %v1999_v7  ;;  %v2000_v38 = vunpack.i.l.bf16 %v1999_v7  ;;  %v2006_v50 = vunpack.i.h.bf16 %v2004_v57  ;;  %v2005_v45 = vunpack.i.l.bf16 %v2004_v57 }
 0x162   : > { %v1177_v23 = vsel %vm1172_vm11, %v1160_v18, %v2000_v38  ;;  %v1178_v52 = vsel %vm1172_vm11, %v1161_v32, %v2001_v35  ;;  %v1063_v55 = vsel %vm1053_vm4, %v2455_v2, %v2006_v50  ;;  %v1062_v17 = vsel %vm1053_vm4, %v2467_v14, %v2005_v45 }
 0x163   : > { %v1191_v28 = vpack.c.bf16 %v1178_v52, %v1177_v23  ;;  %v2014_v11 = vpop.permute.xlu0 %2013  ;;  %v2009_v58 = vpop.permute.xlu1 %2008 }
 0x164   : > { %v2011_v10 = vunpack.i.h.bf16 %v2009_v58  ;;  %v2010_v34 = vunpack.i.l.bf16 %v2009_v58  ;;  %v2016_v36 = vunpack.i.h.bf16 %v2014_v11  ;;  %v2015_v44 = vunpack.i.l.bf16 %v2014_v11 }
 0x165   : > { %1730 = vmatprep.mubr.msk.bf16.mxu0 %vm1233_vm12, %v1191_v28 }
 0x166   : > { %v1180_v9 = vsel %vm1172_vm11, %v1163_v41, %v2011_v10  ;;  %v1179_v30 = vsel %vm1172_vm11, %v1162_v37, %v2010_v34  ;;  %v1065_v63 = vsel %vm1053_vm4, %v2478_v19, %v2016_v36  ;;  %v1064_v3 = vsel %vm1053_vm4, %v2486_v40, %v2015_v44 }
 0x167   : > { %v1192_v46 = vpack.c.bf16 %v1180_v9, %v1179_v30  ;;  %v2024_v0 = vpop.permute.xlu0 %2023  ;;  %v2019_v47 = vpop.permute.xlu1 %2018  ;;  %v1865_v19 = vunpack.i.l.bf16 %v2788_v59  ;;  %v1861_v40 = vunpack.i.h.bf16 %v2790_v8 }
 0x168   : > { %v2026_v49 = vunpack.i.h.bf16 %v2024_v0  ;;  %v2025_v43 = vunpack.i.l.bf16 %v2024_v0  ;;  %v2021_v15 = vunpack.i.h.bf16 %v2019_v47  ;;  %v2020_v42 = vunpack.i.l.bf16 %v2019_v47 }
 0x169   : > { %1731 = vmatmul.mubr.msk.bf16.gmra.mxu0 %vm1233_vm12, %v1192_v46 }
 0x16a   : > { %v1081_v61 = vsel %vm1070_vm5, %v1064_v3, %v2025_v43  ;;  %v1082_v5 = vsel %vm1070_vm5, %v1065_v63, %v2026_v49  ;;  %v1080_v6 = vsel %vm1070_vm5, %v1063_v55, %v2021_v15  ;;  %v1079_v54 = vsel %vm1070_vm5, %v1062_v17, %v2020_v42 }
 0x16b   : > { %v2034_v25 = vpop.permute.xlu0 %2033  ;;  %v2029_v12 = vpop.permute.xlu1 %2028  ;;  %v1098_v57 = vsel %vm1087_vm6, %v1081_v61, %v1855_v53  ;;  %v1099_v7 = vsel %vm1087_vm6, %v1082_v5, %v1856_v51  ;;  %v1096_v33 = vsel %vm1087_vm6, %v1079_v54, %v1850_v29  ;;  %v1097_v20 = vsel %vm1087_vm6, %v1080_v6, %v1851_v24 }
 0x16c   : > { %v2036_v2 = vunpack.i.h.bf16 %v2034_v25  ;;  %v2035_v16 = vunpack.i.l.bf16 %v2034_v25  ;;  %v2031_v13 = vunpack.i.h.bf16 %v2029_v12  ;;  %v2030_v14 = vunpack.i.l.bf16 %v2029_v12 }
 0x16e   : > { %v1115_v59 = vsel %vm1104_vm7, %v1098_v57, %v2035_v16  ;;  %v1116_v23 = vsel %vm1104_vm7, %v1099_v7, %v2036_v2  ;;  %v1113_v8 = vsel %vm1104_vm7, %v1096_v33, %v2030_v14  ;;  %v1114_v52 = vsel %vm1104_vm7, %v1097_v20, %v2031_v13 }
 0x16f   : > { %v2044_v35 = vpop.permute.xlu0 %2043  ;;  %v2039_v38 = vpop.permute.xlu1 %2038  ;;  %v1876_v57 = vunpack.i.h.bf16 %v2792_v60  ;;  %v1875_v7 = vunpack.i.l.bf16 %v2792_v60  ;;  %v1871_v33 = vunpack.i.h.bf16 %v2794_v22  ;;  %v1870_v20 = vunpack.i.l.bf16 %v2794_v22 }
 0x170   : > { %v2046_v31 = vunpack.i.h.bf16 %v2044_v35  ;;  %v2045_v39 = vunpack.i.l.bf16 %v2044_v35  ;;  %v2041_v18 = vunpack.i.h.bf16 %v2039_v38  ;;  %v2040_v32 = vunpack.i.l.bf16 %v2039_v38 }
 0x172   : > { %v1132_v28 = vsel %vm1121_vm8, %v1115_v59, %v2045_v39  ;;  %v1133_v11 = vsel %vm1121_vm8, %v1116_v23, %v2046_v31  ;;  %v1130_v58 = vsel %vm1121_vm8, %v1113_v8, %v2040_v32  ;;  %v1131_v10 = vsel %vm1121_vm8, %v1114_v52, %v2041_v18 }
 0x173   : > { %v2054_v34 = vpop.permute.xlu0 %2053  ;;  %v1149_v37 = vsel %vm1138_vm9, %v1132_v28, %v1865_v19  ;;  %v1150_v41 = vsel %vm1138_vm9, %v1133_v11, %v1866_v1  ;;  %v2049_v50 = vpop.permute.xlu1 %2048  ;;  %v1147_v9 = vsel %vm1138_vm9, %v1130_v58, %v1860_v27  ;;  %v1148_v30 = vsel %vm1138_vm9, %v1131_v10, %v1861_v40 }
 0x174   : > { %v2051_v45 = vunpack.i.h.bf16 %v2049_v50  ;;  %v2050_v36 = vunpack.i.l.bf16 %v2049_v50  ;;  %v2056_v49 = vunpack.i.h.bf16 %v2054_v34  ;;  %v2055_v43 = vunpack.i.l.bf16 %v2054_v34 }
 0x175   : > { %v1886_v28 = vunpack.i.h.bf16 %v2796_v21  ;;  %v1880_v11 = vunpack.i.l.bf16 %v2798_v26 }
 0x176   : > { %v1164_v15 = vsel %vm1155_vm10, %v1147_v9, %v2050_v36  ;;  %v1165_v42 = vsel %vm1155_vm10, %v1148_v30, %v2051_v45  ;;  %v1166_v3 = vsel %vm1155_vm10, %v1149_v37, %v2055_v43  ;;  %v1167_v25 = vsel %vm1155_vm10, %v1150_v41, %v2056_v49 }
 0x177   : > { %v2064_v44 = vpop.permute.xlu0 %2063  ;;  %v2059_v46 = vpop.permute.xlu1 %2058 }
 0x178   : > { %v2061_v0 = vunpack.i.h.bf16 %v2059_v46  ;;  %v2060_v47 = vunpack.i.l.bf16 %v2059_v46  ;;  %v2066_v12 = vunpack.i.h.bf16 %v2064_v44  ;;  %v2065_v6 = vunpack.i.l.bf16 %v2064_v44 }
 0x17a   : > { %v1181_v51 = vsel %vm1172_vm11, %v1164_v15, %v2060_v47  ;;  %v1182_v53 = vsel %vm1172_vm11, %v1165_v42, %v2061_v0  ;;  %v1067_v35 = vsel %vm1053_vm4, %v2494_v48, %v2066_v12  ;;  %v1066_v38 = vsel %vm1053_vm4, %v2503_v56, %v2065_v6 }
 0x17b   : > { %v2074_v24 = vpop.permute.xlu0 %2073  ;;  %v2069_v29 = vpop.permute.xlu1 %2068  ;;  %v1193_v55 = vpack.c.bf16 %v1182_v53, %v1181_v51 }
 0x17c   : > { %v2071_v17 = vunpack.i.h.bf16 %v2069_v29  ;;  %v2070_v63 = vunpack.i.l.bf16 %v2069_v29  ;;  %v2076_v54 = vunpack.i.h.bf16 %v2074_v24  ;;  %v2075_v2 = vunpack.i.l.bf16 %v2074_v24 }
 0x17d   : > { %1734 = vmatprep.mubr.msk.bf16.mxu1 %vm1233_vm12, %v1193_v55 }
 0x17e   : > { %v1184_v61 = vsel %vm1172_vm11, %v1167_v25, %v2071_v17  ;;  %v1183_v5 = vsel %vm1172_vm11, %v1166_v3, %v2070_v63  ;;  %v1069_v31 = vsel %vm1053_vm4, %v2514_v62, %v2076_v54  ;;  %v1068_v39 = vsel %vm1053_vm4, %v2527_v4, %v2075_v2 }
 0x17f   : > { %v1194_v16 = vpack.c.bf16 %v1184_v61, %v1183_v5  ;;  %v2084_v13 = vpop.permute.xlu0 %2083  ;;  %v2079_v14 = vpop.permute.xlu1 %2078  ;;  %v1885_v62 = vunpack.i.l.bf16 %v2796_v21  ;;  %v1881_v4 = vunpack.i.h.bf16 %v2798_v26 }
 0x180   : > { %v2086_v1 = vunpack.i.h.bf16 %v2084_v13  ;;  %v2085_v19 = vunpack.i.l.bf16 %v2084_v13  ;;  %v2081_v40 = vunpack.i.h.bf16 %v2079_v14  ;;  %v2080_v27 = vunpack.i.l.bf16 %v2079_v14 }
 0x181   : > { %1735 = vmatmul.mubr.msk.bf16.vlgmr.msra.gmra.mxu1 %vm1233_vm12, %v1194_v16 }
 0x182   : > { %v1085_v60 = vsel %vm1070_vm5, %v1068_v39, %v2085_v19  ;;  %v1086_v59 = vsel %vm1070_vm5, %v1069_v31, %v2086_v1  ;;  %v1084_v22 = vsel %vm1070_vm5, %v1067_v35, %v2081_v40  ;;  %v1083_v23 = vsel %vm1070_vm5, %v1066_v38, %v2080_v27 }
 0x183   : > { %v2094_v18 = vpop.permute.xlu0 %2093  ;;  %v2089_v32 = vpop.permute.xlu1 %2088  ;;  %v1102_v58 = vsel %vm1087_vm6, %v1085_v60, %v1875_v7  ;;  %v1103_v10 = vsel %vm1087_vm6, %v1086_v59, %v1876_v57  ;;  %v1100_v34 = vsel %vm1087_vm6, %v1083_v23, %v1870_v20  ;;  %v1101_v37 = vsel %vm1087_vm6, %v1084_v22, %v1871_v33 }
 0x184   : > { %v2096_v48 = vunpack.i.h.bf16 %v2094_v18  ;;  %v2095_v8 = vunpack.i.l.bf16 %v2094_v18  ;;  %v2091_v52 = vunpack.i.h.bf16 %v2089_v32  ;;  %v2090_v56 = vunpack.i.l.bf16 %v2089_v32 }
 0x186   : > { %v1119_v21 = vsel %vm1104_vm7, %v1102_v58, %v2095_v8  ;;  %v1120_v44 = vsel %vm1104_vm7, %v1103_v10, %v2096_v48  ;;  %v1117_v26 = vsel %vm1104_vm7, %v1100_v34, %v2090_v56  ;;  %v1118_v46 = vsel %vm1104_vm7, %v1101_v37, %v2091_v52 }
 0x187   : > { %v2104_v41 = vpop.permute.xlu0 %2103  ;;  %v2099_v50 = vpop.permute.xlu1 %2098 }
 0x188   : > { %v2106_v9 = vunpack.i.h.bf16 %v2104_v41  ;;  %v2105_v30 = vunpack.i.l.bf16 %v2104_v41  ;;  %v2101_v45 = vunpack.i.h.bf16 %v2099_v50  ;;  %v2100_v36 = vunpack.i.l.bf16 %v2099_v50 }
 0x18a   : > { %v1136_v0 = vsel %vm1121_vm8, %v1119_v21, %v2105_v30  ;;  %v1137_v47 = vsel %vm1121_vm8, %v1120_v44, %v2106_v9  ;;  %v1134_v49 = vsel %vm1121_vm8, %v1117_v26, %v2100_v36  ;;  %v1135_v43 = vsel %vm1121_vm8, %v1118_v46, %v2101_v45 }
 0x18b   : > { %v2114_v15 = vpop.permute.xlu0 %2113  ;;  %v1153_v42 = vsel %vm1138_vm9, %v1136_v0, %v1885_v62  ;;  %v1154_v51 = vsel %vm1138_vm9, %v1137_v47, %v1886_v28  ;;  %v2109_v53 = vpop.permute.xlu1 %2108  ;;  %v1151_v24 = vsel %vm1138_vm9, %v1134_v49, %v1880_v11  ;;  %v1152_v29 = vsel %vm1138_vm9, %v1135_v43, %v1881_v4 }
 0x18c   : > { %v2116_v55 = vunpack.i.h.bf16 %v2114_v15  ;;  %v2115_v17 = vunpack.i.l.bf16 %v2114_v15  ;;  %v2111_v63 = vunpack.i.h.bf16 %v2109_v53  ;;  %v2110_v3 = vunpack.i.l.bf16 %v2109_v53 }
 0x18e   : > { %v1170_v2 = vsel %vm1155_vm10, %v1153_v42, %v2115_v17  ;;  %v1171_v16 = vsel %vm1155_vm10, %v1154_v51, %v2116_v55  ;;  %v1168_v13 = vsel %vm1155_vm10, %v1151_v24, %v2110_v3  ;;  %v1169_v14 = vsel %vm1155_vm10, %v1152_v29, %v2111_v63 }
 0x18f   : > { %v2124_v25 = vpop.permute.xlu0 %2123  ;;  %v2119_v12 = vpop.permute.xlu1 %2118 }
 0x190   : > { %v2126_v61 = vunpack.i.h.bf16 %v2124_v25  ;;  %v2125_v5 = vunpack.i.l.bf16 %v2124_v25  ;;  %v2121_v6 = vunpack.i.h.bf16 %v2119_v12  ;;  %v2120_v54 = vunpack.i.l.bf16 %v2119_v12 }
 0x192   : > { %v1187_v1 = vsel %vm1172_vm11, %v1170_v2, %v2125_v5  ;;  %v1188_v19 = vsel %vm1172_vm11, %v1171_v16, %v2126_v61  ;;  %v1185_v40 = vsel %vm1172_vm11, %v1168_v13, %v2120_v54  ;;  %v1186_v27 = vsel %vm1172_vm11, %v1169_v14, %v2121_v6 }
 0x193   : > { %v1196_v57 = vpack.c.bf16 %v1188_v19, %v1187_v1  ;;  %v1195_v7 = vpack.c.bf16 %v1186_v27, %v1185_v40 }
 0x195   : > { %1738 = vmatprep.mubr.msk.bf16.mxu1 %vm1233_vm12, %v1195_v7 }
 0x196   : > { %1739 = vmatmul.mubr.msk.bf16.gmra.mxu1 %vm1233_vm12, %v1196_v57 }
 0x211   : > { %v1728_v33 = vpop.f32.mrf.mxu0 }
 0x212   : > { %1457 = vst.msk [vmem:[%s2267_s20 + $0x10] sm:$0xff] %vm1053_vm4, %v1728_v33  ;;  %v1398_v52 = vmul.f32 %v1728_v33, %v1728_v33  ;;  %v1362_v62 = vsel %vm1053_vm4, %v1728_v33, 0.0 }
 0x213   : > { %v1296_v20 = vpop.f32.mrf.mxu0 }
 0x214   : > { %1455 = vst.msk [vmem:[%s2267_s20] sm:$0xff] %vm1053_vm4, %v1296_v20  ;;  %v1396_v59 = vmul.f32 %v1296_v20, %v1296_v20  ;;  %v1359_v23 = vsel %vm1053_vm4, %v1296_v20, 0.0  ;;  %v1415_v11 = vsel %vm1053_vm4, %v1398_v52, 0.0 }
 0x215   : > { %v1729_v35 = vpop.f32.mrf.mxu0 }
 0x216   : > { %1458 = vst.msk [vmem:[%s2267_s20 + $0x18] sm:$0xff] %vm1053_vm4, %v1729_v35  ;;  %v1412_v56 = vsel %vm1053_vm4, %v1396_v59, 0.0  ;;  %v1399_v58 = vmul.f32 %v1729_v35, %v1729_v35  ;;  %v1364_v37 = vsel %vm1053_vm4, %v1729_v35, 0.0 }
 0x217   : > { %v1299_v38 = vpop.f32.mrf.mxu0 }
 0x218   : > { %1456 = vst.msk [vmem:[%s2267_s20 + $0x8] sm:$0xff] %vm1053_vm4, %v1299_v38  ;;  %v1397_v60 = vmul.f32 %v1299_v38, %v1299_v38  ;;  %v1360_v22 = vsel %vm1053_vm4, %v1299_v38, 0.0  ;;  %v1417_v45 = vsel %vm1053_vm4, %v1399_v58, 0.0 }
 0x219   : > { %v1361_v8 = vadd.f32 %v1360_v22, %v1359_v23 }
 0x21a   : > { %v1413_v48 = vsel %vm1053_vm4, %v1397_v60, 0.0 }
 0x21b   : > { %v1414_v28 = vadd.f32 %v1413_v48, %v1412_v56  ;;  %v1363_v4 = vadd.f32 %v1362_v62, %v1361_v8 }
 0x21d   : > { %v1416_v34 = vadd.f32 %v1415_v11, %v1414_v28  ;;  %v1365_v30 = vadd.f32 %v1364_v37, %v1363_v4 }
 0x21f   : > { %v1418_v46 = vadd.f32 %v1417_v45, %v1416_v34 }
 0x229   : > { %v1732_v31 = vpop.f32.mrf.mxu0 }
 0x22a   : > { %1461 = vst.msk [vmem:[%s2267_s20 + $0x30] sm:$0xff] %vm1053_vm4, %v1732_v31  ;;  %v1402_v15 = vmul.f32 %v1732_v31, %v1732_v31  ;;  %v1370_v53 = vsel %vm1053_vm4, %v1732_v31, 0.0 }
 0x22b   : > { %v1312_v39 = vpop.f32.mrf.mxu0 }
 0x22c   : > { %1459 = vst.msk [vmem:[%s2267_s20 + $0x20] sm:$0xff] %vm1053_vm4, %v1312_v39  ;;  %v1400_v10 = vmul.f32 %v1312_v39, %v1312_v39  ;;  %v1366_v41 = vsel %vm1053_vm4, %v1312_v39, 0.0  ;;  %v1423_v29 = vsel %vm1053_vm4, %v1402_v15, 0.0 }
 0x22d   : > { %v1733_v18 = vpop.f32.mrf.mxu0  ;;  %v1367_v26 = vadd.f32 %v1366_v41, %v1365_v30 }
 0x22e   : > { %1462 = vst.msk [vmem:[%s2267_s20 + $0x38] sm:$0xff] %vm1053_vm4, %v1733_v18  ;;  %v1419_v36 = vsel %vm1053_vm4, %v1400_v10, 0.0  ;;  %v1403_v55 = vmul.f32 %v1733_v18, %v1733_v18  ;;  %v1372_v3 = vsel %vm1053_vm4, %v1733_v18, 0.0 }
 0x22f   : > { %v1315_v32 = vpop.f32.mrf.mxu0  ;;  %v1420_v49 = vadd.f32 %v1419_v36, %v1418_v46 }
 0x230   : > { %1460 = vst.msk [vmem:[%s2267_s20 + $0x28] sm:$0xff] %vm1053_vm4, %v1315_v32  ;;  %v1401_v50 = vmul.f32 %v1315_v32, %v1315_v32  ;;  %v1368_v21 = vsel %vm1053_vm4, %v1315_v32, 0.0  ;;  %v1425_v5 = vsel %vm1053_vm4, %v1403_v55, 0.0 }
 0x231   : > { %v1369_v43 = vadd.f32 %v1368_v21, %v1367_v26 }
 0x232   : > { %v1421_v0 = vsel %vm1053_vm4, %v1401_v50, 0.0 }
 0x233   : > { %v1422_v51 = vadd.f32 %v1421_v0, %v1420_v49  ;;  %v1371_v24 = vadd.f32 %v1370_v53, %v1369_v43 }
 0x235   : > { %v1424_v63 = vadd.f32 %v1423_v29, %v1422_v51  ;;  %v1373_v61 = vadd.f32 %v1372_v3, %v1371_v24  ;;  %v1449_v24 = vld [vmem:[%s2262_s17] sm:$0x3] }
 0x237   : > { %v1426_v16 = vadd.f32 %v1425_v5, %v1424_v63 }
 0x241   : > { %v1736_v9 = vpop.f32.mrf.mxu1 }
 0x242   : > { %1465 = vst.msk [vmem:[%s2267_s20 + $0x50] sm:$0xff] %vm1053_vm4, %v1736_v9  ;;  %v1406_v19 = vmul.f32 %v1736_v9, %v1736_v9  ;;  %v1378_v27 = vsel %vm1053_vm4, %v1736_v9, 0.0 }
 0x243   : > { %v1328_v44 = vpop.f32.mrf.mxu1 }
 0x244   : > { %1463 = vst.msk [vmem:[%s2267_s20 + $0x40] sm:$0xff] %vm1053_vm4, %v1328_v44  ;;  %v1404_v17 = vmul.f32 %v1328_v44, %v1328_v44  ;;  %v1374_v25 = vsel %vm1053_vm4, %v1328_v44, 0.0  ;;  %v1431_v33 = vsel %vm1053_vm4, %v1406_v19, 0.0 }
 0x245   : > { %v1737_v47 = vpop.f32.mrf.mxu1  ;;  %v1375_v2 = vadd.f32 %v1374_v25, %v1373_v61 }
 0x246   : > { %1466 = vst.msk [vmem:[%s2267_s20 + $0x58] sm:$0xff] %vm1053_vm4, %v1737_v47  ;;  %v1427_v6 = vsel %vm1053_vm4, %v1404_v17, 0.0  ;;  %v1407_v20 = vmul.f32 %v1737_v47, %v1737_v47  ;;  %v1380_v31 = vsel %vm1053_vm4, %v1737_v47, 0.0 }
 0x247   : > { %v1331_v42 = vpop.f32.mrf.mxu1  ;;  %v1428_v14 = vadd.f32 %v1427_v6, %v1426_v16 }
 0x248   : > { %1464 = vst.msk [vmem:[%s2267_s20 + $0x48] sm:$0xff] %vm1053_vm4, %v1331_v42  ;;  %v1405_v12 = vmul.f32 %v1331_v42, %v1331_v42  ;;  %v1376_v54 = vsel %vm1053_vm4, %v1331_v42, 0.0  ;;  %v1433_v59 = vsel %vm1053_vm4, %v1407_v20, 0.0 }
 0x249   : > { %v1377_v1 = vadd.f32 %v1376_v54, %v1375_v2 }
 0x24a   : > { %v1429_v13 = vsel %vm1053_vm4, %v1405_v12, 0.0 }
 0x24b   : > { %v1430_v40 = vadd.f32 %v1429_v13, %v1428_v14  ;;  %v1379_v57 = vadd.f32 %v1378_v27, %v1377_v1 }
 0x24d   : > { %v1432_v35 = vadd.f32 %v1431_v33, %v1430_v40  ;;  %v1381_v32 = vadd.f32 %v1380_v31, %v1379_v57 }
 0x24f   : > { %v1434_v48 = vadd.f32 %v1433_v59, %v1432_v35 }
 0x256   : > { %v1740_v7 = vpop.f32.mrf.mxu1 }
 0x257   : > { %1469 = vst.msk [vmem:[%s2267_s20 + $0x70] sm:$0xff] %vm1053_vm4, %v1740_v7  ;;  %v1410_v52 = vmul.f32 %v1740_v7, %v1740_v7  ;;  %v1386_v11 = vsel %vm1053_vm4, %v1740_v7, 0.0 }
 0x258   : > { %v1344_v38 = vpop.f32.mrf.mxu1 }
 0x259   : > { %v1382_v39 = vsel %vm1053_vm4, %v1344_v38, 0.0  ;;  %v1408_v18 = vmul.f32 %v1344_v38, %v1344_v38  ;;  %1467 = vst.msk [vmem:[%s2267_s20 + $0x60] sm:$0xff] %vm1053_vm4, %v1344_v38  ;;  %v1439_v41 = vsel %vm1053_vm4, %v1410_v52, 0.0 }
 0x25a   : > { %v1741_v60 = vpop.f32.mrf.mxu1  ;;  %v1383_v23 = vadd.f32 %v1382_v39, %v1381_v32 }
 0x25b   : > { %v1435_v22 = vsel %vm1053_vm4, %v1408_v18, 0.0  ;;  %1470 = vst.msk [vmem:[%s2267_s20 + $0x78] sm:$0xff] %vm1053_vm4, %v1741_v60  ;;  %v1411_v58 = vmul.f32 %v1741_v60, %v1741_v60  ;;  %v1388_v50 = vsel %vm1053_vm4, %v1741_v60, 0.0 }
 0x25c   : > { %v1347_v8 = vpop.f32.mrf.mxu1  ;;  %v1436_v62 = vadd.f32 %v1435_v22, %v1434_v48 }
 0x25d   : > { %v1384_v56 = vsel %vm1053_vm4, %v1347_v8, 0.0  ;;  %v1409_v28 = vmul.f32 %v1347_v8, %v1347_v8  ;;  %1468 = vst.msk [vmem:[%s2267_s20 + $0x68] sm:$0xff] %vm1053_vm4, %v1347_v8  ;;  %v1441_v45 = vsel %vm1053_vm4, %v1411_v58, 0.0 }
 0x25e   : > { %v1385_v4 = vadd.f32 %v1384_v56, %v1383_v23 }
 0x25f   : > { %v1437_v10 = vsel %vm1053_vm4, %v1409_v28, 0.0 }
 0x260   : > { %v1387_v34 = vadd.f32 %v1386_v11, %v1385_v4  ;;  %v1438_v37 = vadd.f32 %v1437_v10, %v1436_v62 }
 0x262   : > { %v1389_v9 = vadd.f32 %v1388_v50, %v1387_v34  ;;  %v1440_v30 = vadd.f32 %v1439_v41, %v1438_v37 }
 0x264   : > { %v1390_v36 = vrot.slane %v1389_v9, 4  ;;  %v1442_v21 = vadd.f32 %v1441_v45, %v1440_v30 }
 0x266   : > { %v1391_v44 = vadd.f32 %v1390_v36, %v1389_v9  ;;  %v1443_v26 = vrot.slane %v1442_v21, 4 }
 0x268   : > { %v1392_v46 = vrot.slane %v1391_v44, 2  ;;  %v1444_v0 = vadd.f32 %v1443_v26, %v1442_v21 }
 0x26a   : > { %v1393_v47 = vadd.f32 %v1392_v46, %v1391_v44  ;;  %v1445_v49 = vrot.slane %v1444_v0, 2 }
 0x26c   : > { %v1394_v43 = vrot.slane %v1393_v47, 1  ;;  %v1446_v15 = vadd.f32 %v1445_v49, %v1444_v0 }
 0x26e   : > { %v1447_v42 = vrot.slane %v1446_v15, 1  ;;  %v1395_v51 = vadd.f32 %v1394_v43, %v1393_v47 }
 0x270   : > { %v1448_v53 = vadd.f32 %v1447_v42, %v1446_v15 }
 0x272   : > { %v1451_v29 = vsel %vm1450_vm13, %v1395_v51, %v1448_v53 }
 0x273   : > { %v1452_v55 = vadd.f32 %v1451_v29, %v1449_v24 }
 0x275   : > { %1454 = vst.msk [vmem:[%s2262_s17] sm:$0x3] %vm1453_vm14, %v1452_v55 }
 0x276 PF: > { %s17_s25 = sadd.s32 1, %s2170_s25   ;;  %s3072_s21 = smov %s2162_s23 }
 0x277   : > { %p14_p12 = scmp.ge.s32.totalorder %s17_s25, 6   ;;  %s3073_s22 = smov %s2166_s24 }
 0x278   : > { %s3074_s23 = smov %s3077_s26  ;;  %s3075_s24 = smov %s3081_s27 }
 0x279   :  { %16 = sbr.rel (!%p14_p12) target bundleno = 3 (0x3), region = 89 }

// kernel: double_conv_forward.2
= control target key start
LH: loop header
LB: loop body
LE: loop exit
PB: predicated region body
PF: predicated region fallthrough
CT: control target
= control target key end

     0   :  { %s2756_s15 = smov 0   ;;  %s2758_s16 = smov 0   ;;  %s4181_s0 = inlined_call_operand.vmem [shape: f32[2,18,26,4], index: 0, kind: input, shape index: {}]   ;;  %s4182_s1 = inlined_call_operand.vmem [shape: bf16[36,8], index: 1, kind: input, shape index: {}]   ;;  %s4183_s2 = inlined_call_operand.vmem [shape: f32[192,1], index: 2, kind: input, shape index: {}]   ;;  %s4184_s3 = inlined_call_operand.vmem [shape: bf16[2,16,24,8], index: 3, kind: output, shape index: {0}]   ;;  %s4185_s4 = inlined_call_operand.vmem [shape: f32[2,2,8], index: 4, kind: output, shape index: {1}]  }
   0x1   :  { %s2760_s17 = smov 0   ;;  %s2762_s18 = smov 0  }
   0x2   :  { %s2764_s19 = smov 0  }
   0x3 LB: > { %s24_s20 = sadd.s32 1, %s2711_s17  ;;  %s27_s21 = sadd.s32 1, %s2715_s18  ;;  %s2719_s19 = sphi %s2764_s19, %s15_s19   ;;  %s2715_s18 = sphi %s2762_s18, %s4383_s18   ;;  %s2711_s17 = sphi %s2760_s17, %s4382_s17   ;;  %s2707_s16 = sphi %s2758_s16, %s4381_s16   ;;  %s2703_s15 = sphi %s2756_s15, %s4380_s15  }
   0x4   : > { %p25_p0 = scmp.ge.s32.totalorder %s24_s20, 2  ;;  %p2004_p1 = scmp.ge.s32.totalorder %s2719_s19, 1 }
   0x5   : > { %p179_p2 = scmp.lt.s32.totalorder %s2719_s19, 5 }
   0x6   : > { %s4385_s20 = smov (%p25_p0, %s24_s20), 0  ;;  %s4387_s21 = smov (!%p25_p0, %s27_s21), %s2715_s18 }
   0x7   : > { %p180_p3 = pnand %p2004_p1, %p179_p2  ;;  %p29_p4 = scmp.ge.s32.totalorder %s4387_s21, 2 }
   0x9   : > { %s4389_s21 = smov (%p29_p4, %s4387_s21), 0  ;;  %183 = sbr.rel (%p180_p3) target bundleno = 574 (0x23e), region = 32 }
   0xe   : > { %p214_p5 = scmp.lt.s32.totalorder %s2707_s16, 1  ;;  %s2006_s22 = sshll.u32 %s2703_s15, 3 }
   0xf   : > { %p222_p6 = scmp.lt.s32.totalorder %s2006_s22, 15  ;;  %p2009_p7 = scmp.ne.s32.totalorder %s2703_s15, 0 }
  0x10   : > { %s4391_s16 = smov (!%p214_p5, %s2707_s16), 1 }
  0x11   : > { %s4393_s22 = smov (!%p222_p6, %s2006_s22), 15  ;;  %s2131_s23 = smul.u32 576, %s4391_s16 }
  0x12   : > { %s2008_s24 = sshll.u32 %s4391_s16, 1  ;;  %s2132_s25 = smul.u32 3, %s4393_s22 }
  0x13   : > { %s2792_s28 = scalar_lea.vmem %s4185_s4, %s2008_s24  ;;  %s218_s5 = scalar_lea.vmem %s4181_s0, %s2131_s23 }
  0x14   : > { %s2133_s6 = smul.u32 48, %s4391_s16 }
  0x15   : > { %238 = sbr.rel (%p2009_p7) target bundleno = 28 (0x1c), region = 36 }
  0x16   : > { %s226_s7 = sadd.s32 %s2133_s6, %s2132_s25 }
  0x17   : > { %s2007_s8 = sshll.u32 %s226_s7, 2 }
  0x18   : > { %s2800_s11 = scalar_lea.vmem %s4184_s3, %s2007_s8 }
  0x1a   : > { %vm239_vm0 = vcmask 58368   ;;  %v2721_v0 = vmov 0.0  }
  0x1b   : > { %240 = vst.msk [vmem:[%s2792_s28] sm:$0x3] %vm239_vm0, %v2721_v0 }
  0x1c PF: > { %s2053_s12 = sshll.u32 %s2703_s15, 8  ;;  %vm316_vm1 = vcmask 1046528   ;;  %s2722_s14 = smov 4   ;;  %vm445_vm2 = vcmask 1045504   ;;  %vm1311_vm3 = vcmask 1041408   ;;  %vm1042_vm4 = vcmask 31744  }
  0x1d   : > { %s2805_s13 = scalar_lea.vmem %s218_s5, %s2053_s12  ;;  %s2723_s15 = smov 8   ;;  %vm1067_vm5 = vcmask 64512   ;;  %vm1092_vm6 = vcmask 97280   ;;  %vm1117_vm7 = vcmask 130048   ;;  %vm1142_vm8 = vcmask 162816  }
  0x1e   : > { %v2808_v1 = vld [vmem:[%s2805_s13 + $0x30] sm:$0xff]  ;;  %v2811_v2 = vld [vmem:[%s2805_s13 + $0x38] sm:$0x3]  ;;  %v2814_v3 = vld [vmem:[%s2805_s13 + $0x40] sm:$0xff]  ;;  %s2724_s16 = smov 12   ;;  %s2725_s24 = smov 16  }
  0x1f   : > { %v2817_v4 = vld [vmem:[%s2805_s13 + $0x48] sm:$0xff]  ;;  %v327_v5 = vrot.slane %v2808_v1, 1  ;;  %v329_v6 = vrot.slane %v2811_v2, 1  ;;  %v331_v7 = vrot.slane %v2814_v3, 1  ;;  %v2828_v11 = vld [vmem:[%s2805_s13 + $0x20] sm:$0xff]  ;;  %v2841_v16 = vld [vmem:[%s2805_s13 + $0x10] sm:$0xff] }
  0x20   : > { %v2823_v8 = vld [vmem:[%s2805_s13 + $0x28] sm:$0xff]  ;;  %v332_v9 = vrot.slane %v2817_v4, 1  ;;  %4246 = vst [vmem:[#allocation2_spill] sm:$0xff] %v2828_v11  ;;  %v2831_v12 = vld [vmem:[%s2805_s13] sm:$0xff]  ;;  %v324_v15 = vrot.slane %v2828_v11, 1  ;;  %4250 = vst [vmem:[#allocation6_spill] sm:$0xff] %v2841_v16 }
  0x21   : > { %v325_v10 = vrot.slane %v2823_v8, 1  ;;  %4247 = vst [vmem:[#allocation3_spill] sm:$0xff] %v2831_v12  ;;  %v2834_v13 = vld [vmem:[%s2805_s13 + $0x8] sm:$0xff]  ;;  %v2837_v14 = vsel %vm316_vm1, %v327_v5, %v329_v6  ;;  %v317_v17 = vrot.slane %v2831_v12, 1  ;;  %v2846_v19 = vld [vmem:[%s2805_s13 + $0x50] sm:$0xff]  ;;  %v320_v22 = vrot.slane %v2841_v16, 1 }
  0x22   : > { %4248 = vst [vmem:[#allocation4_spill] sm:$0xff] %v2834_v13  ;;  %4249 = vst [vmem:[#allocation5_spill] sm:$0xff] %v2837_v14  ;;  %v318_v18 = vrot.slane %v2834_v13, 1  ;;  %v2849_v20 = vsel %vm316_vm1, %v331_v7, %v332_v9  ;;  %v334_v23 = vrot.slane %v2846_v19, 1  ;;  %v2857_v24 = vld [vmem:[%s2805_s13 + $0x18] sm:$0x3] }
  0x23   : > { %4251 = vst [vmem:[#allocation7_spill] sm:$0xff] %v2846_v19  ;;  %4252 = vst [vmem:[#allocation8_spill] sm:$0xff] %v2849_v20  ;;  %v2852_v21 = vsel %vm316_vm1, %v325_v10, %v327_v5  ;;  %v2860_v25 = vld [vmem:[%s2805_s13 + $0x68] sm:$0xff]  ;;  %v2863_v26 = vld [vmem:[%s2805_s13 + $0x70] sm:$0xff]  ;;  %v2870_v29 = vsel %vm316_vm1, %v324_v15, %v325_v10  ;;  %v322_v37 = vrot.slane %v2857_v24, 1  ;;  %v454_v27 = vrot.slane %v2823_v8, 2 }
  0x24   : > { %4253 = vst [vmem:[#allocation9_spill] sm:$0xff] %v2852_v21  ;;  %v2194_v28 = vpack.i.bf16 %v2837_v14, %v2852_v21  ;;  %4254 = vst [vmem:[#allocation10_spill] sm:$0xff] %v2870_v29  ;;  %v319_v30 = vsel %vm316_vm1, %v317_v17, %v318_v18  ;;  %v2874_v31 = vld [vmem:[%s2805_s13 + $0x78] sm:$0x3]  ;;  %v2880_v33 = vld [vmem:[%s2805_s13 + $0x60] sm:$0xff]  ;;  %v321_v35 = vsel %vm316_vm1, %v318_v18, %v320_v22  ;;  %v339_v42 = vrot.slane %v2860_v25, 1 }
  0x25   : > { %v2877_v32 = vld [vmem:[%s2805_s13 + $0x58] sm:$0x3]  ;;  %v2886_v36 = vsel %vm316_vm1, %v332_v9, %v334_v23  ;;  %v2890_v38 = vld [vmem:[%s2805_s13 + $0x90] sm:$0xff]  ;;  %v2184_v40 = vpack.i.bf16 %v321_v35, %v319_v30  ;;  %v341_v43 = vrot.slane %v2863_v26, 1  ;;  %v2903_v44 = vld [vmem:[%s2805_s13 + $0xa0] sm:$0xff]  ;;  %v323_v45 = vsel %vm316_vm1, %v320_v22, %v322_v37  ;;  %s2726_s27 = smov 20  }
  0x26   : > { %4255 = vst [vmem:[#allocation11_spill] sm:$0xff] %v2886_v36  ;;  %v2893_v39 = vld [vmem:[%s2805_s13 + $0x98] sm:$0x3]  ;;  %2195 = vrot.lane.b32.xlu1 %v2194_v28, %s2722_s14  ;;  %v2898_v41 = vpack.i.bf16 %v2886_v36, %v2849_v20  ;;  %v343_v46 = vrot.slane %v2874_v31, 1  ;;  %v336_v47 = vrot.slane %v2877_v32, 1  ;;  %v338_v48 = vrot.slane %v2880_v33, 1 }
  0x27   : > { %v2910_v49 = vld [vmem:[%s2805_s13 + $0xa8] sm:$0xff]  ;;  %v2913_v50 = vld [vmem:[%s2805_s13 + $0x80] sm:$0xff]  ;;  %2185 = vrot.lane.b32.xlu0 %v2184_v40, %s2722_s14  ;;  %v2189_v51 = vpack.i.bf16 %v2870_v29, %v323_v45  ;;  %v2918_v52 = vsel %vm316_vm1, %v339_v42, %v341_v43  ;;  %v348_v53 = vrot.slane %v2890_v38, 1  ;;  %v350_v54 = vrot.slane %v2893_v39, 1  ;;  %v2942_v62 = vld [vmem:[%s2805_s13 + $0xd0] sm:$0xff]  ;;  %s2727_s5 = smov 24  }
  0x28   : > { %4256 = vst [vmem:[#allocation12_spill] sm:$0xff] %v2898_v41  ;;  %4257 = vst [vmem:[#allocation13_spill] sm:$0xff] %v2910_v49  ;;  %v2923_v55 = vld [vmem:[%s2805_s13 + $0x88] sm:$0xff]  ;;  %v2926_v56 = vld [vmem:[%s2805_s13 + $0xc0] sm:$0xff]  ;;  %v2932_v58 = vsel %vm316_vm1, %v341_v43, %v343_v46  ;;  %v2935_v59 = vsel %vm316_vm1, %v334_v23, %v336_v47  ;;  %v2938_v60 = vsel %vm316_vm1, %v338_v48, %v339_v42  ;;  %v352_v61 = vrot.slane %v2903_v44, 1  ;;  %s2728_s6 = smov 28  }
  0x29   : > { %4258 = vst [vmem:[#allocation14_spill] sm:$0xff] %v2926_v56  ;;  %v2929_v57 = vld [vmem:[%s2805_s13 + $0xc8] sm:$0xff]  ;;  %4260 = vst [vmem:[#allocation16_spill] sm:$0xff] %v2935_v59  ;;  %v2948_v63 = vpack.i.bf16 %v2932_v58, %v2918_v52  ;;  %v2951_v0 = vsel %vm316_vm1, %v348_v53, %v350_v54  ;;  %v353_v5 = vrot.slane %v2910_v49, 1  ;;  %v2955_v6 = vld [vmem:[%s2805_s13 + $0xb0] sm:$0xff]  ;;  %v345_v10 = vrot.slane %v2913_v50, 1 }
  0x2a   : > { %4259 = vst [vmem:[#allocation15_spill] sm:$0xff] %v2929_v57  ;;  %2200 = vrot.lane.b32.xlu1 %v2898_v41, %s2722_s14  ;;  %v2958_v7 = vld [vmem:[%s2805_s13 + $0xb8] sm:$0x3]  ;;  %v2961_v9 = vld [vmem:[%s2805_s13 + $0xe8] sm:$0xff]  ;;  %v346_v15 = vrot.slane %v2923_v55, 1  ;;  %v359_v17 = vrot.slane %v2926_v56, 1  ;;  %v2973_v23 = vpack.i.bf16 %v2938_v60, %v2935_v59 }
  0x2b   : > { %4261 = vst [vmem:[#allocation17_spill] sm:$0xff] %v2948_v63  ;;  %v360_v18 = vrot.slane %v2929_v57, 1  ;;  %v2968_v22 = vld [vmem:[%s2805_s13 + $0xf8] sm:$0x3]  ;;  %2190 = vrot.lane.b32.xlu0 %v2189_v51, %s2722_s14  ;;  %v2976_v28 = vsel %vm316_vm1, %v352_v61, %v353_v5  ;;  %v362_v30 = vrot.slane %v2942_v62, 1  ;;  %v2980_v35 = vld [vmem:[%s2805_s13 + $0xf0] sm:$0xff] }
  0x2c   : > { %4262 = vst [vmem:[#allocation18_spill] sm:$0xff] %v2973_v23  ;;  %v2983_v37 = vld [vmem:[%s2805_s13 + $0xd8] sm:$0x3]  ;;  %v2986_v40 = vsel %vm316_vm1, %v345_v10, %v346_v15  ;;  %v2989_v42 = vsel %vm316_vm1, %v346_v15, %v348_v53  ;;  %v355_v43 = vrot.slane %v2955_v6, 1  ;;  %v357_v45 = vrot.slane %v2958_v7, 1  ;;  %v2994_v46 = vld [vmem:[%s2805_s13 + $0xe0] sm:$0xff] }
  0x2d   : > { %v3000_v47 = vpack.i.bf16 %v2976_v28, %v2951_v0  ;;  %v3003_v48 = vsel %vm316_vm1, %v359_v17, %v360_v18  ;;  %v3006_v51 = vsel %vm316_vm1, %v360_v18, %v362_v30  ;;  %v367_v53 = vrot.slane %v2961_v9, 1  ;;  %s2729_s7 = smov 32  }
  0x2e   : > { %2210 = vrot.lane.b32.xlu1 %v2948_v63, %s2722_s14  ;;  %4264 = vst [vmem:[#allocation20_spill] sm:$0xff] %v3006_v51  ;;  %v369_v54 = vrot.slane %v2980_v35, 1  ;;  %v3014_v61 = vpack.i.bf16 %v2989_v42, %v2986_v40  ;;  %v371_v10 = vrot.slane %v2968_v22, 1  ;;  %v364_v15 = vrot.slane %v2983_v37, 1 }
  0x2f   : > { %4263 = vst [vmem:[#allocation19_spill] sm:$0xff] %v3000_v47  ;;  %2205 = vrot.lane.b32.xlu0 %v2973_v23, %s2722_s14  ;;  %v366_v17 = vrot.slane %v2994_v46, 1  ;;  %v3020_v18 = vsel %vm316_vm1, %v353_v5, %v355_v43  ;;  %v3023_v34 = vsel %vm316_vm1, %v355_v43, %v357_v45  ;;  %v3030_v63 = vpack.i.bf16 %v3006_v51, %v3003_v48 }
  0x30   : > { %4265 = vst [vmem:[#allocation21_spill] sm:$0xff] %v3014_v61  ;;  %v3033_v41 = vsel %vm316_vm1, %v367_v53, %v369_v54  ;;  %v449_v23 = vrot.slane %v2841_v16, 2  ;;  %v451_v5 = vrot.slane %v2857_v24, 2  ;;  %v3038_v29 = vsel %vm316_vm1, %v369_v54, %v371_v10 }
  0x31   : > { %4266 = vst [vmem:[#allocation22_spill] sm:$0xff] %v3030_v63  ;;  %4267 = vst [vmem:[#allocation23_spill] sm:$0xff] %v3033_v41  ;;  %v453_v43 = vrot.slane %v2828_v11, 2  ;;  %v446_v45 = vrot.slane %v2831_v12, 2  ;;  %v3047_v21 = vpack.i.bf16 %v3023_v34, %v3020_v18  ;;  %v3050_v16 = vsel %vm316_vm1, %v362_v30, %v364_v15 }
  0x32   : > { %2220 = vrot.lane.b32.xlu1 %v3000_v47, %s2722_s14  ;;  %4268 = vst [vmem:[#allocation24_spill] sm:$0xff] %v3038_v29  ;;  %v447_v47 = vrot.slane %v2834_v13, 2  ;;  %4270 = vst [vmem:[#allocation26_spill] sm:$0xff] %v3050_v16  ;;  %v3053_v24 = vsel %vm316_vm1, %v366_v17, %v367_v53  ;;  %v460_v54 = vrot.slane %v2814_v3, 2  ;;  %v461_v10 = vrot.slane %v2817_v4, 2 }
  0x33   : > { %2215 = vrot.lane.b32.xlu0 %v3014_v61, %s2722_s14  ;;  %4269 = vst [vmem:[#allocation25_spill] sm:$0xff] %v3047_v21  ;;  %4271 = vst [vmem:[#allocation27_spill] sm:$0xff] %v3053_v24  ;;  %v463_v12 = vrot.slane %v2846_v19, 2  ;;  %v458_v13 = vrot.slane %v2811_v2, 2  ;;  %v3063_v61 = vpack.i.bf16 %v3038_v29, %v3033_v41  ;;  %v3067_v30 = vpack.i.bf16 %v3053_v24, %v3050_v16  ;;  %v279_v24 = vld [vmem:[%s2805_s13 + $0x118] sm:$0x3] }
  0x34   : > { %v452_v53 = vsel %vm445_vm2, %v449_v23, %v451_v5  ;;  %v3071_v15 = vsel %vm445_vm2, %v453_v43, %v454_v27  ;;  %v448_v17 = vsel %vm445_vm2, %v446_v45, %v447_v47  ;;  %v450_v2 = vsel %vm445_vm2, %v447_v47, %v449_v23 }
  0x35   : > { %4272 = vst [vmem:[#allocation28_spill] sm:$0xff] %v3063_v61  ;;  %4273 = vst [vmem:[#allocation29_spill] sm:$0xff] %v3067_v30  ;;  %v468_v14 = vrot.slane %v2860_v25, 2  ;;  %v470_v20 = vrot.slane %v2863_v26, 2  ;;  %v3081_v19 = vsel %vm445_vm2, %v460_v54, %v461_v10  ;;  %v3084_v5 = vsel %vm445_vm2, %v461_v10, %v463_v12 }
  0x36   : > { %2230 = vrot.lane.b32.xlu1 %v3030_v63, %s2722_s14  ;;  %4274 = vst [vmem:[#allocation30_spill] sm:$0xff] %v3071_v15  ;;  %v456_v63 = vrot.slane %v2808_v1, 2  ;;  %4275 = vst [vmem:[#allocation31_spill] sm:$0xff] %v3081_v19  ;;  %v472_v43 = vrot.slane %v2874_v31, 2  ;;  %v2249_v45 = vpack.i.bf16 %v3071_v15, %v452_v53  ;;  %v2244_v23 = vpack.i.bf16 %v450_v2, %v448_v17 }
  0x37   : > { %2225 = vrot.lane.b32.xlu0 %v3047_v21, %s2722_s14  ;;  %v465_v47 = vrot.slane %v2877_v32, 2  ;;  %v3095_v54 = vpack.i.bf16 %v3084_v5, %v3081_v19  ;;  %v467_v32 = vrot.slane %v2880_v33, 2  ;;  %v477_v17 = vrot.slane %v2890_v38, 2 }
  0x38   : > { %v3098_v10 = vsel %vm445_vm2, %v454_v27, %v456_v63  ;;  %v3101_v31 = vsel %vm445_vm2, %v456_v63, %v458_v13  ;;  %v3107_v53 = vsel %vm445_vm2, %v470_v20, %v472_v43  ;;  %v479_v2 = vrot.slane %v2893_v39, 2 }
  0x39   : > { %4276 = vst [vmem:[#allocation32_spill] sm:$0xff] %v3098_v10  ;;  %v481_v27 = vrot.slane %v2903_v44, 2  ;;  %v482_v13 = vrot.slane %v2910_v49, 2  ;;  %v474_v63 = vrot.slane %v2913_v50, 2  ;;  %v489_v43 = vrot.slane %v2929_v57, 2 }
  0x3a   : > { %2240 = vrot.lane.b32.xlu1 %v3063_v61, %s2722_s14  ;;  %v3104_v61 = vsel %vm445_vm2, %v468_v14, %v470_v20  ;;  %v488_v20 = vrot.slane %v2926_v56, 2  ;;  %v491_v21 = vrot.slane %v2942_v62, 2  ;;  %v2254_v39 = vpack.i.bf16 %v3101_v31, %v3098_v10 }
  0x3b   : > { %2235 = vrot.lane.b32.xlu0 %v3067_v30, %s2722_s14  ;;  %4277 = vst [vmem:[#allocation33_spill] sm:$0xff] %v3104_v61  ;;  %v475_v30 = vrot.slane %v2923_v55, 2  ;;  %v3128_v15 = vsel %vm445_vm2, %v463_v12, %v465_v47  ;;  %v3131_v19 = vsel %vm445_vm2, %v467_v32, %v468_v14  ;;  %v484_v49 = vrot.slane %v2955_v6, 2 }
  0x3c   : > { %v486_v57 = vrot.slane %v2958_v7, 2  ;;  %v3141_v10 = vsel %vm445_vm2, %v481_v27, %v482_v13  ;;  %v3150_v14 = vsel %vm445_vm2, %v488_v20, %v489_v43  ;;  %v3153_v7 = vsel %vm445_vm2, %v489_v43, %v491_v21 }
  0x3d   : > { %4279 = vst [vmem:[#allocation35_spill] sm:$0xff] %v3141_v10  ;;  %v3147_v12 = vsel %vm445_vm2, %v475_v30, %v477_v17  ;;  %4280 = vst [vmem:[#allocation36_spill] sm:$0xff] %v3153_v7  ;;  %v3158_v47 = vpack.i.bf16 %v3131_v19, %v3128_v15  ;;  %v496_v20 = vrot.slane %v2961_v9, 2  ;;  %v498_v43 = vrot.slane %v2980_v35, 2 }
  0x3e   : > { %2250 = vrot.lane.b32.xlu1 %v2249_v45, %s2723_s15  ;;  %v3125_v45 = vpack.i.bf16 %v3107_v53, %v3104_v61  ;;  %v3144_v61 = vsel %vm445_vm2, %v474_v63, %v475_v30  ;;  %v3174_v27 = vsel %vm445_vm2, %v484_v49, %v486_v57  ;;  %v3180_v63 = vpack.i.bf16 %v3153_v7, %v3150_v14 }
  0x3f   : > { %2245 = vrot.lane.b32.xlu0 %v2244_v23, %s2723_s15  ;;  %v3138_v23 = vsel %vm445_vm2, %v477_v17, %v479_v2  ;;  %v3168_v30 = vpack.i.bf16 %v3147_v12, %v3144_v61  ;;  %v3171_v17 = vsel %vm445_vm2, %v482_v13, %v484_v49  ;;  %v493_v32 = vrot.slane %v2983_v37, 2 }
  0x40   : > { %4278 = vst [vmem:[#allocation34_spill] sm:$0xff] %v3125_v45  ;;  %v3164_v2 = vpack.i.bf16 %v3141_v10, %v3138_v23  ;;  %4281 = vst [vmem:[#allocation37_spill] sm:$0xff] %v3171_v17  ;;  %v3193_v57 = vpack.i.bf16 %v3174_v27, %v3171_v17  ;;  %v3210_v59 = vsel %vm445_vm2, %v496_v20, %v498_v43  ;;  %v655_v7 = vrot.slane %v279_v24, 1 }
  0x41   : > { %4282 = vst [vmem:[#allocation38_spill] sm:$0xff] %v3180_v63  ;;  %4283 = vst [vmem:[#allocation39_spill] sm:$0xff] %v3210_v59  ;;  %v3222_v36 = vsel %vm445_vm2, %v491_v21, %v493_v32  ;;  %v3245_v32 = vld [vmem:[%s2805_s13 + $0x100] sm:$0xff]  ;;  %v2304_v13 = vpack.i.bf16 %v2823_v8, %v2828_v11  ;;  %v2339_v41 = vpack.i.bf16 %v2926_v56, %v2955_v6  ;;  %vm1167_vm9 = vcmask 195584  }
  0x42   : > { %2260 = vrot.lane.b32.xlu1 %v3095_v54, %s2723_s15  ;;  %4285 = vst [vmem:[#allocation41_spill] sm:$0xff] %v3222_v36  ;;  %v729_v8 = vrot.slane %v3245_v32, 2  ;;  %vm1192_vm10 = vcmask 228352   ;;  %vm1217_vm11 = vcmask 261120   ;;  %vm1274_vm12 = vcmask 293888  }
  0x43   : > { %2255 = vrot.lane.b32.xlu0 %v2254_v39, %s2723_s15  ;;  %v500_v39 = vrot.slane %v2968_v22, 2  ;;  %vm1852_vm13 = vcmask 60416   ;;  %vm1743_vm14 = vcmask 1040384   ;;  %vm1746_vm15 = vcmask 58368  }
  0x45   : > { %v3213_v22 = vsel %vm445_vm2, %v498_v43, %v500_v39  ;;  %v650_v39 = vrot.slane %v3245_v32, 1 }
  0x46   : > { %2270 = vrot.lane.b32.xlu1 %v3125_v45, %s2723_s15  ;;  %v495_v45 = vrot.slane %v2994_v46, 2  ;;  %4284 = vst [vmem:[#allocation40_spill] sm:$0xff] %v3213_v22  ;;  %v3235_v49 = vpack.i.bf16 %v3213_v22, %v3210_v59 }
  0x47   : > { %2265 = vrot.lane.b32.xlu0 %v3158_v47, %s2723_s15 }
  0x48   : > { %v3225_v37 = vsel %vm445_vm2, %v495_v45, %v496_v20  ;;  %4287 = vst [vmem:[#allocation43_spill] sm:$0xff] %v3235_v49  ;;  %v3242_v45 = vld [vmem:[%s2805_s13 + $0x108] sm:$0xff] }
  0x49   : > { %4286 = vst [vmem:[#allocation42_spill] sm:$0xff] %v3225_v37  ;;  %v3239_v21 = vpack.i.bf16 %v3225_v37, %v3222_v36  ;;  %v651_v51 = vrot.slane %v3242_v45, 1  ;;  %v730_v11 = vrot.slane %v3242_v45, 2  ;;  %v734_v36 = vrot.slane %v279_v24, 2  ;;  %v3315_v24 = vld [vmem:[%s2805_s13 + $0x128] sm:$0xff] }
  0x4a   : > { %2280 = vrot.lane.b32.xlu1 %v3164_v2, %s2723_s15  ;;  %v885_v22 = vrot.slane %v3315_v24, 1 }
  0x4b   : > { %2275 = vrot.lane.b32.xlu0 %v3168_v30, %s2723_s15  ;;  %4288 = vst [vmem:[#allocation44_spill] sm:$0xff] %v3239_v21  ;;  %v3274_v10 = vsel %vm316_vm1, %v650_v39, %v651_v51  ;;  %v3284_v59 = vsel %vm445_vm2, %v729_v8, %v730_v11  ;;  %v4293_v8 = vpack.i.bf16 %v2814_v3, %v2808_v1  ;;  %v3318_v1 = vld [vmem:[%s2805_s13 + $0x130] sm:$0xff] }
  0x4c   : > { %4289 = vst [vmem:[#allocation45_spill] sm:$0xff] %v3274_v10  ;;  %4291 = vst [vmem:[#allocation47_spill] sm:$0xff] %v3284_v59  ;;  %v964_v10 = vrot.slane %v3315_v24, 2 }
  0x4d   : > { %4296 = vst [vmem:[#allocation49_spill] sm:$0xff] %v3318_v1 }
  0x4e   : > { %2290 = vrot.lane.b32.xlu1 %v3180_v63, %s2723_s15  ;;  %v3258_v63 = vld [vmem:[%s2805_s13 + $0x110] sm:$0xff] }
  0x4f   : > { %2285 = vrot.lane.b32.xlu0 %v3193_v57, %s2723_s15  ;;  %v653_v43 = vrot.slane %v3258_v63, 1  ;;  %v732_v37 = vrot.slane %v3258_v63, 2 }
  0x51   : > { %v3277_v20 = vsel %vm316_vm1, %v651_v51, %v653_v43  ;;  %v3287_v39 = vsel %vm445_vm2, %v730_v11, %v732_v37  ;;  %v3294_v16 = vsel %vm316_vm1, %v653_v43, %v655_v7  ;;  %v2319_v11 = vpack.i.bf16 %v2860_v25, %v2880_v33  ;;  %v283_v43 = vld [vmem:[%s2805_s13 + $0x138] sm:$0x3] }
  0x52   : > { %2300 = vrot.lane.b32.xlu1 %v3235_v49, %s2723_s15  ;;  %4290 = vst [vmem:[#allocation46_spill] sm:$0xff] %v3277_v20  ;;  %4292 = vst [vmem:[#allocation48_spill] sm:$0xff] %v3287_v39  ;;  %v3297_v49 = vsel %vm445_vm2, %v732_v37, %v734_v36  ;;  %v4294_v36 = vld [vmem:[#allocation7_spill] sm:$0xff]  ;;  %v2329_v51 = vpack.i.bf16 %v2890_v38, %v2923_v55  ;;  %v889_v59 = vrot.slane %v283_v43, 1 }
  0x53   : > { %2295 = vrot.lane.b32.xlu0 %v3239_v21, %s2723_s15  ;;  %v2314_v37 = vpack.i.bf16 %v4294_v36, %v2817_v4  ;;  %4295 = vst [vmem:[#allocation7_spill] sm:$0xff] %v3315_v24  ;;  %v2324_v39 = vpack.i.bf16 %v2913_v50, %v2863_v26  ;;  %v968_v24 = vrot.slane %v283_v43, 2  ;;  %v4305_v43 = vld [vmem:[#allocation31_spill] sm:$0xff] }
  0x56   : > { %2310 = vrot.lane.b32.xlu1 %v4293_v8, %s2724_s16  ;;  %v3321_v8 = vld [vmem:[%s2805_s13 + $0x120] sm:$0xff] }
  0x57   : > { %2305 = vrot.lane.b32.xlu0 %v2304_v13, %s2724_s16  ;;  %4297 = vst [vmem:[#allocation50_spill] sm:$0xff] %v3321_v8  ;;  %v887_v13 = vrot.slane %v3318_v1, 1  ;;  %v884_v29 = vrot.slane %v3321_v8, 1  ;;  %v963_v20 = vrot.slane %v3321_v8, 2  ;;  %v4307_v8 = vld [vmem:[#allocation10_spill] sm:$0xff] }
  0x59   : > { %v3339_v7 = vsel %vm316_vm1, %v885_v22, %v887_v13  ;;  %v3345_v21 = vsel %vm316_vm1, %v887_v13, %v889_v59  ;;  %v4301_v13 = vld [vmem:[#allocation15_spill] sm:$0xff] }
  0x5a   : > { %2320 = vrot.lane.b32.xlu1 %v2319_v11, %s2724_s16  ;;  %v966_v11 = vrot.slane %v3318_v1, 2 }
  0x5b   : > { %2315 = vrot.lane.b32.xlu0 %v2314_v37, %s2724_s16  ;;  %v3348_v37 = vsel %vm316_vm1, %v884_v29, %v885_v22  ;;  %v3364_v29 = vsel %vm445_vm2, %v963_v20, %v964_v10  ;;  %v2349_v22 = vpack.i.bf16 %v2961_v9, %v2994_v46  ;;  %v2666_v20 = vld [vmem:[%s4182_s1 + $0x10] ss:$0 sps:$4 sm:$0x33]  }
  0x5c   : > { %v3358_v56 = vsel %vm445_vm2, %v964_v10, %v966_v11  ;;  %v3361_v59 = vsel %vm445_vm2, %v966_v11, %v968_v24  ;;  %4300 = vst [vmem:[#allocation51_spill] sm:$0xff] %v3364_v29  ;;  %v2344_v24 = vpack.i.bf16 %v2942_v62, %v4301_v13  ;;  %v2359_v10 = vpack.i.bf16 %v3258_v63, %v3242_v45  ;;  %v4302_v11 = vld [vmem:[#allocation8_spill] sm:$0xff] }
  0x5d   : > { %2129 = vmatprep.subr.msk.bf16.mxu0 %vm1311_vm3, %v2666_v20  ;;  %2130 = vmatprep.subr.msk.bf16.mxu1 %vm1311_vm3, %v2666_v20  ;;  %v4310_v29 = vld [vmem:[#allocation32_spill] sm:$0xff] }
  0x5e   : > { %2330 = vrot.lane.b32.xlu1 %v2329_v51, %s2724_s16  ;;  %v4298_v51 = vld [vmem:[#allocation13_spill] sm:$0xff] }
  0x5f   : > { %2325 = vrot.lane.b32.xlu0 %v2324_v39, %s2724_s16  ;;  %v2334_v17 = vpack.i.bf16 %v4298_v51, %v2903_v44  ;;  %4299 = vst [vmem:[#allocation13_spill] sm:$0xff] %v3358_v56  ;;  %v2379_v39 = vpack.i.bf16 %v4305_v43, %v3101_v31  ;;  %v2389_v31 = vpack.i.bf16 %v2880_v33, %v4294_v36  ;;  %v2668_v43 = vld [vmem:[%s4182_s1] sm:$0xff]   ;;  %v4312_v36 = vld [vmem:[#allocation12_spill] sm:$0xff] }
  0x60   : > { %v4311_v33 = vld [vmem:[#allocation18_spill] sm:$0xff] }
  0x62   : > { %2340 = vrot.lane.b32.xlu1 %v2339_v41, %s2724_s16  ;;  %v2354_v41 = vpack.i.bf16 %v3245_v32, %v2980_v35 }
  0x63   : > { %2335 = vrot.lane.b32.xlu0 %v2334_v17, %s2724_s16  ;;  %v1313_v17 = vsel %vm1311_vm3, %v2666_v20, 0  ;;  %v4309_v20 = vld [vmem:[#allocation30_spill] sm:$0xff] }
  0x64   : > { %2094 = vmatpush3.bf16.msra.mxu0 %v1313_v17  ;;  %2126 = vmatpush3.bf16.msra.mxu1 %v1313_v17  ;;  %v2374_v56 = vpack.i.bf16 %v4310_v29, %v4309_v20  ;;  %v4316_v29 = vld [vmem:[#allocation11_spill] sm:$0xff]  ;;  %v4326_v17 = vld [vmem:[#allocation25_spill] sm:$0xff] }
  0x65   : > { %v4331_v20 = vld [vmem:[#allocation37_spill] sm:$0xff] }
  0x66   : > { %2350 = vrot.lane.b32.xlu1 %v2349_v22, %s2724_s16  ;;  %v4303_v22 = vld [vmem:[#allocation5_spill] sm:$0xff] }
  0x67   : > { %2345 = vrot.lane.b32.xlu0 %v2344_v24, %s2724_s16  ;;  %v4304_v24 = vpack.i.bf16 %v4302_v11, %v4303_v22  ;;  %v4328_v22 = vpack.i.bf16 %v3003_v48, %v3023_v34 }
  0x6a   : > { %2360 = vrot.lane.b32.xlu1 %v2359_v10, %s2724_s16  ;;  %v2667_v10 = vld [vmem:[%s4182_s1 + $0x8] sm:$0xff]  }
  0x6b   : > { %2355 = vrot.lane.b32.xlu0 %v2354_v41, %s2724_s16  ;;  %v4306_v41 = vld [vmem:[#allocation9_spill] sm:$0xff]  ;;  %2095 = vmatprep.subr.bf16.mxu0 %v2667_v10 }
  0x6c   : > { %v4308_v1 = vpack.i.bf16 %v4306_v41, %v4307_v8  ;;  %2124 = vmatprep.subr.bf16.mxu1 %v2667_v10  ;;  %2096 = vmatpush3.bf16.msra.mxu0 %v2667_v10  ;;  %v4315_v8 = vld [vmem:[#allocation16_spill] sm:$0xff] }
  0x6d   : > { %2127 = vmatpush3.bf16.msra.mxu1 %v2667_v10  ;;  %2097 = vmatprep.subr.bf16.mxu0 %v2668_v43 }
  0x6e   : > { %2370 = vrot.lane.b32.xlu1 %v4304_v24, %s2725_s24  ;;  %2125 = vmatprep.subr.bf16.mxu1 %v2668_v43  ;;  %v4329_v24 = vpack.i.bf16 %v3020_v18, %v2976_v28 }
  0x6f   : > { %2365 = vrot.lane.b32.xlu0 %v4308_v1, %s2725_s24  ;;  %v2384_v1 = vpack.i.bf16 %v2817_v4, %v2814_v3  ;;  %v4313_v3 = vpack.i.bf16 %v2918_v52, %v2938_v60  ;;  %v4314_v4 = vld [vmem:[#allocation33_spill] sm:$0xff]  ;;  %v2434_v52 = vpack.i.bf16 %v2863_v26, %v2860_v25  ;;  %v4322_v25 = vpack.i.bf16 %v2951_v0, %v2989_v42 }
  0x70   : > { %2098 = vmatpush3.bf16.msra.mxu0 %v2668_v43  ;;  %v4320_v60 = vld [vmem:[#allocation17_spill] sm:$0xff]  ;;  %v4323_v26 = vpack.i.bf16 %v2986_v40, %v2932_v58  ;;  %v4325_v0 = vpack.i.bf16 %v3144_v61, %v3107_v53  ;;  %v2484_v58 = vpack.i.bf16 %v2903_v44, %v2890_v38  ;;  %v4327_v61 = vld [vmem:[#allocation19_spill] sm:$0xff] }
  0x71   : > { %2128 = vmatpush3.bf16.msra.mxu1 %v2668_v43  ;;  %v4334_v43 = vld [vmem:[#allocation14_spill] sm:$0xff] }
  0x72   : > { %2380 = vrot.lane.b32.xlu1 %v2379_v39, %s2726_s27  ;;  %v4317_v39 = vpack.i.bf16 %v4315_v8, %v4316_v29  ;;  %v2534_v28 = vpack.i.bf16 %v4301_v13, %v4334_v43  ;;  %v4338_v8 = vld [vmem:[#allocation38_spill] sm:$0xff] }
  0x73   : > { %2375 = vrot.lane.b32.xlu0 %v2374_v56, %s2726_s27  ;;  %v2429_v56 = vpack.i.bf16 %v4314_v4, %v3131_v19  ;;  %v4319_v19 = vld [vmem:[#allocation21_spill] sm:$0xff] }
  0x76   : > { %2390 = vrot.lane.b32.xlu1 %v2389_v31, %s2727_s5  ;;  %v4332_v31 = vld [vmem:[#allocation35_spill] sm:$0xff] }
  0x77   : > { %2385 = vrot.lane.b32.xlu0 %v2384_v1, %s2727_s5  ;;  %v4333_v34 = vpack.i.bf16 %v4331_v20, %v4332_v31  ;;  %v4335_v1 = vld [vmem:[#allocation29_spill] sm:$0xff]  ;;  %v2584_v31 = vpack.i.bf16 %v2980_v35, %v2961_v9 }
  0x7a   : > { %2400 = vrot.lane.b32.xlu1 %v4311_v33, %s2728_s6  ;;  %v4336_v33 = vld [vmem:[#allocation22_spill] sm:$0xff] }
  0x7b   : > { %2395 = vrot.lane.b32.xlu0 %v4312_v36, %s2728_s6 }
  0x7e   : > { %2410 = vrot.lane.b32.xlu1 %v3158_v47, %s2729_s7  ;;  %v2439_v47 = vpack.i.bf16 %v2923_v55, %v2913_v50  ;;  %v4321_v50 = vld [vmem:[#allocation34_spill] sm:$0xff] }
  0x7f   : > { %2405 = vrot.lane.b32.xlu0 %v3095_v54, %s2729_s7  ;;  %v4318_v54 = vpack.i.bf16 %v3128_v15, %v3084_v5  ;;  %v4324_v5 = vpack.i.bf16 %v3138_v23, %v3147_v12 }
  0x82   : > { %2420 = vrot.lane.b32.xlu1 %v4313_v3, %s2725_s24  ;;  %v2730_v3 = vmov 0  }
  0x83   : > { %2415 = vrot.lane.b32.xlu0 %v4317_v39, %s2725_s24  ;;  %2665 = vset.pattern.permute.xlu1 %v2730_v3 }
  0x84   : > { %2664 = vset.pattern.permute.xlu0 %v2730_v3 }
  0x86   : > { %2430 = vrot.lane.b32.xlu1 %v2429_v56, %s2726_s27  ;;  %v4337_v56 = vld [vmem:[#allocation44_spill] sm:$0xff] }
  0x87   : > { %2425 = vrot.lane.b32.xlu0 %v4318_v54, %s2726_s27  ;;  %v4340_v54 = vld [vmem:[#allocation27_spill] sm:$0xff] }
  0x8a   : > { %2440 = vrot.lane.b32.xlu1 %v2439_v47, %s2727_s5  ;;  %v4339_v47 = vld [vmem:[#allocation23_spill] sm:$0xff] }
  0x8b   : > { %2435 = vrot.lane.b32.xlu0 %v2434_v52, %s2727_s5  ;;  %v4341_v52 = vpack.i.bf16 %v4339_v47, %v4340_v54 }
  0x8e   : > { %2450 = vrot.lane.b32.xlu1 %v4319_v19, %s2728_s6  ;;  %v4342_v19 = vld [vmem:[#allocation26_spill] sm:$0xff] }
  0x8f   : > { %2445 = vrot.lane.b32.xlu0 %v4320_v60, %s2728_s6  ;;  %v4343_v60 = vld [vmem:[#allocation20_spill] sm:$0xff] }
  0x92   : > { %2460 = vrot.lane.b32.xlu1 %v3168_v30, %s2729_s7  ;;  %v2489_v30 = vpack.i.bf16 %v2955_v6, %v4298_v51 }
  0x93   : > { %2455 = vrot.lane.b32.xlu0 %v4321_v50, %s2729_s7  ;;  %v4344_v50 = vpack.i.bf16 %v4342_v19, %v4343_v60  ;;  %v4352_v19 = vld [vmem:[#allocation46_spill] sm:$0xff]  ;;  %v4353_v60 = vld [vmem:[#allocation45_spill] sm:$0xff] }
  0x96   : > { %2470 = vrot.lane.b32.xlu1 %v4322_v25, %s2725_s24 }
  0x97   : > { %2465 = vrot.lane.b32.xlu0 %v4323_v26, %s2725_s24 }
  0x98   : > { %v3458_v55 = vpop.permute.xlu1 %2195 }
  0x99   : > { %v3460_v15 = vpop.permute.xlu0 %2185 }
  0x9a   : > { %2480 = vrot.lane.b32.xlu1 %v4324_v5, %s2726_s27 }
  0x9b   : > { %2475 = vrot.lane.b32.xlu0 %v4325_v0, %s2726_s27  ;;  %v4345_v0 = vld [vmem:[#allocation39_spill] sm:$0xff] }
  0x9c   : > { %v3472_v42 = vpop.permute.xlu1 %2200 }
  0x9d   : > { %v3476_v40 = vpop.permute.xlu0 %2190 }
  0x9e   : > { %2490 = vrot.lane.b32.xlu1 %v2489_v30, %s2727_s5 }
  0x9f   : > { %2485 = vrot.lane.b32.xlu0 %v2484_v58, %s2727_s5  ;;  %v4346_v58 = vld [vmem:[#allocation42_spill] sm:$0xff] }
  0xa0   : > { %v3480_v23 = vpop.permute.xlu1 %2210 }
  0xa1   : > { %v3482_v12 = vpop.permute.xlu0 %2205 }
  0xa2   : > { %2500 = vrot.lane.b32.xlu1 %v4326_v17, %s2728_s6  ;;  %v4347_v17 = vpack.i.bf16 %v4345_v0, %v4346_v58  ;;  %v4357_v0 = vld [vmem:[#allocation47_spill] sm:$0xff] }
  0xa3   : > { %2495 = vrot.lane.b32.xlu0 %v4327_v61, %s2728_s6 }
  0xa4   : > { %v3488_v53 = vpop.permute.xlu1 %2220 }
  0xa5   : > { %v3490_v11 = vpop.permute.xlu0 %2215 }
  0xa6   : > { %2510 = vrot.lane.b32.xlu1 %v3193_v57, %s2729_s7  ;;  %v2539_v57 = vpack.i.bf16 %v2994_v46, %v2942_v62 }
  0xa7   : > { %2505 = vrot.lane.b32.xlu0 %v3164_v2, %s2729_s7  ;;  %v4330_v2 = vpack.i.bf16 %v3150_v14, %v3174_v27 }
  0xa8   : > { %v3496_v38 = vpop.permute.xlu1 %2230 }
  0xa9   : > { %v3498_v44 = vpop.permute.xlu0 %2225 }
  0xaa   : > { %2520 = vrot.lane.b32.xlu1 %v4328_v22, %s2725_s24 }
  0xab   : > { %2515 = vrot.lane.b32.xlu0 %v4329_v24, %s2725_s24  ;;  %v4348_v24 = vld [vmem:[#allocation41_spill] sm:$0xff] }
  0xac   : > { %v2241_v10 = vpop.permute.xlu1 %2240 }
  0xad   : > { %v2236_v41 = vpop.permute.xlu0 %2235  ;;  %v2243_v26 = vunpack.i.h.bf16 %v2241_v10  ;;  %v2242_v5 = vunpack.i.l.bf16 %v2241_v10 }
  0xae   : > { %2530 = vrot.lane.b32.xlu1 %v4330_v2, %s2726_s27  ;;  %v2238_v61 = vunpack.i.h.bf16 %v2236_v41  ;;  %v2237_v22 = vunpack.i.l.bf16 %v2236_v41  ;;  %v4349_v2 = vld [vmem:[#allocation36_spill] sm:$0xff] }
  0xaf   : > { %2525 = vrot.lane.b32.xlu0 %v4333_v34, %s2726_s27 }
  0xb0   : > { %v3518_v48 = vpop.permute.xlu1 %2250  ;;  %v1064_v54 = vsel %vm1042_vm4, %v2994_v46, %v2238_v61  ;;  %v4355_v46 = vld [vmem:[#allocation28_spill] sm:$0xff] }
  0xb1   : > { %v3522_v18 = vpop.permute.xlu0 %2245 }
  0xb2   : > { %2540 = vrot.lane.b32.xlu1 %v2539_v57, %s2727_s5  ;;  %v4350_v57 = vpack.i.bf16 %v4348_v24, %v4349_v2  ;;  %v4360_v24 = vpack.i.bf16 %v3294_v16, %v4352_v19  ;;  %v4361_v2 = vld [vmem:[#allocation24_spill] sm:$0xff] }
  0xb3   : > { %2535 = vrot.lane.b32.xlu0 %v2534_v28, %s2727_s5  ;;  %v1066_v28 = vsel %vm1042_vm4, %v2980_v35, %v2243_v26  ;;  %v1063_v35 = vsel %vm1042_vm4, %v2942_v62, %v2237_v22 }
  0xb4   : > { %v3526_v14 = vpop.permute.xlu1 %2260 }
  0xb5   : > { %v3528_v27 = vpop.permute.xlu0 %2255 }
  0xb6   : > { %2550 = vrot.lane.b32.xlu1 %v4335_v1, %s2728_s6  ;;  %v1065_v1 = vsel %vm1042_vm4, %v2961_v9, %v2242_v5  ;;  %v4356_v5 = vld [vmem:[#allocation48_spill] sm:$0xff] }
  0xb7   : > { %2545 = vrot.lane.b32.xlu0 %v4336_v33, %s2728_s6  ;;  %v4351_v33 = vpack.i.bf16 %v3242_v45, %v3245_v32  ;;  %v4358_v58 = vpack.i.bf16 %v4356_v5, %v4357_v0 }
  0xb8   : > { %v3534_v36 = vpop.permute.xlu1 %2270 }
  0xb9   : > { %v3536_v4 = vpop.permute.xlu0 %2265 }
  0xba   : > { %2560 = vrot.lane.b32.xlu1 %v4337_v56, %s2729_s7 }
  0xbb   : > { %2555 = vrot.lane.b32.xlu0 %v4338_v8, %s2729_s7 }
  0xbc   : > { %v3542_v29 = vpop.permute.xlu1 %2280 }
  0xbd   : > { %v3544_v39 = vpop.permute.xlu0 %2275 }
  0xbe   : > { %2570 = vrot.lane.b32.xlu1 %v4341_v52, %s2725_s24 }
  0xbf   : > { %2565 = vrot.lane.b32.xlu0 %v4344_v50, %s2725_s24  ;;  %v4354_v50 = vpack.i.bf16 %v4352_v19, %v4353_v60 }
  0xc0   : > { %v3554_v25 = vpop.permute.xlu1 %2290 }
  0xc1   : > { %v3556_v30 = vpop.permute.xlu0 %2285 }
  0xc2   : > { %2580 = vrot.lane.b32.xlu1 %v4347_v17, %s2726_s27  ;;  %v4359_v17 = vld [vmem:[#allocation43_spill] sm:$0xff]  ;;  %v2287_v19 = vunpack.i.l.bf16 %v3556_v30 }
  0xc3   : > { %2575 = vrot.lane.b32.xlu0 %v4350_v57, %s2726_s27  ;;  %v4362_v57 = vpack.i.bf16 %v4353_v60, %v4361_v2  ;;  %v4366_v60 = vld [vmem:[#allocation40_spill] sm:$0xff] }
  0xc4   : > { %v2301_v20 = vpop.permute.xlu1 %2300 }
  0xc5   : > { %v2303_v10 = vunpack.i.h.bf16 %v2301_v20  ;;  %v2302_v34 = vunpack.i.l.bf16 %v2301_v20  ;;  %v2296_v41 = vpop.permute.xlu0 %2295 }
  0xc6   : > { %2590 = vrot.lane.b32.xlu1 %v4351_v33, %s2727_s5  ;;  %v2298_v8 = vunpack.i.h.bf16 %v2296_v41  ;;  %v2297_v47 = vunpack.i.l.bf16 %v2296_v41  ;;  %v2228_v41 = vunpack.i.h.bf16 %v3498_v44  ;;  %v2227_v33 = vunpack.i.l.bf16 %v3498_v44 }
  0xc7   : > { %v1091_v3 = vsel %vm1067_vm5, %v1066_v28, %v2303_v10  ;;  %v1090_v56 = vsel %vm1067_vm5, %v1065_v1, %v2302_v34  ;;  %2585 = vrot.lane.b32.xlu0 %v2584_v31, %s2727_s5  ;;  %v2233_v31 = vunpack.i.h.bf16 %v3496_v38  ;;  %v2232_v10 = vunpack.i.l.bf16 %v3496_v38  ;;  %v4363_v34 = vld [vmem:[#allocation7_spill] sm:$0xff]  ;;  %v4364_v28 = vld [vmem:[#allocation49_spill] sm:$0xff] }
  0xc8   : > { %v3583_v9 = vpop.permute.xlu1 %2310  ;;  %v1088_v52 = vsel %vm1067_vm5, %v1063_v35, %v2297_v47  ;;  %v1089_v45 = vsel %vm1067_vm5, %v1064_v54, %v2298_v8  ;;  %v2639_v1 = vpack.i.bf16 %v4364_v28, %v4363_v34  ;;  %v2293_v8 = vunpack.i.h.bf16 %v3554_v25 }
  0xc9   : > { %v3587_v32 = vpop.permute.xlu0 %2305  ;;  %v2292_v47 = vunpack.i.l.bf16 %v3554_v25  ;;  %v4365_v35 = vpack.i.bf16 %v3297_v49, %v4356_v5  ;;  %v2288_v38 = vunpack.i.h.bf16 %v3556_v30  ;;  %v4367_v44 = vpack.i.bf16 %v4357_v0, %v4366_v60 }
  0xca   : > { %2600 = vrot.lane.b32.xlu1 %v4354_v50, %s2728_s6  ;;  %v1062_v25 = vsel %vm1042_vm4, %v4301_v13, %v2233_v31  ;;  %v1059_v30 = vsel %vm1042_vm4, %v4298_v51, %v2227_v33  ;;  %v4368_v51 = vld [vmem:[#allocation50_spill] sm:$0xff] }
  0xcb   : > { %2595 = vrot.lane.b32.xlu0 %v4355_v46, %s2728_s6  ;;  %v1061_v46 = vsel %vm1042_vm4, %v4334_v43, %v2232_v10  ;;  %v4369_v34 = vpack.i.bf16 %v4368_v51, %v3258_v63  ;;  %v4378_v51 = vld [vmem:[#allocation2_spill] sm:$0xff] }
  0xcc   : > { %v3595_v26 = vpop.permute.xlu1 %2320  ;;  %v1086_v0 = vsel %vm1067_vm5, %v1061_v46, %v2292_v47  ;;  %v2188_v46 = vunpack.i.h.bf16 %v3460_v15 }
  0xcd   : > { %v3597_v62 = vpop.permute.xlu0 %2315 }
  0xce   : > { %2610 = vrot.lane.b32.xlu1 %v4358_v58, %s2729_s7 }
  0xcf   : > { %2605 = vrot.lane.b32.xlu0 %v4359_v17, %s2729_s7  ;;  %v1060_v17 = vsel %vm1042_vm4, %v2955_v6, %v2228_v41  ;;  %v1084_v6 = vsel %vm1067_vm5, %v1059_v30, %v2287_v19  ;;  %v2252_v30 = vunpack.i.l.bf16 %v3518_v48 }
  0xd0   : > { %v3605_v61 = vpop.permute.xlu1 %2330  ;;  %v1085_v10 = vsel %vm1067_vm5, %v1060_v17, %v2288_v38 }
  0xd1   : > { %v3607_v22 = vpop.permute.xlu0 %2325 }
  0xd2   : > { %2620 = vrot.lane.b32.xlu1 %v4360_v24, %s2725_s24  ;;  %v1087_v24 = vsel %vm1067_vm5, %v1062_v25, %v2293_v8 }
  0xd3   : > { %2615 = vrot.lane.b32.xlu0 %v4362_v57, %s2725_s24 }
  0xd4   : > { %v3617_v20 = vpop.permute.xlu1 %2340 }
  0xd5   : > { %v3627_v54 = vpop.permute.xlu0 %2335 }
  0xd6   : > { %2630 = vrot.lane.b32.xlu1 %v4365_v35, %s2726_s27  ;;  %v4370_v35 = vpack.i.bf16 %v3345_v21, %v3339_v7 }
  0xd7   : > { %2625 = vrot.lane.b32.xlu0 %v4367_v44, %s2726_s27  ;;  %v4371_v44 = vpack.i.bf16 %v3348_v37, %v3294_v16  ;;  %v1445_v16 = vld [vmem:[%s4183_s2 + $0x8] sm:$0xff]  ;;  %v2193_v37 = vunpack.i.h.bf16 %v3476_v40 }
  0xd8   : > { %v2351_v50 = vpop.permute.xlu1 %2350 }
  0xd9   : > { %v2353_v58 = vunpack.i.h.bf16 %v2351_v50  ;;  %v2352_v5 = vunpack.i.l.bf16 %v2351_v50  ;;  %v2346_v2 = vpop.permute.xlu0 %2345 }
  0xda   : > { %2640 = vrot.lane.b32.xlu1 %v2639_v1, %s2727_s5  ;;  %v2348_v57 = vunpack.i.h.bf16 %v2346_v2  ;;  %v2347_v31 = vunpack.i.l.bf16 %v2346_v2 }
  0xdb   : > { %v3651_v13 = vsel %vm1092_vm6, %v1086_v0, %v2352_v5  ;;  %v3654_v43 = vsel %vm1092_vm6, %v1087_v24, %v2353_v58  ;;  %2635 = vrot.lane.b32.xlu0 %v4369_v34, %s2727_s5  ;;  %v2187_v58 = vunpack.i.l.bf16 %v3460_v15  ;;  %v1444_v15 = vld [vmem:[%s4183_s2] sm:$0xff]  ;;  %v2248_v24 = vunpack.i.h.bf16 %v3522_v18 }
  0xdc   : > { %v2361_v28 = vpop.permute.xlu1 %2360  ;;  %v3663_v1 = vsel %vm1092_vm6, %v1084_v6, %v2347_v31  ;;  %v3666_v41 = vsel %vm1092_vm6, %v1085_v10, %v2348_v57  ;;  %v2313_v0 = vunpack.i.h.bf16 %v3583_v9  ;;  %v4376_v57 = vld [vmem:[#allocation4_spill] sm:$0xff]  ;;  %v4379_v34 = vld [vmem:[#allocation6_spill] sm:$0xff] }
  0xdd   : > { %v2363_v33 = vunpack.i.h.bf16 %v2361_v28  ;;  %v2362_v8 = vunpack.i.l.bf16 %v2361_v28  ;;  %v2356_v47 = vpop.permute.xlu0 %2355  ;;  %v1044_v31 = vsel %vm1042_vm4, %v4376_v57, %v2188_v46  ;;  %v1446_v10 = vld [vmem:[%s4183_s2 + $0x10] sm:$0xff]  ;;  %v2308_v28 = vunpack.i.h.bf16 %v3587_v32 }
  0xde   : > { %2650 = vrot.lane.b32.xlu1 %v4370_v35, %s2728_s6  ;;  %v2358_v19 = vunpack.i.h.bf16 %v2356_v47  ;;  %v2357_v60 = vunpack.i.l.bf16 %v2356_v47 }
  0xdf   : > { %v3673_v38 = vsel %vm1092_vm6, %v1090_v56, %v2362_v8  ;;  %v3676_v63 = vsel %vm1092_vm6, %v1091_v3, %v2363_v33  ;;  %2645 = vrot.lane.b32.xlu0 %v4371_v44, %s2728_s6  ;;  %v4372_v3 = vld [vmem:[#allocation13_spill] sm:$0xff]  ;;  %v2307_v33 = vunpack.i.l.bf16 %v3587_v32 }
  0xe0   : > { %v2371_v50 = vpop.permute.xlu1 %2370  ;;  %v3683_v25 = vsel %vm1092_vm6, %v1088_v52, %v2357_v60  ;;  %v3686_v21 = vsel %vm1092_vm6, %v1089_v45, %v2358_v19  ;;  %v4373_v56 = vpack.i.bf16 %v3361_v59, %v4372_v3  ;;  %v2192_v52 = vunpack.i.l.bf16 %v3476_v40  ;;  %v4374_v45 = vld [vmem:[#allocation51_spill] sm:$0xff]  ;;  %v1447_v44 = vld [vmem:[%s4183_s2 + $0x18] sm:$0xff] }
  0xe1   : > { %v3688_v7 = vpop.permute.xlu0 %2365  ;;  %v4375_v5 = vpack.i.bf16 %v4374_v45, %v3297_v49  ;;  %v2253_v59 = vunpack.i.h.bf16 %v3518_v48  ;;  %v2247_v40 = vunpack.i.l.bf16 %v3522_v18  ;;  %v2312_v49 = vunpack.i.l.bf16 %v3583_v9  ;;  %v4377_v48 = vld [vmem:[#allocation3_spill] sm:$0xff]  ;;  %v1448_v45 = vld [vmem:[%s4183_s2 + $0x20] sm:$0xff] }
  0xe2   : > { %2660 = vrot.lane.b32.xlu1 %v4373_v56, %s2729_s7  ;;  %v1043_v6 = vsel %vm1042_vm4, %v4377_v48, %v2187_v58  ;;  %v1046_v18 = vsel %vm1042_vm4, %v4378_v51, %v2193_v37  ;;  %v1045_v9 = vsel %vm1042_vm4, %v4379_v34, %v2192_v52  ;;  %v2373_v19 = vunpack.i.h.bf16 %v2371_v50 }
  0xe3   : > { %2655 = vrot.lane.b32.xlu0 %v4375_v5, %s2729_s7  ;;  %v1070_v47 = vsel %vm1067_vm5, %v1045_v9, %v2252_v30  ;;  %v1071_v35 = vsel %vm1067_vm5, %v1046_v18, %v2253_v59  ;;  %v2372_v60 = vunpack.i.l.bf16 %v2371_v50  ;;  %v1068_v3 = vsel %vm1067_vm5, %v1043_v6, %v2247_v40  ;;  %v1450_v9 = vld [vmem:[%s4183_s2 + $0x30] sm:$0xff] }
  0xe4   : > { %v2381_v17 = vpop.permute.xlu1 %2380  ;;  %v1069_v56 = vsel %vm1067_vm5, %v1044_v31, %v2248_v24  ;;  %v1095_v46 = vsel %vm1092_vm6, %v1070_v47, %v2312_v49  ;;  %v1096_v32 = vsel %vm1092_vm6, %v1071_v35, %v2313_v0  ;;  %v2367_v37 = vunpack.i.l.bf16 %v3688_v7 }
  0xe5   : > { %v2376_v2 = vpop.permute.xlu0 %2375  ;;  %v2383_v52 = vunpack.i.h.bf16 %v2381_v17  ;;  %v2382_v50 = vunpack.i.l.bf16 %v2381_v17  ;;  %v1093_v5 = vsel %vm1092_vm6, %v1068_v3, %v2307_v33  ;;  %v1094_v59 = vsel %vm1092_vm6, %v1069_v56, %v2308_v28  ;;  %v1449_v17 = vld [vmem:[%s4183_s2 + $0x28] sm:$0xff]  ;;  %v1451_v56 = vld [vmem:[%s4183_s2 + $0x38] sm:$0xff] }
  0xe6   : > { %1475 = vperm.xlu1 %2665, %v1445_v16   ;;  %v2368_v16 = vunpack.i.h.bf16 %v3688_v7  ;;  %v2378_v30 = vunpack.i.h.bf16 %v2376_v2  ;;  %v1120_v40 = vsel %vm1117_vm7, %v1095_v46, %v2372_v60  ;;  %v1121_v0 = vsel %vm1117_vm7, %v1096_v32, %v2373_v19 }
  0xe7   : > { %1470 = vperm.xlu0 %2664, %v1444_v15   ;;  %v2377_v15 = vunpack.i.l.bf16 %v2376_v2  ;;  %v1118_v2 = vsel %vm1117_vm7, %v1093_v5, %v2367_v37  ;;  %v1145_v18 = vsel %vm1142_vm8, %v1120_v40, %v2382_v50  ;;  %v1146_v34 = vsel %vm1142_vm8, %v1121_v0, %v2383_v52 }
  0xe8   : > { %v2391_v8 = vpop.permute.xlu1 %2390  ;;  %v1119_v51 = vsel %vm1117_vm7, %v1094_v59, %v2368_v16  ;;  %v1452_v59 = vld [vmem:[%s4183_s2 + $0x40] sm:$0xff] }
  0xe9   : > { %v2386_v58 = vpop.permute.xlu0 %2385  ;;  %v2393_v49 = vunpack.i.h.bf16 %v2391_v8  ;;  %v2392_v7 = vunpack.i.l.bf16 %v2391_v8  ;;  %v1143_v28 = vsel %vm1142_vm8, %v1118_v2, %v2377_v15  ;;  %v1144_v33 = vsel %vm1142_vm8, %v1119_v51, %v2378_v30 }
  0xea   : > { %1480 = vperm.xlu1 %2665, %v1446_v10   ;;  %v2388_v57 = vunpack.i.h.bf16 %v2386_v58  ;;  %v2387_v31 = vunpack.i.l.bf16 %v2386_v58  ;;  %v2202_v2 = vunpack.i.l.bf16 %v3472_v42 }
  0xeb   : > { %1485 = vperm.xlu0 %2664, %v1447_v44   ;;  %v1170_v19 = vsel %vm1167_vm9, %v1145_v18, %v2392_v7  ;;  %v1171_v60 = vsel %vm1167_vm9, %v1146_v34, %v2393_v49  ;;  %v1453_v7 = vld [vmem:[%s4183_s2 + $0x48] sm:$0xff]  ;;  %v2263_v18 = vunpack.i.h.bf16 %v3526_v14  ;;  %v1455_v34 = vld [vmem:[%s4183_s2 + $0x58] sm:$0xff] }
  0xec   : > { %v2401_v24 = vpop.permute.xlu1 %2400  ;;  %v1168_v46 = vsel %vm1167_vm9, %v1143_v28, %v2387_v31  ;;  %v1169_v32 = vsel %vm1167_vm9, %v1144_v33, %v2388_v57  ;;  %v2198_v31 = vunpack.i.h.bf16 %v3458_v55  ;;  %v2323_v28 = vunpack.i.h.bf16 %v3595_v26 }
  0xed   : > { %v2403_v48 = vunpack.i.h.bf16 %v2401_v24  ;;  %v2402_v6 = vunpack.i.l.bf16 %v2401_v24  ;;  %v2396_v10 = vpop.permute.xlu0 %2395  ;;  %v2322_v33 = vunpack.i.l.bf16 %v3595_v26  ;;  %v2318_v26 = vunpack.i.h.bf16 %v3597_v62 }
  0xee   : > { %1490 = vperm.xlu1 %2665, %v1448_v45   ;;  %v2398_v8 = vunpack.i.h.bf16 %v2396_v10  ;;  %v2397_v47 = vunpack.i.l.bf16 %v2396_v10  ;;  %v2203_v10 = vunpack.i.h.bf16 %v3472_v42  ;;  %v2258_v42 = vunpack.i.h.bf16 %v3528_v27 }
  0xef   : > { %1495 = vperm.xlu0 %2664, %v1449_v17   ;;  %v1195_v58 = vsel %vm1192_vm10, %v1170_v19, %v2402_v6  ;;  %v1196_v16 = vsel %vm1192_vm10, %v1171_v60, %v2403_v48  ;;  %v2197_v48 = vunpack.i.l.bf16 %v3458_v55  ;;  %v1454_v6 = vld [vmem:[%s4183_s2 + $0x50] sm:$0xff]  ;;  %v2262_v55 = vunpack.i.l.bf16 %v3526_v14  ;;  %v1456_v60 = vld [vmem:[%s4183_s2 + $0x60] sm:$0xff] }
  0xf0   : > { %v2411_v35 = vpop.permute.xlu1 %2410  ;;  %v1193_v15 = vsel %vm1192_vm10, %v1168_v46, %v2397_v47  ;;  %v1194_v24 = vsel %vm1192_vm10, %v1169_v32, %v2398_v8  ;;  %v2669_v47 = vld [vmem:[%s2805_s13 + $0x30] sm:$0xff]  ;;  %v2317_v46 = vunpack.i.l.bf16 %v3597_v62 }
  0xf1   : > { %v2413_v44 = vunpack.i.h.bf16 %v2411_v35  ;;  %v2412_v3 = vunpack.i.l.bf16 %v2411_v35  ;;  %v2406_v37 = vpop.permute.xlu0 %2405  ;;  %v1048_v14 = vsel %vm1042_vm4, %v2669_v47, %v2198_v31  ;;  %v2670_v35 = vld [vmem:[%s2805_s13 + $0x28] sm:$0xff] }
  0xf2   : > { %1500 = vperm.xlu1 %2665, %v1450_v9   ;;  %v2408_v45 = vunpack.i.h.bf16 %v2406_v37  ;;  %v2407_v5 = vunpack.i.l.bf16 %v2406_v37  ;;  %v2257_v9 = vunpack.i.l.bf16 %v3528_v27  ;;  %v1047_v19 = vsel %vm1042_vm4, %v2670_v35, %v2197_v48  ;;  %v2672_v27 = vld [vmem:[%s2805_s13 + $0x40] sm:$0xff] }
  0xf3   : > { %v1220_v52 = vsel %vm1217_vm11, %v1195_v58, %v2412_v3  ;;  %v1221_v50 = vsel %vm1217_vm11, %v1196_v16, %v2413_v44  ;;  %1505 = vperm.xlu0 %2664, %v1451_v56   ;;  %v2671_v44 = vld [vmem:[%s2805_s13 + $0x48] sm:$0xff]  ;;  %v1049_v56 = vsel %vm1042_vm4, %v2672_v27, %v2202_v2  ;;  %v1460_v35 = vld [vmem:[%s4183_s2 + $0x80] sm:$0xff] }
  0xf4   : > { %v3771_v30 = vpop.permute.xlu1 %2420  ;;  %v1243_v40 = vpack.c.bf16 %v1221_v50, %v1220_v52  ;;  %v1218_v0 = vsel %vm1217_vm11, %v1193_v15, %v2407_v5  ;;  %v1219_v49 = vsel %vm1217_vm11, %v1194_v24, %v2408_v45  ;;  %v1050_v3 = vsel %vm1042_vm4, %v2671_v44, %v2203_v10  ;;  %v1457_v50 = vld [vmem:[%s4183_s2 + $0x68] sm:$0xff] }
  0xf5   : > { %v3780_v17 = vpop.permute.xlu0 %2415  ;;  %v1242_v57 = vpack.c.bf16 %v1219_v49, %v1218_v0  ;;  %v1075_v58 = vsel %vm1067_vm5, %v1050_v3, %v2263_v18  ;;  %v1074_v16 = vsel %vm1067_vm5, %v1049_v56, %v2262_v55  ;;  %v2423_v37 = vunpack.i.h.bf16 %v3771_v30  ;;  %v1458_v49 = vld [vmem:[%s4183_s2 + $0x70] sm:$0xff] }
  0xf6   : > { %1510 = vperm.xlu1 %2665, %v1452_v59   ;;  %v2422_v52 = vunpack.i.l.bf16 %v3771_v30  ;;  %v1073_v45 = vsel %vm1067_vm5, %v1048_v14, %v2258_v42  ;;  %v1072_v5 = vsel %vm1067_vm5, %v1047_v19, %v2257_v9  ;;  %v1099_v62 = vsel %vm1092_vm6, %v1074_v16, %v2322_v33 }
  0xf7   : > { %2099 = vmatprep.mubr.msk.bf16.mxu0 %vm1274_vm12, %v1242_v57  ;;  %1515 = vperm.xlu0 %2664, %v1453_v7   ;;  %v1100_v59 = vsel %vm1092_vm6, %v1075_v58, %v2323_v28  ;;  %v2418_v24 = vunpack.i.h.bf16 %v3780_v17  ;;  %v1097_v7 = vsel %vm1092_vm6, %v1072_v5, %v2317_v46  ;;  %v1098_v57 = vsel %vm1092_vm6, %v1073_v45, %v2318_v26  ;;  %v1461_v58 = vld [vmem:[%s4183_s2 + $0x88] sm:$0xff] }
  0xf8   : > { %v3790_v51 = vpop.permute.xlu1 %2430  ;;  %2100 = vmatmul.mubr.msk.bf16.vlgmr.msra.gmra.mxu0 %vm1274_vm12, %v1243_v40  ;;  %v2417_v40 = vunpack.i.l.bf16 %v3780_v17  ;;  %v1124_v10 = vsel %vm1117_vm7, %v1099_v62, %v2422_v52  ;;  %v1125_v17 = vsel %vm1117_vm7, %v1100_v59, %v2423_v37 }
  0xf9   : > { %v2426_v8 = vpop.permute.xlu0 %2425  ;;  %v2433_v30 = vunpack.i.h.bf16 %v3790_v51  ;;  %v2432_v0 = vunpack.i.l.bf16 %v3790_v51  ;;  %v1459_v51 = vld [vmem:[%s4183_s2 + $0x78] sm:$0xff] }
  0xfa   : > { %1520 = vperm.xlu1 %2665, %v1454_v6   ;;  %v2428_v31 = vunpack.i.h.bf16 %v2426_v8  ;;  %v2427_v48 = vunpack.i.l.bf16 %v2426_v8  ;;  %v1122_v33 = vsel %vm1117_vm7, %v1097_v7, %v2417_v40  ;;  %v1123_v8 = vsel %vm1117_vm7, %v1098_v57, %v2418_v24  ;;  %v1462_v24 = vld [vmem:[%s4183_s2 + $0x90] sm:$0xff] }
  0xfb   : > { %1525 = vperm.xlu0 %2664, %v1455_v34   ;;  %v1149_v47 = vsel %vm1142_vm8, %v1124_v10, %v2432_v0  ;;  %v1150_v14 = vsel %vm1142_vm8, %v1125_v17, %v2433_v30  ;;  %v2213_v10 = vunpack.i.h.bf16 %v3480_v23  ;;  %v2212_v17 = vunpack.i.l.bf16 %v3480_v23  ;;  %v1465_v23 = vld [vmem:[%s4183_s2 + $0xa8] sm:$0xff] }
  0xfc   : > { %v2441_v32 = vpop.permute.xlu1 %2440  ;;  %v1147_v19 = vsel %vm1142_vm8, %v1122_v33, %v2427_v48  ;;  %v2332_v33 = vunpack.i.l.bf16 %v3605_v61 }
  0xfd   : > { %v2436_v15 = vpop.permute.xlu0 %2435  ;;  %v2443_v2 = vunpack.i.h.bf16 %v2441_v32  ;;  %v2442_v18 = vunpack.i.l.bf16 %v2441_v32 }
  0xfe   : > { %1530 = vperm.xlu1 %2665, %v1456_v60   ;;  %v2438_v55 = vunpack.i.h.bf16 %v2436_v15  ;;  %v2437_v34 = vunpack.i.l.bf16 %v2436_v15  ;;  %v1148_v60 = vsel %vm1142_vm8, %v1123_v8, %v2428_v31  ;;  %v1463_v31 = vld [vmem:[%s4183_s2 + $0x98] sm:$0xff] }
  0xff   : > { %1535 = vperm.xlu0 %2664, %v1457_v50   ;;  %v1174_v56 = vsel %vm1167_vm9, %v1149_v47, %v2442_v18  ;;  %v1175_v26 = vsel %vm1167_vm9, %v1150_v14, %v2443_v2  ;;  %v1464_v2 = vld [vmem:[%s4183_s2 + $0xa0] sm:$0xff]  ;;  %v2208_v18 = vunpack.i.h.bf16 %v3482_v12  ;;  %v2673_v47 = vld [vmem:[%s2805_s13 + $0x70] sm:$0xff]  ;;  %v2674_v14 = vld [vmem:[%s2805_s13 + $0x68] sm:$0xff] }
 0x100   : > { %v2451_v6 = vpop.permute.xlu1 %2450  ;;  %v1172_v16 = vsel %vm1167_vm9, %v1147_v19, %v2437_v34  ;;  %v1173_v37 = vsel %vm1167_vm9, %v1148_v60, %v2438_v55  ;;  %v2273_v34 = vunpack.i.h.bf16 %v3534_v36  ;;  %v1466_v19 = vld [vmem:[%s4183_s2 + $0xb0] sm:$0xff]  ;;  %v2675_v60 = vld [vmem:[%s2805_s13 + $0x60] sm:$0xff] }
 0x101   : > { %v2453_v42 = vunpack.i.h.bf16 %v2451_v6  ;;  %v2452_v9 = vunpack.i.l.bf16 %v2451_v6  ;;  %v2446_v28 = vpop.permute.xlu0 %2445 }
 0x102   : > { %1540 = vperm.xlu1 %2665, %v1458_v49   ;;  %v2448_v44 = vunpack.i.h.bf16 %v2446_v28  ;;  %v2447_v3 = vunpack.i.l.bf16 %v2446_v28  ;;  %v2333_v28 = vunpack.i.h.bf16 %v3605_v61  ;;  %v2328_v61 = vunpack.i.h.bf16 %v3607_v22 }
 0x103   : > { %1545 = vperm.xlu0 %2664, %v1459_v51   ;;  %v1199_v52 = vsel %vm1192_vm10, %v1174_v56, %v2452_v9  ;;  %v1200_v50 = vsel %vm1192_vm10, %v1175_v26, %v2453_v42  ;;  %v2207_v51 = vunpack.i.l.bf16 %v3482_v12  ;;  %v2272_v42 = vunpack.i.l.bf16 %v3534_v36 }
 0x104   : > { %v2461_v27 = vpop.permute.xlu1 %2460  ;;  %v1197_v40 = vsel %vm1192_vm10, %v1172_v16, %v2447_v3  ;;  %v1198_v30 = vsel %vm1192_vm10, %v1173_v37, %v2448_v44  ;;  %v2268_v9 = vunpack.i.h.bf16 %v3536_v4  ;;  %v2267_v12 = vunpack.i.l.bf16 %v3536_v4  ;;  %v2676_v4 = vld [vmem:[%s2805_s13 + $0x50] sm:$0xff]  ;;  %v1467_v16 = vld [vmem:[%s4183_s2 + $0xb8] sm:$0xff] }
 0x105   : > { %v2463_v46 = vunpack.i.h.bf16 %v2461_v27  ;;  %v2462_v32 = vunpack.i.l.bf16 %v2461_v27  ;;  %v2456_v45 = vpop.permute.xlu0 %2455  ;;  %v1054_v36 = vsel %vm1042_vm4, %v2673_v47, %v2213_v10  ;;  %v1052_v44 = vsel %vm1042_vm4, %v2675_v60, %v2208_v18 }
 0x106   : > { %1550 = vperm.xlu1 %2665, %v1460_v35   ;;  %v2458_v59 = vunpack.i.h.bf16 %v2456_v45  ;;  %v2457_v15 = vunpack.i.l.bf16 %v2456_v45  ;;  %v1053_v35 = vsel %vm1042_vm4, %v2674_v14, %v2212_v17  ;;  %v1051_v3 = vsel %vm1042_vm4, %v2676_v4, %v2207_v51 }
 0x107   : > { %v1224_v5 = vsel %vm1217_vm11, %v1199_v52, %v2462_v32  ;;  %v1225_v62 = vsel %vm1217_vm11, %v1200_v50, %v2463_v46  ;;  %1555 = vperm.xlu0 %2664, %v1461_v58   ;;  %v2327_v27 = vunpack.i.l.bf16 %v3607_v22  ;;  %v1079_v26 = vsel %vm1067_vm5, %v1054_v36, %v2273_v34 }
 0x108   : > { %v3865_v0 = vpop.permute.xlu1 %2470  ;;  %v1245_v49 = vpack.c.bf16 %v1225_v62, %v1224_v5  ;;  %v1222_v7 = vsel %vm1217_vm11, %v1197_v40, %v2457_v15  ;;  %v1223_v57 = vsel %vm1217_vm11, %v1198_v30, %v2458_v59  ;;  %v1078_v46 = vsel %vm1067_vm5, %v1053_v35, %v2272_v42 }
 0x109   : > { %v1244_v48 = vpack.c.bf16 %v1223_v57, %v1222_v7  ;;  %v3872_v6 = vpop.permute.xlu0 %2465  ;;  %v2473_v32 = vunpack.i.h.bf16 %v3865_v0  ;;  %v2472_v58 = vunpack.i.l.bf16 %v3865_v0  ;;  %v1076_v37 = vsel %vm1067_vm5, %v1051_v3, %v2267_v12 }
 0x10a   : > { %1560 = vperm.xlu1 %2665, %v1462_v24   ;;  %v1077_v52 = vsel %vm1067_vm5, %v1052_v44, %v2268_v9  ;;  %v1103_v22 = vsel %vm1092_vm6, %v1078_v46, %v2332_v33  ;;  %v1104_v50 = vsel %vm1092_vm6, %v1079_v26, %v2333_v28  ;;  %v2468_v5 = vunpack.i.h.bf16 %v3872_v6 }
 0x10b   : > { %2103 = vmatprep.mubr.msk.bf16.mxu0 %vm1274_vm12, %v1244_v48  ;;  %1565 = vperm.xlu0 %2664, %v1463_v31   ;;  %v2467_v62 = vunpack.i.l.bf16 %v3872_v6  ;;  %v1101_v24 = vsel %vm1092_vm6, %v1076_v37, %v2327_v27  ;;  %v1102_v40 = vsel %vm1092_vm6, %v1077_v52, %v2328_v61  ;;  %v1128_v7 = vsel %vm1117_vm7, %v1103_v22, %v2472_v58 }
 0x10c   : > { %v2481_v55 = vpop.permute.xlu1 %2480  ;;  %2104 = vmatmul.mubr.msk.bf16.gmra.mxu0 %vm1274_vm12, %v1245_v49  ;;  %v1129_v57 = vsel %vm1117_vm7, %v1104_v50, %v2473_v32  ;;  %v2223_v50 = vunpack.i.h.bf16 %v3488_v53 }
 0x10d   : > { %v2476_v8 = vpop.permute.xlu0 %2475  ;;  %v2483_v59 = vunpack.i.h.bf16 %v2481_v55  ;;  %v2482_v15 = vunpack.i.l.bf16 %v2481_v55  ;;  %v1126_v51 = vsel %vm1117_vm7, %v1101_v24, %v2467_v62  ;;  %v1127_v55 = vsel %vm1117_vm7, %v1102_v40, %v2468_v5 }
 0x10e   : > { %1570 = vperm.xlu1 %2665, %v1464_v2   ;;  %v2478_v30 = vunpack.i.h.bf16 %v2476_v8  ;;  %v2477_v0 = vunpack.i.l.bf16 %v2476_v8  ;;  %v2218_v5 = vunpack.i.h.bf16 %v3490_v11  ;;  %v2217_v62 = vunpack.i.l.bf16 %v3490_v11  ;;  %v2677_v11 = vld [vmem:[%s2805_s13 + $0xa0] sm:$0xff] }
 0x10f   : > { %1575 = vperm.xlu0 %2664, %v1465_v23   ;;  %v1153_v34 = vsel %vm1142_vm8, %v1128_v7, %v2482_v15  ;;  %v1154_v42 = vsel %vm1142_vm8, %v1129_v57, %v2483_v59  ;;  %v2283_v15 = vunpack.i.h.bf16 %v3542_v29  ;;  %v2282_v24 = vunpack.i.l.bf16 %v3542_v29  ;;  %v2678_v57 = vld [vmem:[%s2805_s13 + $0x90] sm:$0xff] }
 0x110   : > { %v2491_v56 = vpop.permute.xlu1 %2490  ;;  %v1151_v23 = vsel %vm1142_vm8, %v1126_v51, %v2477_v0  ;;  %v1152_v9 = vsel %vm1142_vm8, %v1127_v55, %v2478_v30  ;;  %v2278_v40 = vunpack.i.h.bf16 %v3544_v39  ;;  %v2277_v30 = vunpack.i.l.bf16 %v3544_v39 }
 0x111   : > { %v2486_v45 = vpop.permute.xlu0 %2485  ;;  %v2493_v31 = vunpack.i.h.bf16 %v2491_v56  ;;  %v2492_v48 = vunpack.i.l.bf16 %v2491_v56  ;;  %v2342_v0 = vunpack.i.l.bf16 %v3617_v20  ;;  %v1058_v7 = vsel %vm1042_vm4, %v2677_v11, %v2223_v50 }
 0x112   : > { %1580 = vperm.xlu1 %2665, %v1466_v19   ;;  %v2488_v10 = vunpack.i.h.bf16 %v2486_v45  ;;  %v2487_v17 = vunpack.i.l.bf16 %v2486_v45  ;;  %v2222_v45 = vunpack.i.l.bf16 %v3488_v53  ;;  %v2343_v53 = vunpack.i.h.bf16 %v3617_v20 }
 0x113   : > { %1585 = vperm.xlu0 %2664, %v1467_v16   ;;  %v1178_v8 = vsel %vm1167_vm9, %v1153_v34, %v2492_v48  ;;  %v1179_v47 = vsel %vm1167_vm9, %v1154_v42, %v2493_v31  ;;  %v2679_v48 = vld [vmem:[%s2805_s13 + $0x88] sm:$0xff]  ;;  %v2337_v39 = vunpack.i.l.bf16 %v3627_v54  ;;  %v1083_v20 = vsel %vm1067_vm5, %v1058_v7, %v2283_v15 }
 0x114   : > { %v2501_v49 = vpop.permute.xlu1 %2500  ;;  %v1176_v35 = vsel %vm1167_vm9, %v1151_v23, %v2487_v17  ;;  %v1177_v19 = vsel %vm1167_vm9, %v1152_v9, %v2488_v10  ;;  %v1057_v31 = vsel %vm1042_vm4, %v2678_v57, %v2222_v45  ;;  %v1056_v29 = vsel %vm1042_vm4, %v2679_v48, %v2218_v5  ;;  %v2680_v10 = vld [vmem:[%s2805_s13 + $0x80] sm:$0xff] }
 0x115   : > { %v2503_v2 = vunpack.i.h.bf16 %v2501_v49  ;;  %v2502_v6 = vunpack.i.l.bf16 %v2501_v49  ;;  %v2496_v18 = vpop.permute.xlu0 %2495  ;;  %v1055_v17 = vsel %vm1042_vm4, %v2680_v10, %v2217_v62  ;;  %v1081_v42 = vsel %vm1067_vm5, %v1056_v29, %v2278_v40 }
 0x116   : > { %v2498_v12 = vunpack.i.h.bf16 %v2496_v18  ;;  %v2497_v28 = vunpack.i.l.bf16 %v2496_v18  ;;  %v1082_v18 = vsel %vm1067_vm5, %v1057_v31, %v2282_v24  ;;  %v1080_v34 = vsel %vm1067_vm5, %v1055_v17, %v2277_v30 }
 0x117   : > { %v1203_v60 = vsel %vm1192_vm10, %v1178_v8, %v2502_v6  ;;  %v1204_v44 = vsel %vm1192_vm10, %v1179_v47, %v2503_v2  ;;  %v2338_v2 = vunpack.i.h.bf16 %v3627_v54  ;;  %v1107_v23 = vsel %vm1092_vm6, %v1082_v18, %v2342_v0 }
 0x118   : > { %v2511_v33 = vpop.permute.xlu1 %2510  ;;  %v1201_v26 = vsel %vm1192_vm10, %v1176_v35, %v2497_v28  ;;  %v1202_v46 = vsel %vm1192_vm10, %v1177_v19, %v2498_v12  ;;  %v1108_v9 = vsel %vm1092_vm6, %v1083_v20, %v2343_v53  ;;  %v1105_v47 = vsel %vm1092_vm6, %v1080_v34, %v2337_v39 }
 0x119   : > { %v2513_v36 = vunpack.i.h.bf16 %v2511_v33  ;;  %v2512_v14 = vunpack.i.l.bf16 %v2511_v33  ;;  %v2506_v4 = vpop.permute.xlu0 %2505 }
 0x11a   : > { %v2508_v27 = vunpack.i.h.bf16 %v2506_v4  ;;  %v2507_v56 = vunpack.i.l.bf16 %v2506_v4 }
 0x11b   : > { %v1228_v3 = vsel %vm1217_vm11, %v1203_v60, %v2512_v14  ;;  %v1229_v61 = vsel %vm1217_vm11, %v1204_v44, %v2513_v36  ;;  %v1106_v36 = vsel %vm1092_vm6, %v1081_v42, %v2338_v2 }
 0x11c   : > { %v2521_v32 = vpop.permute.xlu1 %2520  ;;  %v1247_v58 = vpack.c.bf16 %v1229_v61, %v1228_v3  ;;  %v1226_v16 = vsel %vm1217_vm11, %v1201_v26, %v2507_v56  ;;  %v1227_v37 = vsel %vm1217_vm11, %v1202_v46, %v2508_v27 }
 0x11d   : > { %v1246_v52 = vpack.c.bf16 %v1227_v37, %v1226_v16  ;;  %v2516_v22 = vpop.permute.xlu0 %2515  ;;  %v2523_v51 = vunpack.i.h.bf16 %v2521_v32  ;;  %v2522_v55 = vunpack.i.l.bf16 %v2521_v32 }
 0x11e   : > { %v2518_v28 = vunpack.i.h.bf16 %v2516_v22  ;;  %v2517_v33 = vunpack.i.l.bf16 %v2516_v22 }
 0x11f   : > { %2107 = vmatprep.mubr.msk.bf16.mxu0 %vm1274_vm12, %v1246_v52  ;;  %v1132_v60 = vsel %vm1117_vm7, %v1107_v23, %v2522_v55  ;;  %v1133_v44 = vsel %vm1117_vm7, %v1108_v9, %v2523_v51 }
 0x120   : > { %v2531_v59 = vpop.permute.xlu1 %2530  ;;  %2108 = vmatmul.mubr.msk.bf16.gmra.mxu0 %vm1274_vm12, %v1247_v58  ;;  %v1130_v32 = vsel %vm1117_vm7, %v1105_v47, %v2517_v33  ;;  %v1131_v58 = vsel %vm1117_vm7, %v1106_v36, %v2518_v28 }
 0x121   : > { %v2526_v49 = vpop.permute.xlu0 %2525  ;;  %v2533_v8 = vunpack.i.h.bf16 %v2531_v59  ;;  %v2532_v54 = vunpack.i.l.bf16 %v2531_v59 }
 0x122   : > { %v2528_v14 = vunpack.i.h.bf16 %v2526_v49  ;;  %v2527_v35 = vunpack.i.l.bf16 %v2526_v49 }
 0x123   : > { %v1157_v16 = vsel %vm1142_vm8, %v1132_v60, %v2532_v54  ;;  %v1158_v37 = vsel %vm1142_vm8, %v1133_v44, %v2533_v8 }
 0x124   : > { %v2541_v6 = vpop.permute.xlu1 %2540  ;;  %v1155_v52 = vsel %vm1142_vm8, %v1130_v32, %v2527_v35  ;;  %v1156_v22 = vsel %vm1142_vm8, %v1131_v58, %v2528_v14 }
 0x125   : > { %v2536_v12 = vpop.permute.xlu0 %2535  ;;  %v2543_v4 = vunpack.i.h.bf16 %v2541_v6  ;;  %v2542_v3 = vunpack.i.l.bf16 %v2541_v6 }
 0x126   : > { %v2538_v61 = vunpack.i.h.bf16 %v2536_v12  ;;  %v2537_v27 = vunpack.i.l.bf16 %v2536_v12 }
 0x127   : > { %v1182_v62 = vsel %vm1167_vm9, %v1157_v16, %v2542_v3  ;;  %v1183_v59 = vsel %vm1167_vm9, %v1158_v37, %v2543_v4 }
 0x128   : > { %v2551_v19 = vpop.permute.xlu1 %2550  ;;  %v1180_v40 = vsel %vm1167_vm9, %v1155_v52, %v2537_v27  ;;  %v1181_v30 = vsel %vm1167_vm9, %v1156_v22, %v2538_v61 }
 0x129   : > { %v2553_v56 = vunpack.i.h.bf16 %v2551_v19  ;;  %v2552_v26 = vunpack.i.l.bf16 %v2551_v19  ;;  %v2546_v46 = vpop.permute.xlu0 %2545 }
 0x12a   : > { %v2548_v50 = vunpack.i.h.bf16 %v2546_v46  ;;  %v2547_v45 = vunpack.i.l.bf16 %v2546_v46 }
 0x12b   : > { %v1207_v53 = vsel %vm1192_vm10, %v1182_v62, %v2552_v26  ;;  %v1208_v0 = vsel %vm1192_vm10, %v1183_v59, %v2553_v56 }
 0x12c   : > { %v2561_v5 = vpop.permute.xlu1 %2560  ;;  %v1205_v29 = vsel %vm1192_vm10, %v1180_v40, %v2547_v45  ;;  %v1206_v10 = vsel %vm1192_vm10, %v1181_v30, %v2548_v50 }
 0x12d   : > { %v2563_v15 = vunpack.i.h.bf16 %v2561_v5  ;;  %v2562_v24 = vunpack.i.l.bf16 %v2561_v5  ;;  %v2556_v49 = vpop.permute.xlu0 %2555 }
 0x12e   : > { %v2558_v57 = vunpack.i.h.bf16 %v2556_v49  ;;  %v2557_v31 = vunpack.i.l.bf16 %v2556_v49 }
 0x12f   : > { %v1232_v11 = vsel %vm1217_vm11, %v1207_v53, %v2562_v24  ;;  %v1233_v7 = vsel %vm1217_vm11, %v1208_v0, %v2563_v15 }
 0x130   : > { %v2571_v48 = vpop.permute.xlu1 %2570  ;;  %v1249_v17 = vpack.c.bf16 %v1233_v7, %v1232_v11  ;;  %v1230_v2 = vsel %vm1217_vm11, %v1205_v29, %v2557_v31  ;;  %v1231_v39 = vsel %vm1217_vm11, %v1206_v10, %v2558_v57 }
 0x131   : > { %v2566_v6 = vpop.permute.xlu0 %2565  ;;  %v1248_v20 = vpack.c.bf16 %v1231_v39, %v1230_v2  ;;  %v2573_v34 = vunpack.i.h.bf16 %v2571_v48  ;;  %v2572_v42 = vunpack.i.l.bf16 %v2571_v48 }
 0x132   : > { %v2568_v9 = vunpack.i.h.bf16 %v2566_v6  ;;  %v2567_v12 = vunpack.i.l.bf16 %v2566_v6 }
 0x133   : > { %2111 = vmatprep.mubr.msk.bf16.mxu1 %vm1274_vm12, %v1248_v20  ;;  %v1136_v36 = vsel %vm1117_vm7, %v3651_v13, %v2572_v42  ;;  %v1137_v14 = vsel %vm1117_vm7, %v3654_v43, %v2573_v34 }
 0x134   : > { %v2581_v18 = vpop.permute.xlu1 %2580  ;;  %2112 = vmatmul.mubr.msk.bf16.vlgmr.msra.gmra.mxu1 %vm1274_vm12, %v1249_v17  ;;  %v1134_v27 = vsel %vm1117_vm7, %v3663_v1, %v2567_v12  ;;  %v1135_v56 = vsel %vm1117_vm7, %v3666_v41, %v2568_v9 }
 0x135   : > { %v2576_v51 = vpop.permute.xlu0 %2575  ;;  %v2583_v28 = vunpack.i.h.bf16 %v2581_v18  ;;  %v2582_v33 = vunpack.i.l.bf16 %v2581_v18 }
 0x136   : > { %v2578_v8 = vunpack.i.h.bf16 %v2576_v51  ;;  %v2577_v54 = vunpack.i.l.bf16 %v2576_v51 }
 0x137   : > { %v1161_v26 = vsel %vm1142_vm8, %v1136_v36, %v2582_v33  ;;  %v1162_v13 = vsel %vm1142_vm8, %v1137_v14, %v2583_v28 }
 0x138   : > { %v2591_v55 = vpop.permute.xlu1 %2590  ;;  %v1159_v46 = vsel %vm1142_vm8, %v1134_v27, %v2577_v54  ;;  %v1160_v43 = vsel %vm1142_vm8, %v1135_v56, %v2578_v8 }
 0x139   : > { %v2586_v23 = vpop.permute.xlu0 %2585  ;;  %v2593_v35 = vunpack.i.h.bf16 %v2591_v55  ;;  %v2592_v19 = vunpack.i.l.bf16 %v2591_v55 }
 0x13a   : > { %v2588_v60 = vunpack.i.h.bf16 %v2586_v23  ;;  %v2587_v44 = vunpack.i.l.bf16 %v2586_v23 }
 0x13b   : > { %v1186_v37 = vsel %vm1167_vm9, %v1161_v26, %v2592_v19  ;;  %v1187_v52 = vsel %vm1167_vm9, %v1162_v13, %v2593_v35 }
 0x13c   : > { %v2601_v47 = vpop.permute.xlu1 %2600  ;;  %v1184_v50 = vsel %vm1167_vm9, %v1159_v46, %v2587_v44  ;;  %v1185_v41 = vsel %vm1167_vm9, %v1160_v43, %v2588_v60 }
 0x13d   : > { %v2603_v4 = vunpack.i.h.bf16 %v2601_v47  ;;  %v2602_v3 = vunpack.i.l.bf16 %v2601_v47  ;;  %v2596_v61 = vpop.permute.xlu0 %2595 }
 0x13e   : > { %v2598_v32 = vunpack.i.h.bf16 %v2596_v61  ;;  %v2597_v58 = vunpack.i.l.bf16 %v2596_v61 }
 0x13f   : > { %v1211_v45 = vsel %vm1192_vm10, %v1186_v37, %v2602_v3  ;;  %v1212_v5 = vsel %vm1192_vm10, %v1187_v52, %v2603_v4 }
 0x140   : > { %v2611_v16 = vpop.permute.xlu1 %2610  ;;  %v1209_v30 = vsel %vm1192_vm10, %v1184_v50, %v2597_v58  ;;  %v1210_v53 = vsel %vm1192_vm10, %v1185_v41, %v2598_v32 }
 0x141   : > { %v2613_v22 = vunpack.i.h.bf16 %v2611_v16  ;;  %v2612_v1 = vunpack.i.l.bf16 %v2611_v16  ;;  %v2606_v62 = vpop.permute.xlu0 %2605 }
 0x142   : > { %v2608_v24 = vunpack.i.h.bf16 %v2606_v62  ;;  %v2607_v40 = vunpack.i.l.bf16 %v2606_v62 }
 0x143   : > { %v1236_v59 = vsel %vm1217_vm11, %v1211_v45, %v2612_v1  ;;  %v1237_v15 = vsel %vm1217_vm11, %v1212_v5, %v2613_v22 }
 0x144   : > { %v1251_v0 = vpack.c.bf16 %v1237_v15, %v1236_v59  ;;  %v2621_v49 = vpop.permute.xlu1 %2620  ;;  %v1234_v11 = vsel %vm1217_vm11, %v1209_v30, %v2607_v40  ;;  %v1235_v7 = vsel %vm1217_vm11, %v1210_v53, %v2608_v24 }
 0x145   : > { %v1250_v57 = vpack.c.bf16 %v1235_v7, %v1234_v11  ;;  %v2616_v31 = vpop.permute.xlu0 %2615  ;;  %v2623_v17 = vunpack.i.h.bf16 %v2621_v49  ;;  %v2622_v2 = vunpack.i.l.bf16 %v2621_v49 }
 0x146   : > { %v2618_v6 = vunpack.i.h.bf16 %v2616_v31  ;;  %v2617_v20 = vunpack.i.l.bf16 %v2616_v31 }
 0x147   : > { %2115 = vmatprep.mubr.msk.bf16.mxu1 %vm1274_vm12, %v1250_v57  ;;  %v1140_v23 = vsel %vm1117_vm7, %v3673_v38, %v2622_v2  ;;  %v1141_v9 = vsel %vm1117_vm7, %v3676_v63, %v2623_v17 }
 0x148   : > { %v2631_v48 = vpop.permute.xlu1 %2630  ;;  %2116 = vmatmul.mubr.msk.bf16.gmra.mxu1 %vm1274_vm12, %v1251_v0  ;;  %v1138_v14 = vsel %vm1117_vm7, %v3683_v25, %v2617_v20  ;;  %v1139_v35 = vsel %vm1117_vm7, %v3686_v21, %v2618_v6 }
 0x149   : > { %v2626_v29 = vpop.permute.xlu0 %2625  ;;  %v2633_v18 = vunpack.i.h.bf16 %v2631_v48  ;;  %v2632_v51 = vunpack.i.l.bf16 %v2631_v48 }
 0x14a   : > { %v2628_v55 = vunpack.i.h.bf16 %v2626_v29  ;;  %v2627_v34 = vunpack.i.l.bf16 %v2626_v29 }
 0x14b   : > { %v1165_v19 = vsel %vm1142_vm8, %v1140_v23, %v2632_v51  ;;  %v1166_v38 = vsel %vm1142_vm8, %v1141_v9, %v2633_v18 }
 0x14c   : > { %v2641_v10 = vpop.permute.xlu1 %2640  ;;  %v1163_v60 = vsel %vm1142_vm8, %v1138_v14, %v2627_v34  ;;  %v1164_v63 = vsel %vm1142_vm8, %v1139_v35, %v2628_v55 }
 0x14d   : > { %v2636_v39 = vpop.permute.xlu0 %2635  ;;  %v2643_v12 = vunpack.i.h.bf16 %v2641_v10  ;;  %v2642_v28 = vunpack.i.l.bf16 %v2641_v10 }
 0x14e   : > { %v2638_v33 = vunpack.i.h.bf16 %v2636_v39  ;;  %v2637_v8 = vunpack.i.l.bf16 %v2636_v39 }
 0x14f   : > { %v1190_v61 = vsel %vm1167_vm9, %v1165_v19, %v2642_v28  ;;  %v1191_v27 = vsel %vm1167_vm9, %v1166_v38, %v2643_v12 }
 0x150   : > { %v2651_v42 = vpop.permute.xlu1 %2650  ;;  %v1188_v26 = vsel %vm1167_vm9, %v1163_v60, %v2637_v8  ;;  %v1189_v21 = vsel %vm1167_vm9, %v1164_v63, %v2638_v33 }
 0x151   : > { %v2653_v54 = vunpack.i.h.bf16 %v2651_v42  ;;  %v2652_v47 = vunpack.i.l.bf16 %v2651_v42  ;;  %v2646_v36 = vpop.permute.xlu0 %2645 }
 0x152   : > { %v2648_v44 = vunpack.i.h.bf16 %v2646_v36  ;;  %v2647_v4 = vunpack.i.l.bf16 %v2646_v36 }
 0x153   : > { %v1215_v13 = vsel %vm1192_vm10, %v1190_v61, %v2652_v47  ;;  %v1216_v46 = vsel %vm1192_vm10, %v1191_v27, %v2653_v54 }
 0x154   : > { %v2661_v3 = vpop.permute.xlu1 %2660  ;;  %v1213_v52 = vsel %vm1192_vm10, %v1188_v26, %v2647_v4  ;;  %v1214_v22 = vsel %vm1192_vm10, %v1189_v21, %v2648_v44 }
 0x155   : > { %v2663_v56 = vunpack.i.h.bf16 %v2661_v3  ;;  %v2662_v25 = vunpack.i.l.bf16 %v2661_v3  ;;  %v2656_v43 = vpop.permute.xlu0 %2655 }
 0x156   : > { %v2658_v16 = vunpack.i.h.bf16 %v2656_v43  ;;  %v2657_v37 = vunpack.i.l.bf16 %v2656_v43 }
 0x157   : > { %v1240_v32 = vsel %vm1217_vm11, %v1215_v13, %v2662_v25  ;;  %v1241_v58 = vsel %vm1217_vm11, %v1216_v46, %v2663_v56 }
 0x158   : > { %v1253_v1 = vpack.c.bf16 %v1241_v58, %v1240_v32  ;;  %v1238_v50 = vsel %vm1217_vm11, %v1213_v52, %v2657_v37  ;;  %v1239_v41 = vsel %vm1217_vm11, %v1214_v22, %v2658_v16 }
 0x159   : > { %v1252_v45 = vpack.c.bf16 %v1239_v41, %v1238_v50 }
 0x15b   : > { %2119 = vmatprep.mubr.msk.bf16.mxu1 %vm1274_vm12, %v1252_v45 }
 0x15c   : > { %2120 = vmatmul.mubr.msk.bf16.gmra.mxu1 %vm1274_vm12, %v1253_v1 }
 0x161   : > { %v1476_v5 = vpop.permute.xlu1 %1475 }
 0x162   : > { %v1471_v62 = vpop.permute.xlu0 %1470 }
 0x165   : > { %v1481_v24 = vpop.permute.xlu1 %1480 }
 0x166   : > { %v1486_v0 = vpop.permute.xlu0 %1485 }
 0x169   : > { %v1491_v21 = vpop.permute.xlu1 %1490 }
 0x16a   : > { %v1496_v46 = vpop.permute.xlu0 %1495 }
 0x16d   : > { %v1501_v58 = vpop.permute.xlu1 %1500 }
 0x16e   : > { %v1506_v41 = vpop.permute.xlu0 %1505 }
 0x1b8   : > { %v2101_v59 = vpop.f32.mrf.mxu0 }
 0x1b9   : > { %v2056_v15 = vpack.c.bf16 %v2101_v59, %v2101_v59  ;;  %v1590_v11 = vmul.f32 %v2101_v59, %v1481_v24  ;;  %v1511_v24 = vpop.permute.xlu1 %1510 }
 0x1ba   : > { %v1349_v40 = vpop.f32.mrf.mxu0 }
 0x1bb   : > { %1855 = vst.msk [vmem:[%s2800_s11 + $0x8] sm:$0xf] %vm1852_vm13, %v2056_v15  ;;  %v1588_v30 = vmul.f32 %v1471_v62, %v1349_v40  ;;  %v2054_v53 = vpack.c.bf16 %v1349_v40, %v1349_v40  ;;  %v1667_v17 = vmul.f32 %v2101_v59, %v1590_v11  ;;  %v1615_v18 = vsel %vm1067_vm5, %v1590_v11, 0.0 }
 0x1bc   : > { %v2102_v49 = vpop.f32.mrf.mxu0 }
 0x1bd   : > { %1853 = vst.msk [vmem:[%s2800_s11] sm:$0xf] %vm1852_vm13, %v2054_v53  ;;  %v2057_v7 = vpack.c.bf16 %v2102_v49, %v2102_v49  ;;  %v1665_v31 = vmul.f32 %v1588_v30, %v1349_v40  ;;  %v1591_v48 = vmul.f32 %v2102_v49, %v1486_v0  ;;  %v1612_v2 = vsel %vm1067_vm5, %v1588_v30, 0.0 }
 0x1be   : > { %v1352_v57 = vpop.f32.mrf.mxu0  ;;  %v1692_v9 = vsel %vm1067_vm5, %v1667_v17, 0.0 }
 0x1bf   : > { %v1589_v29 = vmul.f32 %v1476_v5, %v1352_v57  ;;  %1856 = vst.msk [vmem:[%s2800_s11 + $0xc] sm:$0xf] %vm1852_vm13, %v2057_v7  ;;  %v2055_v10 = vpack.c.bf16 %v1352_v57, %v1352_v57  ;;  %v1689_v51 = vsel %vm1067_vm5, %v1665_v31, 0.0  ;;  %v1668_v55 = vmul.f32 %v2102_v49, %v1591_v48  ;;  %v1516_v7 = vpop.permute.xlu0 %1515 }
 0x1c0   : > { %v1617_v12 = vsel %vm1067_vm5, %v1591_v48, 0.0 }
 0x1c1   : > { %v1613_v39 = vsel %vm1067_vm5, %v1589_v29, 0.0  ;;  %v1666_v6 = vmul.f32 %v1589_v29, %v1352_v57  ;;  %1854 = vst.msk [vmem:[%s2800_s11 + $0x4] sm:$0xf] %vm1852_vm13, %v2055_v10  ;;  %v1694_v8 = vsel %vm1067_vm5, %v1668_v55, 0.0 }
 0x1c2   : > { %v1614_v20 = vadd.f32 %v1613_v39, %v1612_v2 }
 0x1c3   : > { %v1690_v34 = vsel %vm1067_vm5, %v1666_v6, 0.0 }
 0x1c4   : > { %v1616_v42 = vadd.f32 %v1615_v18, %v1614_v20  ;;  %v1691_v23 = vadd.f32 %v1690_v34, %v1689_v51  ;;  %v1521_v18 = vpop.permute.xlu1 %1520 }
 0x1c6   : > { %v1693_v28 = vadd.f32 %v1692_v9, %v1691_v23  ;;  %v1618_v33 = vadd.f32 %v1617_v12, %v1616_v42  ;;  %v1526_v23 = vpop.permute.xlu0 %1525 }
 0x1c8   : > { %v1695_v54 = vadd.f32 %v1694_v8, %v1693_v28 }
 0x1cc   : > { %v2105_v47 = vpop.f32.mrf.mxu0 }
 0x1cd   : > { %v2060_v36 = vpack.c.bf16 %v2105_v47, %v2105_v47  ;;  %v1594_v52 = vmul.f32 %v2105_v47, %v1501_v58 }
 0x1ce   : > { %v1365_v14 = vpop.f32.mrf.mxu0 }
 0x1cf   : > { %1859 = vst.msk [vmem:[%s2800_s11 + $0x18] sm:$0xf] %vm1852_vm13, %v2060_v36  ;;  %v2058_v35 = vpack.c.bf16 %v1365_v14, %v1365_v14  ;;  %v1592_v13 = vmul.f32 %v1491_v21, %v1365_v14  ;;  %v1671_v30 = vmul.f32 %v2105_v47, %v1594_v52  ;;  %v1623_v31 = vsel %vm1067_vm5, %v1594_v52, 0.0 }
 0x1d0   : > { %v2106_v19 = vpop.f32.mrf.mxu0 }
 0x1d1   : > { %1857 = vst.msk [vmem:[%s2800_s11 + $0x10] sm:$0xf] %vm1852_vm13, %v2058_v35  ;;  %v2061_v38 = vpack.c.bf16 %v2106_v19, %v2106_v19  ;;  %v1669_v32 = vmul.f32 %v1592_v13, %v1365_v14  ;;  %v1619_v16 = vsel %vm1067_vm5, %v1592_v13, 0.0  ;;  %v1595_v53 = vmul.f32 %v2106_v19, %v1506_v41  ;;  %v1531_v35 = vpop.permute.xlu1 %1530 }
 0x1d2   : > { %v1368_v60 = vpop.f32.mrf.mxu0  ;;  %v1620_v50 = vadd.f32 %v1619_v16, %v1618_v33  ;;  %v1700_v2 = vsel %vm1067_vm5, %v1671_v30, 0.0 }
 0x1d3   : > { %1860 = vst.msk [vmem:[%s2800_s11 + $0x1c] sm:$0xf] %vm1852_vm13, %v2061_v38  ;;  %v2059_v63 = vpack.c.bf16 %v1368_v60, %v1368_v60  ;;  %v1593_v43 = vmul.f32 %v1496_v46, %v1368_v60  ;;  %v1696_v22 = vsel %vm1067_vm5, %v1669_v32, 0.0  ;;  %v1672_v39 = vmul.f32 %v2106_v19, %v1595_v53 }
 0x1d4   : > { %v1697_v59 = vadd.f32 %v1696_v22, %v1695_v54  ;;  %v1625_v55 = vsel %vm1067_vm5, %v1595_v53, 0.0 }
 0x1d5   : > { %1858 = vst.msk [vmem:[%s2800_s11 + $0x14] sm:$0xf] %vm1852_vm13, %v2059_v63  ;;  %v1670_v37 = vmul.f32 %v1593_v43, %v1368_v60  ;;  %v1621_v1 = vsel %vm1067_vm5, %v1593_v43, 0.0  ;;  %v1702_v12 = vsel %vm1067_vm5, %v1672_v39, 0.0  ;;  %v1541_v43 = vpop.permute.xlu1 %1540 }
 0x1d6   : > { %v1622_v15 = vadd.f32 %v1621_v1, %v1620_v50 }
 0x1d7   : > { %v1698_v5 = vsel %vm1067_vm5, %v1670_v37, 0.0 }
 0x1d8   : > { %v1699_v11 = vadd.f32 %v1698_v5, %v1697_v59  ;;  %v1624_v29 = vadd.f32 %v1623_v31, %v1622_v15 }
 0x1d9   : > { %v1551_v30 = vpop.permute.xlu1 %1550 }
 0x1da   : > { %v1701_v20 = vadd.f32 %v1700_v2, %v1699_v11  ;;  %v1626_v9 = vadd.f32 %v1625_v55, %v1624_v29 }
 0x1dc   : > { %v1703_v47 = vadd.f32 %v1702_v12, %v1701_v20 }
 0x1e0   : > { %v4068_v44 = vpop.f32.mrf.mxu0 }
 0x1e1   : > { %v2064_v4 = vpack.c.bf16 %v4068_v44, %v4068_v44  ;;  %v1598_v28 = vmul.f32 %v4068_v44, %v1521_v18 }
 0x1e2   : > { %v1381_v3 = vpop.f32.mrf.mxu0 }
 0x1e3   : > { %1863 = vst.msk [vmem:[%s2800_s11 + $0x28] sm:$0xf] %vm1852_vm13, %v2064_v4  ;;  %v2062_v61 = vpack.c.bf16 %v1381_v3, %v1381_v3  ;;  %v1596_v0 = vmul.f32 %v1511_v24, %v1381_v3  ;;  %v1675_v60 = vmul.f32 %v4068_v44, %v1598_v28  ;;  %v1536_v4 = vpop.permute.xlu0 %1535 }
 0x1e4   : > { %v4074_v27 = vpop.f32.mrf.mxu0 }
 0x1e5   : > { %1861 = vst.msk [vmem:[%s2800_s11 + $0x20] sm:$0xf] %vm1852_vm13, %v2062_v61  ;;  %v2065_v56 = vpack.c.bf16 %v4074_v27, %v4074_v27  ;;  %v1673_v6 = vmul.f32 %v1596_v0, %v1381_v3  ;;  %v1627_v34 = vsel %vm1067_vm5, %v1596_v0, 0.0  ;;  %v1599_v19 = vmul.f32 %v4074_v27, %v1526_v23 }
 0x1e6   : > { %v1384_v25 = vpop.f32.mrf.mxu0  ;;  %v1628_v54 = vadd.f32 %v1627_v34, %v1626_v9  ;;  %v1631_v61 = vsel %vm1067_vm5, %v1598_v28, 0.0  ;;  %v1708_v21 = vsel %vm1067_vm5, %v1675_v60, 0.0 }
 0x1e7   : > { %1864 = vst.msk [vmem:[%s2800_s11 + $0x2c] sm:$0xf] %vm1852_vm13, %v2065_v56  ;;  %v2063_v26 = vpack.c.bf16 %v1384_v25, %v1384_v25  ;;  %v1597_v48 = vmul.f32 %v1516_v7, %v1384_v25  ;;  %v1704_v33 = vsel %vm1067_vm5, %v1673_v6, 0.0  ;;  %v1633_v58 = vsel %vm1067_vm5, %v1599_v19, 0.0  ;;  %v1546_v22 = vpop.permute.xlu0 %1545 }
 0x1e8   : > { %v1705_v14 = vadd.f32 %v1704_v33, %v1703_v47 }
 0x1e9   : > { %1862 = vst.msk [vmem:[%s2800_s11 + $0x24] sm:$0xf] %vm1852_vm13, %v2063_v26  ;;  %v1674_v42 = vmul.f32 %v1597_v48, %v1384_v25  ;;  %v1629_v8 = vsel %vm1067_vm5, %v1597_v48, 0.0  ;;  %v1676_v25 = vmul.f32 %v4074_v27, %v1599_v19 }
 0x1ea   : > { %v1630_v38 = vadd.f32 %v1629_v8, %v1628_v54 }
 0x1eb   : > { %v1706_v36 = vsel %vm1067_vm5, %v1674_v42, 0.0  ;;  %v1710_v52 = vsel %vm1067_vm5, %v1676_v25, 0.0  ;;  %v1556_v29 = vpop.permute.xlu0 %1555 }
 0x1ec   : > { %v1707_v3 = vadd.f32 %v1706_v36, %v1705_v14  ;;  %v1632_v26 = vadd.f32 %v1631_v61, %v1630_v38 }
 0x1ee   : > { %v1709_v46 = vadd.f32 %v1708_v21, %v1707_v3  ;;  %v1634_v1 = vadd.f32 %v1633_v58, %v1632_v26 }
 0x1ef   : > { %v1566_v9 = vpop.permute.xlu0 %1565 }
 0x1f0   : > { %v1711_v15 = vadd.f32 %v1710_v52, %v1709_v46 }
 0x1f4   : > { %v4087_v45 = vpop.f32.mrf.mxu1 }
 0x1f5   : > { %v2068_v62 = vpack.c.bf16 %v4087_v45, %v4087_v45  ;;  %v1602_v50 = vmul.f32 %v4087_v45, %v1541_v43 }
 0x1f6   : > { %v1397_v40 = vpop.f32.mrf.mxu1 }
 0x1f7   : > { %1867 = vst.msk [vmem:[%s2800_s11 + $0x38] sm:$0xf] %vm1852_vm13, %v2068_v62  ;;  %v2066_v49 = vpack.c.bf16 %v1397_v40, %v1397_v40  ;;  %v1600_v63 = vmul.f32 %v1531_v35, %v1397_v40  ;;  %v1679_v7 = vmul.f32 %v4087_v45, %v1602_v50  ;;  %v1639_v2 = vsel %vm1067_vm5, %v1602_v50, 0.0  ;;  %v1561_v45 = vpop.permute.xlu1 %1560 }
 0x1f8   : > { %v4094_v57 = vpop.f32.mrf.mxu1 }
 0x1f9   : > { %1865 = vst.msk [vmem:[%s2800_s11 + $0x30] sm:$0xf] %vm1852_vm13, %v2066_v49  ;;  %v2069_v10 = vpack.c.bf16 %v4094_v57, %v4094_v57  ;;  %v1677_v13 = vmul.f32 %v1600_v63, %v1397_v40  ;;  %v1635_v44 = vsel %vm1067_vm5, %v1600_v63, 0.0  ;;  %v1603_v31 = vmul.f32 %v4094_v57, %v1546_v22  ;;  %v1576_v63 = vpop.permute.xlu0 %1575 }
 0x1fa   : > { %v1400_v17 = vpop.f32.mrf.mxu1  ;;  %v1636_v59 = vadd.f32 %v1635_v44, %v1634_v1  ;;  %v1716_v20 = vsel %vm1067_vm5, %v1679_v7, 0.0 }
 0x1fb   : > { %1868 = vst.msk [vmem:[%s2800_s11 + $0x3c] sm:$0xf] %vm1852_vm13, %v2069_v10  ;;  %v2067_v51 = vpack.c.bf16 %v1400_v17, %v1400_v17  ;;  %v1601_v56 = vmul.f32 %v1536_v4, %v1400_v17  ;;  %v1712_v41 = vsel %vm1067_vm5, %v1677_v13, 0.0  ;;  %v1680_v18 = vmul.f32 %v4094_v57, %v1603_v31  ;;  %v1571_v14 = vpop.permute.xlu1 %1570 }
 0x1fc   : > { %v1713_v53 = vadd.f32 %v1712_v41, %v1711_v15  ;;  %v1641_v34 = vsel %vm1067_vm5, %v1603_v31, 0.0 }
 0x1fd   : > { %1866 = vst.msk [vmem:[%s2800_s11 + $0x34] sm:$0xf] %vm1852_vm13, %v2067_v51  ;;  %v1678_v16 = vmul.f32 %v1601_v56, %v1400_v17  ;;  %v1637_v5 = vsel %vm1067_vm5, %v1601_v56, 0.0  ;;  %v1718_v28 = vsel %vm1067_vm5, %v1680_v18, 0.0  ;;  %v1586_v1 = vpop.permute.xlu0 %1585 }
 0x1fe   : > { %v1638_v0 = vadd.f32 %v1637_v5, %v1636_v59 }
 0x1ff   : > { %v1714_v40 = vsel %vm1067_vm5, %v1678_v16, 0.0  ;;  %v1581_v58 = vpop.permute.xlu1 %1580 }
 0x200   : > { %v1715_v10 = vadd.f32 %v1714_v40, %v1713_v53  ;;  %v1640_v6 = vadd.f32 %v1639_v2, %v1638_v0 }
 0x202   : > { %v1717_v55 = vadd.f32 %v1716_v20, %v1715_v10  ;;  %v1642_v12 = vadd.f32 %v1641_v34, %v1640_v6 }
 0x204   : > { %v1719_v36 = vadd.f32 %v1718_v28, %v1717_v55 }
 0x208   : > { %v2117_v32 = vpop.f32.mrf.mxu1 }
 0x209   : > { %v2072_v37 = vpack.c.bf16 %v2117_v32, %v2117_v32  ;;  %v1606_v33 = vmul.f32 %v2117_v32, %v1561_v45 }
 0x20a   : > { %v1413_v27 = vpop.f32.mrf.mxu1 }
 0x20b   : > { %1871 = vst.msk [vmem:[%s2800_s11 + $0x48] sm:$0xf] %vm1852_vm13, %v2072_v37  ;;  %v2070_v62 = vpack.c.bf16 %v1413_v27, %v1413_v27  ;;  %v1604_v48 = vmul.f32 %v1551_v30, %v1413_v27  ;;  %v1683_v38 = vmul.f32 %v2117_v32, %v1606_v33  ;;  %v1647_v61 = vsel %vm1067_vm5, %v1606_v33, 0.0 }
 0x20c   : > { %v2118_v24 = vpop.f32.mrf.mxu1 }
 0x20d   : > { %1869 = vst.msk [vmem:[%s2800_s11 + $0x40] sm:$0xf] %vm1852_vm13, %v2070_v62  ;;  %v2073_v49 = vpack.c.bf16 %v2118_v24, %v2118_v24  ;;  %v1681_v51 = vmul.f32 %v1604_v48, %v1413_v27  ;;  %v1643_v42 = vsel %vm1067_vm5, %v1604_v48, 0.0  ;;  %v1607_v60 = vmul.f32 %v2118_v24, %v1566_v9 }
 0x20e   : > { %v1416_v11 = vpop.f32.mrf.mxu1  ;;  %v1644_v47 = vadd.f32 %v1643_v42, %v1642_v12  ;;  %v1724_v21 = vsel %vm1067_vm5, %v1683_v38, 0.0 }
 0x20f   : > { %1872 = vst.msk [vmem:[%s2800_s11 + $0x4c] sm:$0xf] %vm1852_vm13, %v2073_v49  ;;  %v2071_v17 = vpack.c.bf16 %v1416_v11, %v1416_v11  ;;  %v1605_v39 = vmul.f32 %v1556_v29, %v1416_v11  ;;  %v1720_v8 = vsel %vm1067_vm5, %v1681_v51, 0.0  ;;  %v1684_v13 = vmul.f32 %v2118_v24, %v1607_v60 }
 0x210   : > { %v1721_v35 = vadd.f32 %v1720_v8, %v1719_v36  ;;  %v1649_v16 = vsel %vm1067_vm5, %v1607_v60, 0.0  ;;  %v1742_v36 = vld [vmem:[%s2792_s28] sm:$0x3] }
 0x211   : > { %1870 = vst.msk [vmem:[%s2800_s11 + $0x44] sm:$0xf] %vm1852_vm13, %v2071_v17  ;;  %v1682_v23 = vmul.f32 %v1605_v39, %v1416_v11  ;;  %v1645_v54 = vsel %vm1067_vm5, %v1605_v39, 0.0  ;;  %v1726_v5 = vsel %vm1067_vm5, %v1684_v13, 0.0 }
 0x212   : > { %v1646_v19 = vadd.f32 %v1645_v54, %v1644_v47 }
 0x213   : > { %v1722_v57 = vsel %vm1067_vm5, %v1682_v23, 0.0 }
 0x214   : > { %v1723_v4 = vadd.f32 %v1722_v57, %v1721_v35  ;;  %v1648_v25 = vadd.f32 %v1647_v61, %v1646_v19 }
 0x216   : > { %v1725_v44 = vadd.f32 %v1724_v21, %v1723_v4  ;;  %v1650_v27 = vadd.f32 %v1649_v16, %v1648_v25 }
 0x218   : > { %v1727_v40 = vadd.f32 %v1726_v5, %v1725_v44 }
 0x21c   : > { %v2121_v3 = vpop.f32.mrf.mxu1 }
 0x21d   : > { %v2076_v56 = vpack.c.bf16 %v2121_v3, %v2121_v3  ;;  %v1610_v37 = vmul.f32 %v2121_v3, %v1581_v58 }
 0x21e   : > { %v1429_v26 = vpop.f32.mrf.mxu1 }
 0x21f   : > { %1875 = vst.msk [vmem:[%s2800_s11 + $0x58] sm:$0xf] %vm1852_vm13, %v2076_v56  ;;  %v1608_v46 = vmul.f32 %v1571_v14, %v1429_v26  ;;  %v2074_v43 = vpack.c.bf16 %v1429_v26, %v1429_v26  ;;  %v1687_v53 = vmul.f32 %v2121_v3, %v1610_v37  ;;  %v1655_v31 = vsel %vm1067_vm5, %v1610_v37, 0.0 }
 0x220   : > { %v2122_v32 = vpop.f32.mrf.mxu1 }
 0x221   : > { %v1651_v52 = vsel %vm1067_vm5, %v1608_v46, 0.0  ;;  %v1685_v22 = vmul.f32 %v1608_v46, %v1429_v26  ;;  %1873 = vst.msk [vmem:[%s2800_s11 + $0x50] sm:$0xf] %vm1852_vm13, %v2074_v43  ;;  %v2077_v50 = vpack.c.bf16 %v2122_v32, %v2122_v32  ;;  %v1611_v59 = vmul.f32 %v2122_v32, %v1586_v1 }
 0x222   : > { %v1432_v41 = vpop.f32.mrf.mxu1  ;;  %v1652_v24 = vadd.f32 %v1651_v52, %v1650_v27  ;;  %v1732_v2 = vsel %vm1067_vm5, %v1687_v53, 0.0 }
 0x223   : > { %v1728_v62 = vsel %vm1067_vm5, %v1685_v22, 0.0  ;;  %v1609_v15 = vmul.f32 %v1576_v63, %v1432_v41  ;;  %1876 = vst.msk [vmem:[%s2800_s11 + $0x5c] sm:$0xf] %vm1852_vm13, %v2077_v50  ;;  %v2075_v30 = vpack.c.bf16 %v1432_v41, %v1432_v41  ;;  %v1688_v48 = vmul.f32 %v2122_v32, %v1611_v59 }
 0x224   : > { %v1729_v11 = vadd.f32 %v1728_v62, %v1727_v40  ;;  %v1657_v39 = vsel %vm1067_vm5, %v1611_v59, 0.0 }
 0x225   : > { %v1653_v0 = vsel %vm1067_vm5, %v1609_v15, 0.0  ;;  %v1686_v49 = vmul.f32 %v1609_v15, %v1432_v41  ;;  %1874 = vst.msk [vmem:[%s2800_s11 + $0x54] sm:$0xf] %vm1852_vm13, %v2075_v30  ;;  %v1734_v18 = vsel %vm1067_vm5, %v1688_v48, 0.0 }
 0x226   : > { %v1654_v7 = vadd.f32 %v1653_v0, %v1652_v24 }
 0x227   : > { %v1730_v29 = vsel %vm1067_vm5, %v1686_v49, 0.0 }
 0x228   : > { %v1656_v10 = vadd.f32 %v1655_v31, %v1654_v7  ;;  %v1731_v17 = vadd.f32 %v1730_v29, %v1729_v11 }
 0x22a   : > { %v1658_v6 = vadd.f32 %v1657_v39, %v1656_v10  ;;  %v1733_v20 = vadd.f32 %v1732_v2, %v1731_v17 }
 0x22c   : > { %v1659_v51 = vrot.slane %v1658_v6, 4  ;;  %v1735_v45 = vadd.f32 %v1734_v18, %v1733_v20 }
 0x22e   : > { %v1660_v55 = vadd.f32 %v1659_v51, %v1658_v6  ;;  %v1736_v34 = vrot.slane %v1735_v45, 4 }
 0x230   : > { %v1661_v42 = vrot.slane %v1660_v55, 2  ;;  %v1737_v23 = vadd.f32 %v1736_v34, %v1735_v45 }
 0x232   : > { %v1662_v9 = vadd.f32 %v1661_v42, %v1660_v55  ;;  %v1738_v12 = vrot.slane %v1737_v23, 2 }
 0x234   : > { %v1663_v28 = vrot.slane %v1662_v9, 1  ;;  %v1739_v33 = vadd.f32 %v1738_v12, %v1737_v23 }
 0x236   : > { %v1740_v8 = vrot.slane %v1739_v33, 1  ;;  %v1664_v54 = vadd.f32 %v1663_v28, %v1662_v9 }
 0x238   : > { %v1741_v47 = vadd.f32 %v1740_v8, %v1739_v33 }
 0x23a   : > { %v1744_v57 = vsel %vm1743_vm14, %v1664_v54, %v1741_v47 }
 0x23b   : > { %v1745_v14 = vadd.f32 %v1744_v57, %v1742_v36 }
 0x23d   : > { %1747 = vst.msk [vmem:[%s2792_s28] sm:$0x3] %vm1746_vm15, %v1745_v14 }
 0x23e PF: > { %s15_s19 = sadd.s32 1, %s2719_s19   ;;  %s4380_s15 = smov %s2711_s17 }
 0x23f   : > { %p12_p8 = scmp.ge.s32.totalorder %s15_s19, 6   ;;  %s4381_s16 = smov %s2715_s18 }
 0x240   : > { %s4382_s17 = smov %s4385_s20  ;;  %s4383_s18 = smov %s4389_s21 }
 0x241   :  { %14 = sbr.rel (!%p12_p8) target bundleno = 3 (0x3), region = 79 }

</bundles_post_ra>
